<compile_context>
chip_gen: v7x
topology: tpu7x:2x2x1
jax: 0.10.0
libtpu: 0.0.40
codegen_flags: <defaults>
</compile_context>

<pallas_src>
import functools

import jax
import jax.numpy as jnp
from jax.experimental import pallas as pl
from jax.experimental.pallas import tpu as pltpu


def _round_up(x, m):
    return ((x + m - 1) // m) * m


# ------------------------------------------------------------------------------ kernel
def _mlp_kernel(x_ref, w1, b1, w2, b2, w3, b3, w4, b4, w5, b5, o_ref, *, act_dtype):
    """Fused 5-layer MLP forward for one batch tile; everything stays in VMEM/vregs.

        y = cos(tanh(tanh(tanh(x@W1+b1)@W2+b2)@W3+b3) @ W4' + b4') @ W5 + b5
    with W4' = rate*W4, b4' = rate*b4 folded in at prep time (row-vector convention).
    Matmuls run at the weights' dtype (bf16 by default) with f32 accumulation; bias adds
    in f32; tanh/cos in `act_dtype`.
    """

    def layer(h, w, b):
        return jnp.dot(h.astype(w.dtype), w[...],
                       preferred_element_type=jnp.float32) + b[...]

    h = jnp.tanh(layer(x_ref[...], w1, b1).astype(act_dtype))
    h = jnp.tanh(layer(h, w2, b2).astype(act_dtype))
    h = jnp.tanh(layer(h, w3, b3).astype(act_dtype))
    h = jnp.cos(layer(h, w4, b4).astype(act_dtype))          # rate already folded in
    o_ref[...] = layer(h, w5, b5).astype(o_ref.dtype)


# ------------------------------------------------------------------------------ prep
def prepare_mlp_params(params, rate=1.0, matmul_dtype=jnp.bfloat16):
    """One-time weight preprocessing (hoisted out of the per-call hot path)."""
    D = params["w1"].shape[0]
    O = params["w5"].shape[1]
    Dp = _round_up(D, 128)        # 257 -> 384 (zero rows in W1 make the pad exact)
    Op = _round_up(O, 128)        # 2   -> 128 (lane-dense output store)
    mm = matmul_dtype
    rate = jnp.float32(rate)

    def row(b):                    # biases as (1, N) f32 rows for in-kernel broadcasting
        return b.astype(jnp.float32).reshape(1, -1)

    return dict(
        w1=jnp.pad(params["w1"].astype(jnp.float32), ((0, Dp - D), (0, 0))).astype(mm),
        b1=row(params["b1"]),
        w2=params["w2"].astype(mm), b2=row(params["b2"]),
        w3=params["w3"].astype(mm), b3=row(params["b3"]),
        w4=(params["w4"].astype(jnp.float32) * rate).astype(mm),
        b4=row(params["b4"]) * rate,
        w5=jnp.pad(params["w5"].astype(jnp.float32), ((0, 0), (0, Op - O))).astype(mm),
        b5=row(jnp.pad(params["b5"].astype(jnp.float32), ((0, Op - O),))),
        out_dim=O,                 # plain python int (static)
    )


def _default_act_dtype():
    """bf16 tanh/cos only where the VPU/EUP have a bf16 path (v6e / v7x)."""
    try:
        kind = jax.devices()[0].device_kind.lower()
    except Exception:
        return jnp.float32
    return jnp.bfloat16 if ("v6" in kind or "v7" in kind) else jnp.float32


# ------------------------------------------------------------------------------ forward
@functools.partial(jax.jit, static_argnames=("tm", "act_dtype", "out_dim"))
def _mlp_forward_jit(x, w, *, tm, act_dtype, out_dim):
    B, D = x.shape
    Dp, D1 = w["w1"].shape
    D2 = w["w2"].shape[1]
    D3 = w["w3"].shape[1]
    D4 = w["w4"].shape[1]
    Op = w["w5"].shape[1]
    mm = w["w1"].dtype

    # Batch tiling: big tile to amortize per-step overhead, but guarantee >= 2 grid
    # steps when there is enough work so the v7x second TensorCore is not idle.
    B8 = _round_up(B, 8)
    tm = max(8, min(_round_up(tm, 8), B8))
    if B8 >= 16 and pl.cdiv(B8, tm) < 2:
        tm = _round_up(pl.cdiv(B8, 2), 8)
    grid = (pl.cdiv(B, tm),)

    # Only per-call input prep: feature pad 257 -> 384 fused with the matmul-dtype cast
    # (single pass over x).  No batch pad: ragged last tile is masked; rows >= B are
    # garbage in VMEM but row-independent and never stored.
    x_p = jnp.pad(x.astype(mm), ((0, 0), (0, Dp - D)))

    const = lambda i: (0, 0)       # same block every step -> weights stay VMEM-resident

    flops = 2 * B * (Dp * D1 + D1 * D2 + D2 * D3 + D3 * D4 + D4 * Op)
    transcendentals = B * (D1 + D2 + D3 + D4)
    bytes_accessed = (x_p.size * x_p.dtype.itemsize
                      + sum(v.size * v.dtype.itemsize for v in w.values())
                      + B * Op * 4)

    out = pl.pallas_call(
        functools.partial(_mlp_kernel, act_dtype=act_dtype),
        out_shape=jax.ShapeDtypeStruct((B, Op), jnp.float32),
        grid=grid,
        in_specs=[
            pl.BlockSpec((tm, Dp), lambda i: (i, 0)),        # x batch tile
            pl.BlockSpec((Dp, D1), const), pl.BlockSpec((1, D1), const),
            pl.BlockSpec((D1, D2), const), pl.BlockSpec((1, D2), const),
            pl.BlockSpec((D2, D3), const), pl.BlockSpec((1, D3), const),
            pl.BlockSpec((D3, D4), const), pl.BlockSpec((1, D4), const),
            pl.BlockSpec((D4, Op), const), pl.BlockSpec((1, Op), const),
        ],
        out_specs=pl.BlockSpec((tm, Op), lambda i: (i, 0)),
        compiler_params=pltpu.CompilerParams(
            dimension_semantics=("parallel",),               # megacore sharding on v7x
        ),
        cost_estimate=pl.CostEstimate(
            flops=flops, transcendentals=transcendentals,
            bytes_accessed=bytes_accessed),
    )(x_p,
      w["w1"], w["b1"], w["w2"], w["b2"], w["w3"], w["b3"],
      w["w4"], w["b4"], w["w5"], w["b5"])

    return out[:, :out_dim]


def mlp_forward(x, prepared, *, tm=512, act_dtype=None):
    """Forward pass of the MLP via a single fused Pallas kernel. x: (B, input_dim)."""
    if act_dtype is None:
        act_dtype = _default_act_dtype()
    out_dim = prepared["out_dim"]
    weights = {k: v for k, v in prepared.items() if k != "out_dim"}
    return _mlp_forward_jit(x, weights, tm=tm, act_dtype=act_dtype, out_dim=out_dim)


# ------------------------------------------------------------------------------ params
def init_mlp_params(key, input_dim=257, output=2):
    """Kaiming-uniform (fan_in, leaky_relu gain=sqrt(2)) weights, bias = 0.01, matching
    `weights_init` in the PyTorch module.  Stored as (in, out)."""
    dims = [(input_dim, 512), (512, 512), (512, 512), (512, 256), (256, output)]
    params = {}
    for idx, (fi, fo) in enumerate(dims, start=1):
        key, sub = jax.random.split(key)
        bound = (6.0 / fi) ** 0.5   # gain*sqrt(3/fan_in) with gain=sqrt(2)
        params[f"w{idx}"] = jax.random.uniform(
            sub, (fi, fo), jnp.float32, minval=-bound, maxval=bound)
        params[f"b{idx}"] = jnp.full((fo,), 0.01, jnp.float32)
    return params


# ------------------------------------------------------------------------------ reference
def _ref_forward(x, params, rate=1.0):
    hi = jax.lax.Precision.HIGHEST

    def lin(h, w, b):
        return jnp.dot(h, w, precision=hi) + b

    h = jnp.tanh(lin(x.astype(jnp.float32), params["w1"], params["b1"]))
    h = jnp.tanh(lin(h, params["w2"], params["b2"]))
    h = jnp.tanh(lin(h, params["w3"], params["b3"]))
    h = jnp.cos(lin(h, params["w4"], params["b4"]) * rate)
    return lin(h, params["w5"], params["b5"])


# ------------------------------------------------------------------------------ main
if __name__ == "__main__":
    key = jax.random.PRNGKey(0)
    key, kx = jax.random.split(key)

    B, input_dim, output, rate = 12, 257, 2, 0.7
    x = jax.random.normal(kx, (B, input_dim), jnp.float32)
    params = init_mlp_params(key, input_dim=input_dim, output=output)
    ref = _ref_forward(x, params, rate=rate)

    # 1) f32 path: tight correctness check against the pure-JAX reference
    #    (exercises the ragged last batch tile: B=12 -> tiles of 8).
    prep_f32 = prepare_mlp_params(params, rate=rate, matmul_dtype=jnp.float32)
    out_f32 = jax.block_until_ready(mlp_forward(x, prep_f32, act_dtype=jnp.float32))
    assert out_f32.shape == (B, output), out_f32.shape
    assert jnp.allclose(out_f32, ref, rtol=1e-3, atol=1e-3), \
        float(jnp.max(jnp.abs(out_f32 - ref)))

    # 2) production default: bf16 matmuls (f32 accumulation), looser tolerance.
    prep = prepare_mlp_params(params, rate=rate)             # bf16 weights
    out = jax.block_until_ready(mlp_forward(x, prep))
    assert out.shape == (B, output), out.shape
    assert jnp.allclose(out, ref, rtol=5e-2, atol=5e-2), \
        float(jnp.max(jnp.abs(out - ref)))

    print("KERNEL_OK")
</pallas_src>

<mosaic_0001>
module attributes {stable_mosaic.version = 11 : i64} {
  func.func @_mlp_kernel(%arg0: i32, %arg1: memref<8x384xf32, #tpu.memory_space<vmem>>, %arg2: memref<384x512xf32, #tpu.memory_space<vmem>>, %arg3: memref<1x512xf32, #tpu.memory_space<vmem>>, %arg4: memref<512x512xf32, #tpu.memory_space<vmem>>, %arg5: memref<1x512xf32, #tpu.memory_space<vmem>>, %arg6: memref<512x512xf32, #tpu.memory_space<vmem>>, %arg7: memref<1x512xf32, #tpu.memory_space<vmem>>, %arg8: memref<512x256xf32, #tpu.memory_space<vmem>>, %arg9: memref<1x256xf32, #tpu.memory_space<vmem>>, %arg10: memref<256x128xf32, #tpu.memory_space<vmem>>, %arg11: memref<1x128xf32, #tpu.memory_space<vmem>>, %arg12: memref<8x128xf32, #tpu.memory_space<vmem>>) attributes {dimension_semantics = [#tpu.dimension_semantics<parallel>], iteration_bounds = array<i64: 2>, scalar_prefetch = 0 : i64, scratch_operands = 0 : i64, tpu.core_type = #tpu.core_type<tc>, window_params = [{transform_indices = @transform_0, window_bounds = array<i64: 8, 384>}, {pipeline_mode = #tpu.pipeline_mode<synchronous>, transform_indices = @transform_1, window_bounds = array<i64: 384, 512>}, {pipeline_mode = #tpu.pipeline_mode<synchronous>, transform_indices = @transform_2, window_bounds = array<i64: 1, 512>}, {pipeline_mode = #tpu.pipeline_mode<synchronous>, transform_indices = @transform_3, window_bounds = array<i64: 512, 512>}, {pipeline_mode = #tpu.pipeline_mode<synchronous>, transform_indices = @transform_4, window_bounds = array<i64: 1, 512>}, {pipeline_mode = #tpu.pipeline_mode<synchronous>, transform_indices = @transform_5, window_bounds = array<i64: 512, 512>}, {pipeline_mode = #tpu.pipeline_mode<synchronous>, transform_indices = @transform_6, window_bounds = array<i64: 1, 512>}, {pipeline_mode = #tpu.pipeline_mode<synchronous>, transform_indices = @transform_7, window_bounds = array<i64: 512, 256>}, {pipeline_mode = #tpu.pipeline_mode<synchronous>, transform_indices = @transform_8, window_bounds = array<i64: 1, 256>}, {pipeline_mode = #tpu.pipeline_mode<synchronous>, transform_indices = @transform_9, window_bounds = array<i64: 256, 128>}, {pipeline_mode = #tpu.pipeline_mode<synchronous>, transform_indices = @transform_10, window_bounds = array<i64: 1, 128>}, {transform_indices = @transform_11, window_bounds = array<i64: 8, 128>}]} {
    %c0 = arith.constant 0 : index
    %c0_0 = arith.constant 0 : index
    %0 = vector.load %arg1[%c0, %c0_0] : memref<8x384xf32, #tpu.memory_space<vmem>>, vector<8x384xf32>
    %c0_1 = arith.constant 0 : index
    %c0_2 = arith.constant 0 : index
    %1 = vector.load %arg2[%c0_1, %c0_2] : memref<384x512xf32, #tpu.memory_space<vmem>>, vector<384x512xf32>
    %cst = arith.constant dense<0.000000e+00> : vector<8x512xf32>
    %2 = tpu.matmul %0, %1, %cst {dimension_numbers = #tpu.dot_dimension_numbers<[1], [0], [0], [1], [0, 0, 1, 1], [], []>} : vector<8x384xf32>, vector<384x512xf32>, vector<8x512xf32> -> vector<8x512xf32>
    %c0_3 = arith.constant 0 : index
    %c0_4 = arith.constant 0 : index
    %3 = vector.load %arg3[%c0_3, %c0_4] : memref<1x512xf32, #tpu.memory_space<vmem>>, vector<1x512xf32>
    %4 = vector.broadcast %3 : vector<1x512xf32> to vector<8x512xf32>
    %5 = arith.addf %2, %4 : vector<8x512xf32>
    %6 = math.tanh %5 : vector<8x512xf32>
    %c0_5 = arith.constant 0 : index
    %c0_6 = arith.constant 0 : index
    %7 = vector.load %arg4[%c0_5, %c0_6] : memref<512x512xf32, #tpu.memory_space<vmem>>, vector<512x512xf32>
    %cst_7 = arith.constant dense<0.000000e+00> : vector<8x512xf32>
    %8 = tpu.matmul %6, %7, %cst_7 {dimension_numbers = #tpu.dot_dimension_numbers<[1], [0], [0], [1], [0, 0, 1, 1], [], []>} : vector<8x512xf32>, vector<512x512xf32>, vector<8x512xf32> -> vector<8x512xf32>
    %c0_8 = arith.constant 0 : index
    %c0_9 = arith.constant 0 : index
    %9 = vector.load %arg5[%c0_8, %c0_9] : memref<1x512xf32, #tpu.memory_space<vmem>>, vector<1x512xf32>
    %10 = vector.broadcast %9 : vector<1x512xf32> to vector<8x512xf32>
    %11 = arith.addf %8, %10 : vector<8x512xf32>
    %12 = math.tanh %11 : vector<8x512xf32>
    %c0_10 = arith.constant 0 : index
    %c0_11 = arith.constant 0 : index
    %13 = vector.load %arg6[%c0_10, %c0_11] : memref<512x512xf32, #tpu.memory_space<vmem>>, vector<512x512xf32>
    %cst_12 = arith.constant dense<0.000000e+00> : vector<8x512xf32>
    %14 = tpu.matmul %12, %13, %cst_12 {dimension_numbers = #tpu.dot_dimension_numbers<[1], [0], [0], [1], [0, 0, 1, 1], [], []>} : vector<8x512xf32>, vector<512x512xf32>, vector<8x512xf32> -> vector<8x512xf32>
    %c0_13 = arith.constant 0 : index
    %c0_14 = arith.constant 0 : index
    %15 = vector.load %arg7[%c0_13, %c0_14] : memref<1x512xf32, #tpu.memory_space<vmem>>, vector<1x512xf32>
    %16 = vector.broadcast %15 : vector<1x512xf32> to vector<8x512xf32>
    %17 = arith.addf %14, %16 : vector<8x512xf32>
    %18 = math.tanh %17 : vector<8x512xf32>
    %c0_15 = arith.constant 0 : index
    %c0_16 = arith.constant 0 : index
    %19 = vector.load %arg8[%c0_15, %c0_16] : memref<512x256xf32, #tpu.memory_space<vmem>>, vector<512x256xf32>
    %cst_17 = arith.constant dense<0.000000e+00> : vector<8x256xf32>
    %20 = tpu.matmul %18, %19, %cst_17 {dimension_numbers = #tpu.dot_dimension_numbers<[1], [0], [0], [1], [0, 0, 1, 1], [], []>} : vector<8x512xf32>, vector<512x256xf32>, vector<8x256xf32> -> vector<8x256xf32>
    %c0_18 = arith.constant 0 : index
    %c0_19 = arith.constant 0 : index
    %21 = vector.load %arg9[%c0_18, %c0_19] : memref<1x256xf32, #tpu.memory_space<vmem>>, vector<1x256xf32>
    %22 = vector.broadcast %21 : vector<1x256xf32> to vector<8x256xf32>
    %23 = arith.addf %20, %22 : vector<8x256xf32>
    %24 = math.cos %23 : vector<8x256xf32>
    %c0_20 = arith.constant 0 : index
    %c0_21 = arith.constant 0 : index
    %25 = vector.load %arg10[%c0_20, %c0_21] : memref<256x128xf32, #tpu.memory_space<vmem>>, vector<256x128xf32>
    %cst_22 = arith.constant dense<0.000000e+00> : vector<8x128xf32>
    %26 = tpu.matmul %24, %25, %cst_22 {dimension_numbers = #tpu.dot_dimension_numbers<[1], [0], [0], [1], [0, 0, 1, 1], [], []>} : vector<8x256xf32>, vector<256x128xf32>, vector<8x128xf32> -> vector<8x128xf32>
    %c0_23 = arith.constant 0 : index
    %c0_24 = arith.constant 0 : index
    %27 = vector.load %arg11[%c0_23, %c0_24] : memref<1x128xf32, #tpu.memory_space<vmem>>, vector<1x128xf32>
    %28 = vector.broadcast %27 : vector<1x128xf32> to vector<8x128xf32>
    %29 = arith.addf %26, %28 : vector<8x128xf32>
    %c0_25 = arith.constant 0 : index
    %c0_26 = arith.constant 0 : index
    %30 = vector.load %arg12[%c0_25, %c0_26] : memref<8x128xf32, #tpu.memory_space<vmem>>, vector<8x128xf32>
    tpu.vector_store %arg12[%c0_25, %c0_26], %29 {strides = array<i32>} : memref<8x128xf32, #tpu.memory_space<vmem>>, vector<8x128xf32>,
    return
  }
  func.func @transform_0(%arg0: i32) -> (i32, i32) {
    %c0_i32 = arith.constant 0 : i32
    %c0_i32_0 = arith.constant 0 : i32
    return %arg0, %c0_i32 : i32, i32
  }
  func.func @transform_1(%arg0: i32) -> (i32, i32) {
    %c0_i32 = arith.constant 0 : i32
    %c0_i32_0 = arith.constant 0 : i32
    %c0_i32_1 = arith.constant 0 : i32
    return %c0_i32, %c0_i32_0 : i32, i32
  }
  func.func @transform_2(%arg0: i32) -> (i32, i32) {
    %c0_i32 = arith.constant 0 : i32
    %c0_i32_0 = arith.constant 0 : i32
    %c0_i32_1 = arith.constant 0 : i32
    return %c0_i32, %c0_i32_0 : i32, i32
  }
  func.func @transform_3(%arg0: i32) -> (i32, i32) {
    %c0_i32 = arith.constant 0 : i32
    %c0_i32_0 = arith.constant 0 : i32
    %c0_i32_1 = arith.constant 0 : i32
    return %c0_i32, %c0_i32_0 : i32, i32
  }
  func.func @transform_4(%arg0: i32) -> (i32, i32) {
    %c0_i32 = arith.constant 0 : i32
    %c0_i32_0 = arith.constant 0 : i32
    %c0_i32_1 = arith.constant 0 : i32
    return %c0_i32, %c0_i32_0 : i32, i32
  }
  func.func @transform_5(%arg0: i32) -> (i32, i32) {
    %c0_i32 = arith.constant 0 : i32
    %c0_i32_0 = arith.constant 0 : i32
    %c0_i32_1 = arith.constant 0 : i32
    return %c0_i32, %c0_i32_0 : i32, i32
  }
  func.func @transform_6(%arg0: i32) -> (i32, i32) {
    %c0_i32 = arith.constant 0 : i32
    %c0_i32_0 = arith.constant 0 : i32
    %c0_i32_1 = arith.constant 0 : i32
    return %c0_i32, %c0_i32_0 : i32, i32
  }
  func.func @transform_7(%arg0: i32) -> (i32, i32) {
    %c0_i32 = arith.constant 0 : i32
    %c0_i32_0 = arith.constant 0 : i32
    %c0_i32_1 = arith.constant 0 : i32
    return %c0_i32, %c0_i32_0 : i32, i32
  }
  func.func @transform_8(%arg0: i32) -> (i32, i32) {
    %c0_i32 = arith.constant 0 : i32
    %c0_i32_0 = arith.constant 0 : i32
    %c0_i32_1 = arith.constant 0 : i32
    return %c0_i32, %c0_i32_0 : i32, i32
  }
  func.func @transform_9(%arg0: i32) -> (i32, i32) {
    %c0_i32 = arith.constant 0 : i32
    %c0_i32_0 = arith.constant 0 : i32
    %c0_i32_1 = arith.constant 0 : i32
    return %c0_i32, %c0_i32_0 : i32, i32
  }
  func.func @transform_10(%arg0: i32) -> (i32, i32) {
    %c0_i32 = arith.constant 0 : i32
    %c0_i32_0 = arith.constant 0 : i32
    %c0_i32_1 = arith.constant 0 : i32
    return %c0_i32, %c0_i32_0 : i32, i32
  }
  func.func @transform_11(%arg0: i32) -> (i32, i32) {
    %c0_i32 = arith.constant 0 : i32
    %c0_i32_0 = arith.constant 0 : i32
    return %arg0, %c0_i32 : i32, i32
  }
}

</mosaic_0001>

<bundles_post_ra>
// kernel: _mlp_forward_jit.1
= control target key start
LH: loop header
LB: loop body
LE: loop exit
PB: predicated region body
PF: predicated region fallthrough
CT: control target
= control target key end

     0   :  { %s4461_s0 = inlined_call_operand.vmem [shape: f32[12,384], index: 0, kind: input, shape index: {}]   ;;  %s4462_s1 = inlined_call_operand.hbm [shape: f32[384,512], index: 1, kind: input, shape index: {}]   ;;  %s4463_s2 = inlined_call_operand.vmem [shape: f32[1,512], index: 2, kind: input, shape index: {}]   ;;  %s4464_s3 = inlined_call_operand.hbm [shape: f32[512,512], index: 3, kind: input, shape index: {}]   ;;  %s4465_s4 = inlined_call_operand.vmem [shape: f32[1,512], index: 4, kind: input, shape index: {}]   ;;  %s4466_s5 = inlined_call_operand.hbm [shape: f32[512,512], index: 5, kind: input, shape index: {}]   ;;  %s4467_s6 = inlined_call_operand.vmem [shape: f32[1,512], index: 6, kind: input, shape index: {}]   ;;  %s4468_s7 = inlined_call_operand.hbm [shape: f32[512,256], index: 7, kind: input, shape index: {}]   ;;  %s4469_s8 = inlined_call_operand.vmem [shape: f32[1,256], index: 8, kind: input, shape index: {}]   ;;  %s4470_s9 = inlined_call_operand.hbm [shape: f32[256,128], index: 9, kind: input, shape index: {}]   ;;  %s4471_s10 = inlined_call_operand.vmem [shape: f32[1,128], index: 10, kind: input, shape index: {}]   ;;  %s4472_s11 = inlined_call_operand.vmem [shape: f32[12,128], index: 11, kind: output, shape index: {}]  }
   0x1   :  { %4479 = sst [smem:[#allocation13_spill]] %s4464_s3 }
   0x2   :  { %16 = vsyncpa [#allocation3], 0 }
   0x3   :  { %17 = vsyncpa [#allocation5], 0 }
   0x4   :  { %18 = vsyncpa [#allocation8], 0  ;;  %s4102_s17 = smov 0  }
   0x5 LB: > { %s4108_s18 = sadd.s32 4294967295, %s4022_s17   ;;  %p2798_p0 = scmp.ge.s32.totalorder %s4022_s17, 1  ;;  %s4022_s17 = sphi %s4102_s17, %s24_s17  }
   0x6   : > { %p291_p1 = scmp.lt.s32.totalorder %s4022_s17, 3  ;;  %p4477_p2 = scmp.eq.s32.totalorder %s4108_s18, 0 }
   0x7   : > { %s4024_s20 = smov [#allocation4]   ;;  %s4025_s22 = smov [#allocation7]  }
   0x8   : > { %p4113_p3 = pnand %p2798_p0, %p291_p1  ;;  %s319_s21 = sshll.u32 %s4024_s20, 4  ;;  %s4117_s21 = int_to_ptr.vmem [resolvable:$true] %s319_s21 }
   0x9   : > { %s351_s23 = sshll.u32 %s4025_s22, 4  ;;  %s4026_s25 = smov [#allocation2]   ;;  %s4121_s23 = int_to_ptr.vmem [resolvable:$true] %s351_s23 }
   0xa   : > { %s4480_s19 = scalar_select %p4113_p3, 1, 0 }
   0xb   : > { %p3780_p4 = pneg %p4113_p3  ;;  %s4129_s26 = sshll.u32 %s4026_s25, 4  ;;  %s304_s26 = int_to_ptr.vmem [resolvable:$true] %s4129_s26 }
   0xc   : > { %s4482_s3 = sld [smem:[#allocation13_spill]] }
   0xd   : > { %p4125_p5 = pnand %p4477_p2, %p3780_p4 }
   0xf   : > { %p4139_p7 = pneg %p4125_p5 }
  0x12   : > { %s3864_s29 = scalar_lea.hbm %s4482_s3, 32768 }
  0x13   : > { %p3865_p6 = scmp.ne.s32.totalorder %s4482_s3, %s3864_s29  ;;  %p3871_p10 = scmp.lt.u32.totalorder %s3864_s29, %s4482_s3 }
  0x15   : > { %p3867_p8 = pnand %p4139_p7, %p3865_p6 }
  0x17   : > { %p3868_p9 = pneg %p3867_p8 }
  0x19   : > { %p3873_p11 = pnand %p3871_p10, %p3868_p9 }
  0x1b   : > { %3876 = shalt.err (!%p3873_p11)
}
  0x1c   : > { %s3877_s16 = scalar_lea.vmem %s4117_s21, 32768  ;;  %p3885_p1 = scmp.lt.s32.totalorder %s4117_s21, %s4117_s21 }
  0x1d   : > { %p3878_p12 = scmp.ne.s32.totalorder %s4117_s21, %s3877_s16  ;;  %p3886_p4 = scmp.lt.s32.totalorder %s3877_s16, %s3877_s16 }
  0x1f   : > { %p3880_p13 = pnand %p3878_p12, %p4139_p7  ;;  %p3887_p6 = por %p3886_p4, %p3885_p1 }
  0x21   : > { %p3881_p0 = pneg %p3880_p13 }
  0x23   : > { %p3888_p8 = pnand %p3887_p6, %p3881_p0 }
  0x25   : > { %3891 = shalt.err (!%p3888_p8)
}
  0x26   : > { %s4473_s20 = smov 512   ;;  %s4475_s22 = smov 32  }
  0x27   : > { %3786 = dma.hbm_to_vmem [thread:$0]  (!%p4125_p5), %s4482_s3, 32768, %s4117_s21, [#allocation5], %s4473_s20, %s4473_s20, %s4475_s22  }
  0x28   : > { %s3892_s30 = scalar_lea.hbm %s4468_s7, 16384 }
  0x29   : > { %p3893_p9 = scmp.ne.s32.totalorder %s4468_s7, %s3892_s30  ;;  %p3899_p12 = scmp.lt.u32.totalorder %s3892_s30, %s4468_s7 }
  0x2b   : > { %p3895_p10 = pnand %p3893_p9, %p4139_p7 }
  0x2d   : > { %p3896_p11 = pneg %p3895_p10 }
  0x2f   : > { %p3901_p13 = pnand %p3899_p12, %p3896_p11 }
  0x31   : > { %3904 = shalt.err (!%p3901_p13)
}
  0x32   : > { %s3905_s21 = scalar_lea.vmem %s4121_s23, 16384  ;;  %p3913_p6 = scmp.lt.s32.totalorder %s4121_s23, %s4121_s23 }
  0x33   : > { %p3906_p0 = scmp.ne.s32.totalorder %s4121_s23, %s3905_s21  ;;  %p3914_p8 = scmp.lt.s32.totalorder %s3905_s21, %s3905_s21 }
  0x35   : > { %p3908_p1 = pnand %p3906_p0, %p4139_p7  ;;  %p3915_p9 = por %p3914_p8, %p3913_p6 }
  0x37   : > { %p3909_p4 = pneg %p3908_p1 }
  0x39   : > { %p3916_p10 = pnand %p3915_p9, %p3909_p4 }
  0x3b   : > { %3919 = shalt.err (!%p3916_p10)
}
  0x3c   : > { %s4029_s25 = smov 256   ;;  %s4030_s27 = smov 16  }
  0x3d   : > { %3792 = dma.hbm_to_vmem [thread:$0]  (!%p4125_p5), %s4468_s7, 16384, %s4121_s23, [#allocation8], %s4029_s25, %s4029_s25, %s4030_s27  }
  0x3e   : > { %s4031_s30 = smov [#allocation6]   ;;  %s3920_s16 = scalar_lea.hbm %s4462_s1, 24576 }
  0x3f   : > { %s335_s12 = sshll.u32 %s4031_s30, 4  ;;  %p3921_p11 = scmp.ne.s32.totalorder %s4462_s1, %s3920_s16  ;;  %s336_s12 = int_to_ptr.vmem [resolvable:$true] %s335_s12 }
  0x40   : > { %p3927_p0 = scmp.lt.u32.totalorder %s3920_s16, %s4462_s1 }
  0x41   : > { %p3923_p12 = pnand %p3921_p11, %p4139_p7 }
  0x43   : > { %p3924_p13 = pneg %p3923_p12 }
  0x45   : > { %p3929_p1 = pnand %p3927_p0, %p3924_p13 }
  0x47   : > { %3932 = shalt.err (!%p3929_p1)
}
  0x48   : > { %s3933_s23 = scalar_lea.vmem %s304_s26, 24576  ;;  %p3941_p9 = scmp.lt.s32.totalorder %s304_s26, %s304_s26 }
  0x49   : > { %p3934_p4 = scmp.ne.s32.totalorder %s304_s26, %s3933_s23  ;;  %p3942_p10 = scmp.lt.s32.totalorder %s3933_s23, %s3933_s23 }
  0x4b   : > { %p3936_p6 = pnand %p3934_p4, %p4139_p7  ;;  %p3943_p2 = por %p3942_p10, %p3941_p9 }
  0x4d   : > { %p3937_p8 = pneg %p3936_p6 }
  0x4f   : > { %p3944_p3 = pnand %p3943_p2, %p3937_p8 }
  0x51   : > { %3947 = shalt.err (!%p3944_p3)
}
  0x52   : > { %s4484_s20 = smov 32   ;;  %s4485_s25 = smov 512  }
  0x53   : > { %3783 = dma.hbm_to_vmem [thread:$0]  (!%p4125_p5), %s4462_s1, 24576, %s304_s26, [#allocation3], %s4485_s25, %s4485_s25, %s4484_s20  }
  0x54   : > { %s3948_s29 = scalar_lea.hbm %s4466_s5, 32768 }
  0x55   : > { %p3949_p2 = scmp.ne.s32.totalorder %s4466_s5, %s3948_s29  ;;  %p3955_p12 = scmp.lt.u32.totalorder %s3948_s29, %s4466_s5 }
  0x57   : > { %p3951_p3 = pnand %p3949_p2, %p4139_p7 }
  0x59   : > { %p3952_p11 = pneg %p3951_p3 }
  0x5b   : > { %p3957_p13 = pnand %p3955_p12, %p3952_p11 }
  0x5d   : > { %3960 = shalt.err (!%p3957_p13)
}
  0x5e   : > { %s3961_s21 = scalar_lea.vmem %s336_s12, 32768  ;;  %p3969_p6 = scmp.lt.s32.totalorder %s336_s12, %s336_s12 }
  0x5f   : > { %p3962_p0 = scmp.ne.s32.totalorder %s336_s12, %s3961_s21  ;;  %p3970_p8 = scmp.lt.s32.totalorder %s3961_s21, %s3961_s21 }
  0x61   : > { %p3964_p1 = pnand %p3962_p0, %p4139_p7  ;;  %p3971_p9 = por %p3970_p8, %p3969_p6 }
  0x63   : > { %p3965_p4 = pneg %p3964_p1 }
  0x65   : > { %p3972_p10 = pnand %p3971_p9, %p3965_p4 }
  0x67   : > { %3975 = shalt.err (!%p3972_p10)
}
  0x68   : > { %3789 = dma.hbm_to_vmem [thread:$0]  (!%p4125_p5), %s4466_s5, 32768, %s336_s12, [#allocation5], %s4485_s25, %s4485_s25, %s4484_s20  }
  0x69   : > { %s4032_s3 = smov [#allocation9]   ;;  %s3976_s29 = scalar_lea.hbm %s4470_s9, 4096 }
  0x6a   : > { %s367_s22 = sshll.u32 %s4032_s3, 4  ;;  %p3977_p2 = scmp.ne.s32.totalorder %s4470_s9, %s3976_s29  ;;  %s368_s22 = int_to_ptr.vmem [resolvable:$true] %s367_s22 }
  0x6b   : > { %p3983_p12 = scmp.lt.u32.totalorder %s3976_s29, %s4470_s9 }
  0x6c   : > { %p3979_p3 = pnand %p3977_p2, %p4139_p7 }
  0x6e   : > { %p3980_p11 = pneg %p3979_p3 }
  0x70   : > { %p3985_p13 = pnand %p3983_p12, %p3980_p11 }
  0x72   : > { %3988 = shalt.err (!%p3985_p13)
}
  0x73   : > { %s3989_s12 = scalar_lea.vmem %s368_s22, 4096  ;;  %p3997_p6 = scmp.lt.s32.totalorder %s368_s22, %s368_s22 }
  0x74   : > { %p3990_p0 = scmp.ne.s32.totalorder %s368_s22, %s3989_s12  ;;  %p3998_p8 = scmp.lt.s32.totalorder %s3989_s12, %s3989_s12 }
  0x76   : > { %p3992_p1 = pnand %p3990_p0, %p4139_p7  ;;  %p3999_p9 = por %p3998_p8, %p3997_p6 }
  0x78   : > { %p3993_p4 = pneg %p3992_p1 }
  0x7a   : > { %p4000_p10 = pnand %p3999_p9, %p3993_p4 }
  0x7c   : > { %4003 = shalt.err (!%p4000_p10)
}
  0x7d   : > { %s4033_s20 = smov 128   ;;  %s4034_s25 = smov 8  }
  0x7e   : > { %3795 = dma.hbm_to_vmem [thread:$0]  (!%p4125_p5), %s4470_s9, 4096, %s368_s22, [#allocation8], %s4033_s20, %s4033_s20, %s4034_s25  }
  0x7f   : > { %p4486_p2 = scmp.ne.s32.totalorder %s4480_s19, 0 }
  0x80   : > { %p4487_p3 = scmp.eq.s32.totalorder (!%p4486_p2), %s4108_s18, 0 }
  0x81   : > { %394 = sbr.rel (%p4486_p2) target bundleno = 1638 (0x666), region = 64 }
  0x88   : > { %4009 = dma.done.wait (%p4487_p3), [#allocation3], 24576   ;;  %p4488_p7 = pmov %p4487_p3 }
  0x89   : > { %p4489_p11 = pmov %p4487_p3 }
  0x8a   : > { %4011 = vsyncadd (%p4488_p7), [#allocation3], 4294942720 }
  0x8b   : > { %4013 = dma.done.wait (%p4489_p11), [#allocation5], 65536   ;;  %p4490_p12 = pmov %p4487_p3 }
  0x8c   : > { %p4491_p13 = pmov %p4487_p3 }
  0x8d   : > { %4015 = vsyncadd (%p4490_p12), [#allocation5], 4294901760 }
  0x8e   : > { %4017 = dma.done.wait (%p4491_p13), [#allocation8], 20480   ;;  %p4492_p5 = pmov %p4487_p3 }
  0x8f   : > { %v4035_v0 = vmov 0.0   ;;  %v462_v1 = vld [vmem:[#allocation2 + $0x8] sm:$0xff]  ;;  %v461_v3 = vld [vmem:[#allocation2] sm:$0xff]  ;;  %p449_p0 = scmp.lt.s32.totalorder %s4108_s18, 1 }
  0x90   : > { %4019 = vsyncadd (%p4492_p5), [#allocation8], 4294946816  ;;  %810 = vmatprep.mubr.f32.mxu0 %v4035_v0  ;;  %v466_v2 = vld [vmem:[#allocation2 + $0x28] sm:$0xff]  ;;  %v465_v5 = vld [vmem:[#allocation2 + $0x20] sm:$0xff] }
  0x91   : > { %v2859_v4 = vpack.c.bf16 %v466_v2, %v462_v1  ;;  %v470_v6 = vld [vmem:[#allocation2 + $0x48] sm:$0xff]  ;;  %v2861_v8 = vpack.c.bf16 %v465_v5, %v461_v3  ;;  %v469_v10 = vld [vmem:[#allocation2 + $0x40] sm:$0xff]  ;;  %s4498_s18 = smov (!%p449_p0, %s4108_s18), 1 }
  0x92   : > { %v474_v7 = vld [vmem:[#allocation2 + $0x68] sm:$0xff]  ;;  %v473_v11 = vld [vmem:[#allocation2 + $0x60] sm:$0xff]  ;;  %s3751_s19 = smul.u32 24, %s4498_s18  ;;  %s2812_s16 = sshll.u32 %s4498_s18, 3 }
  0x93   : > { %v2863_v9 = vpack.c.bf16 %v474_v7, %v470_v6  ;;  %v478_v12 = vld [vmem:[#allocation2 + $0x88] sm:$0xff]  ;;  %2860 = vmatprep.subr.bf16.mxu1 %v2859_v4  ;;  %v2865_v14 = vpack.c.bf16 %v473_v11, %v469_v10  ;;  %v477_v16 = vld [vmem:[#allocation2 + $0x80] sm:$0xff]  ;;  %s457_s26 = scalar_lea.vmem %s4472_s11, %s2812_s16 }
  0x94   : > { %v482_v13 = vld [vmem:[#allocation2 + $0xa8] sm:$0xff]  ;;  %2862 = vmatpush1.bf16.msra.mxu1 %v2861_v8  ;;  %v481_v17 = vld [vmem:[#allocation2 + $0xa0] sm:$0xff]  ;;  %s4272_s23 = scalar_lea.vmem %s4461_s0, %s3751_s19 }
  0x95   : > { %2864 = vmatprep.subr.bf16.mxu1 %v2863_v9  ;;  %v2867_v15 = vpack.c.bf16 %v482_v13, %v478_v12  ;;  %v486_v18 = vld [vmem:[#allocation2 + $0xc8] sm:$0xff]  ;;  %v2869_v20 = vpack.c.bf16 %v481_v17, %v477_v16  ;;  %v485_v22 = vld [vmem:[#allocation2 + $0xc0] sm:$0xff] }
  0x96   : > { %v490_v19 = vld [vmem:[#allocation2 + $0xe8] sm:$0xff]  ;;  %v489_v23 = vld [vmem:[#allocation2 + $0xe0] sm:$0xff] }
  0x97   : > { %v2871_v21 = vpack.c.bf16 %v490_v19, %v486_v18  ;;  %v494_v24 = vld [vmem:[#allocation2 + $0x108] sm:$0xff]  ;;  %v2873_v26 = vpack.c.bf16 %v489_v23, %v485_v22  ;;  %v589_v29 = vld [vmem:[#allocation2 + $0x400] sm:$0xff] }
  0x98   : > { %2866 = vmatpush1.bf16.msra.mxu1 %v2865_v14  ;;  %v498_v25 = vld [vmem:[#allocation2 + $0x128] sm:$0xff]  ;;  %v493_v31 = vld [vmem:[#allocation2 + $0x100] sm:$0xff] }
  0x99   : > { %2868 = vmatprep.subr.bf16.mxu1 %v2867_v15  ;;  %v590_v27 = vld [vmem:[#allocation2 + $0x408] sm:$0xff]  ;;  %v2875_v30 = vpack.c.bf16 %v498_v25, %v494_v24  ;;  %v497_v32 = vld [vmem:[#allocation2 + $0x120] sm:$0xff] }
  0x9a   : > { %v594_v28 = vld [vmem:[#allocation2 + $0x428] sm:$0xff]  ;;  %v593_v34 = vld [vmem:[#allocation2 + $0x420] sm:$0xff]  ;;  %v2877_v42 = vpack.c.bf16 %v497_v32, %v493_v31 }
  0x9b   : > { %v2923_v33 = vpack.c.bf16 %v594_v28, %v590_v27  ;;  %v502_v35 = vld [vmem:[#allocation2 + $0x148] sm:$0xff]  ;;  %v2925_v37 = vpack.c.bf16 %v593_v34, %v589_v29  ;;  %v597_v40 = vld [vmem:[#allocation2 + $0x440] sm:$0xff] }
  0x9c   : > { %2870 = vmatpush1.bf16.msra.mxu1 %v2869_v20  ;;  %v506_v36 = vld [vmem:[#allocation2 + $0x168] sm:$0xff]  ;;  %v601_v41 = vld [vmem:[#allocation2 + $0x460] sm:$0xff] }
  0x9d   : > { %2872 = vmatprep.subr.bf16.mxu1 %v2871_v21  ;;  %v598_v38 = vld [vmem:[#allocation2 + $0x448] sm:$0xff]  ;;  %2924 = vmatprep.subr.bf16.mxu0 %v2923_v33  ;;  %v501_v43 = vld [vmem:[#allocation2 + $0x140] sm:$0xff]  ;;  %v2929_v46 = vpack.c.bf16 %v601_v41, %v597_v40  ;;  %v2879_v47 = vpack.c.bf16 %v506_v36, %v502_v35 }
  0x9e   : > { %v602_v39 = vld [vmem:[#allocation2 + $0x468] sm:$0xff]  ;;  %v505_v44 = vld [vmem:[#allocation2 + $0x160] sm:$0xff]  ;;  %2926 = vmatpush1.bf16.msra.mxu0 %v2925_v37 }
  0x9f   : > { %v2927_v45 = vpack.c.bf16 %v602_v39, %v598_v38  ;;  %v510_v48 = vld [vmem:[#allocation2 + $0x188] sm:$0xff]  ;;  %v605_v53 = vld [vmem:[#allocation2 + $0x480] sm:$0xff]  ;;  %v2881_v55 = vpack.c.bf16 %v505_v44, %v501_v43 }
  0xa0   : > { %2874 = vmatpush1.bf16.msra.mxu1 %v2873_v26  ;;  %v606_v49 = vld [vmem:[#allocation2 + $0x488] sm:$0xff]  ;;  %v609_v54 = vld [vmem:[#allocation2 + $0x4a0] sm:$0xff] }
  0xa1   : > { %2876 = vmatprep.subr.bf16.mxu1 %v2875_v30  ;;  %v610_v50 = vld [vmem:[#allocation2 + $0x4a8] sm:$0xff]  ;;  %2928 = vmatprep.subr.bf16.mxu0 %v2927_v45  ;;  %v509_v56 = vld [vmem:[#allocation2 + $0x180] sm:$0xff]  ;;  %v2933_v57 = vpack.c.bf16 %v609_v54, %v605_v53 }
  0xa2   : > { %v514_v51 = vld [vmem:[#allocation2 + $0x1a8] sm:$0xff]  ;;  %v2931_v52 = vpack.c.bf16 %v610_v50, %v606_v49  ;;  %2930 = vmatpush1.bf16.msra.mxu0 %v2929_v46  ;;  %v513_v61 = vld [vmem:[#allocation2 + $0x1a0] sm:$0xff] }
  0xa3   : > { %v614_v58 = vld [vmem:[#allocation2 + $0x4c8] sm:$0xff]  ;;  %v2883_v60 = vpack.c.bf16 %v514_v51, %v510_v48  ;;  %v613_v63 = vld [vmem:[#allocation2 + $0x4c0] sm:$0xff]  ;;  %v2885_v6 = vpack.c.bf16 %v513_v61, %v509_v56  ;;  %v4279_v61 = vld [vmem:[%s4272_s23 + $0x10] sm:$0xff] }
  0xa4   : > { %2878 = vmatpush1.bf16.msra.mxu1 %v2877_v42  ;;  %v618_v59 = vld [vmem:[#allocation2 + $0x4e8] sm:$0xff]  ;;  %2932 = vmatprep.subr.bf16.mxu0 %v2931_v52  ;;  %v617_v1 = vld [vmem:[#allocation2 + $0x4e0] sm:$0xff] }
  0xa5   : > { %2880 = vmatprep.subr.bf16.mxu1 %v2879_v47  ;;  %v2935_v62 = vpack.c.bf16 %v618_v59, %v614_v58  ;;  %v518_v2 = vld [vmem:[#allocation2 + $0x1c8] sm:$0xff]  ;;  %v517_v7 = vld [vmem:[#allocation2 + $0x1c0] sm:$0xff]  ;;  %v2937_v9 = vpack.c.bf16 %v617_v1, %v613_v63 }
  0xa6   : > { %v522_v3 = vld [vmem:[#allocation2 + $0x1e8] sm:$0xff]  ;;  %v521_v8 = vld [vmem:[#allocation2 + $0x1e0] sm:$0xff]  ;;  %2934 = vmatpush1.bf16.msra.mxu0 %v2933_v57 }
  0xa7   : > { %v622_v4 = vld [vmem:[#allocation2 + $0x508] sm:$0xff]  ;;  %v2887_v10 = vpack.c.bf16 %v522_v3, %v518_v2  ;;  %2936 = vmatprep.subr.bf16.mxu0 %v2935_v62  ;;  %v621_v13 = vld [vmem:[#allocation2 + $0x500] sm:$0xff]  ;;  %v2889_v18 = vpack.c.bf16 %v521_v8, %v517_v7 }
  0xa8   : > { %v626_v5 = vld [vmem:[#allocation2 + $0x528] sm:$0xff]  ;;  %2882 = vmatpush1.bf16.msra.mxu1 %v2881_v55  ;;  %v625_v14 = vld [vmem:[#allocation2 + $0x520] sm:$0xff] }
  0xa9   : > { %2884 = vmatprep.subr.bf16.mxu1 %v2883_v60  ;;  %v526_v11 = vld [vmem:[#allocation2 + $0x208] sm:$0xff]  ;;  %v2939_v12 = vpack.c.bf16 %v626_v5, %v622_v4  ;;  %v525_v19 = vld [vmem:[#allocation2 + $0x200] sm:$0xff]  ;;  %v2941_v21 = vpack.c.bf16 %v625_v14, %v621_v13 }
  0xaa   : > { %v530_v15 = vld [vmem:[#allocation2 + $0x228] sm:$0xff]  ;;  %v529_v20 = vld [vmem:[#allocation2 + $0x220] sm:$0xff]  ;;  %2938 = vmatpush1.bf16.msra.mxu0 %v2937_v9 }
  0xab   : > { %v630_v16 = vld [vmem:[#allocation2 + $0x548] sm:$0xff]  ;;  %v2891_v22 = vpack.c.bf16 %v530_v15, %v526_v11  ;;  %2940 = vmatprep.subr.bf16.mxu0 %v2939_v12  ;;  %v629_v25 = vld [vmem:[#allocation2 + $0x540] sm:$0xff]  ;;  %v2893_v31 = vpack.c.bf16 %v529_v20, %v525_v19  ;;  %v464_v20 = vld [vmem:[#allocation2 + $0x18] sm:$0xff] }
  0xac   : > { %v634_v17 = vld [vmem:[#allocation2 + $0x568] sm:$0xff]  ;;  %2886 = vmatpush1.bf16.msra.mxu1 %v2885_v6  ;;  %v633_v26 = vld [vmem:[#allocation2 + $0x560] sm:$0xff] }
  0xad   : > { %2888 = vmatprep.subr.bf16.mxu1 %v2887_v10  ;;  %v534_v23 = vld [vmem:[#allocation2 + $0x248] sm:$0xff]  ;;  %v2943_v24 = vpack.c.bf16 %v634_v17, %v630_v16  ;;  %v533_v32 = vld [vmem:[#allocation2 + $0x240] sm:$0xff]  ;;  %v2945_v34 = vpack.c.bf16 %v633_v26, %v629_v25  ;;  %v467_v25 = vld [vmem:[#allocation2 + $0x30] sm:$0xff] }
  0xae   : > { %v538_v27 = vld [vmem:[#allocation2 + $0x268] sm:$0xff]  ;;  %v537_v33 = vld [vmem:[#allocation2 + $0x260] sm:$0xff]  ;;  %2942 = vmatpush1.bf16.msra.mxu0 %v2941_v21  ;;  %v468_v21 = vld [vmem:[#allocation2 + $0x38] sm:$0xff] }
  0xaf   : > { %v638_v28 = vld [vmem:[#allocation2 + $0x588] sm:$0xff]  ;;  %v2895_v35 = vpack.c.bf16 %v538_v27, %v534_v23  ;;  %2944 = vmatprep.subr.bf16.mxu0 %v2943_v24  ;;  %v637_v38 = vld [vmem:[#allocation2 + $0x580] sm:$0xff]  ;;  %v2897_v43 = vpack.c.bf16 %v537_v33, %v533_v32  ;;  %v2955_v23 = vpack.c.bf16 %v468_v21, %v464_v20  ;;  %v463_v24 = vld [vmem:[#allocation2 + $0x10] sm:$0xff] }
  0xb0   : > { %v642_v29 = vld [vmem:[#allocation2 + $0x5a8] sm:$0xff]  ;;  %2890 = vmatpush1.bf16.msra.mxu1 %v2889_v18  ;;  %v641_v39 = vld [vmem:[#allocation2 + $0x5a0] sm:$0xff]  ;;  %v472_v26 = vld [vmem:[#allocation2 + $0x58] sm:$0xff] }
  0xb1   : > { %v4275_v30 = vld [vmem:[%s4272_s23 + $0x8] sm:$0xff]  ;;  %2892 = vmatprep.subr.bf16.mxu1 %v2891_v22  ;;  %v2947_v37 = vpack.c.bf16 %v642_v29, %v638_v28  ;;  %v541_v44 = vld [vmem:[#allocation2 + $0x280] sm:$0xff]  ;;  %v2949_v45 = vpack.c.bf16 %v641_v39, %v637_v38  ;;  %v476_v27 = vld [vmem:[#allocation2 + $0x78] sm:$0xff]  ;;  %v2957_v29 = vpack.c.bf16 %v467_v25, %v463_v24 }
  0xb2   : > { %v542_v36 = vld [vmem:[#allocation2 + $0x288] sm:$0xff]  ;;  %739 = vmatprep.mubr.f32.mxu1 %v4275_v30  ;;  %2946 = vmatpush1.bf16.msra.mxu0 %v2945_v34  ;;  %v545_v47 = vld [vmem:[#allocation2 + $0x2a0] sm:$0xff]  ;;  %v475_v32 = vld [vmem:[#allocation2 + $0x70] sm:$0xff]  ;;  %v2959_v33 = vpack.c.bf16 %v476_v27, %v472_v26 }
  0xb3   : > { %v546_v40 = vld [vmem:[#allocation2 + $0x2a8] sm:$0xff]  ;;  %2948 = vmatprep.subr.bf16.mxu0 %v2947_v37  ;;  %v645_v49 = vld [vmem:[#allocation2 + $0x5c0] sm:$0xff]  ;;  %v2901_v53 = vpack.c.bf16 %v545_v47, %v541_v44  ;;  %v480_v34 = vld [vmem:[#allocation2 + $0x98] sm:$0xff] }
  0xb4   : > { %v646_v41 = vld [vmem:[#allocation2 + $0x5c8] sm:$0xff]  ;;  %2894 = vmatpush1.bf16.msra.mxu1 %v2893_v31  ;;  %v2899_v46 = vpack.c.bf16 %v546_v40, %v542_v36  ;;  %v649_v50 = vld [vmem:[#allocation2 + $0x5e0] sm:$0xff]  ;;  %v471_v31 = vld [vmem:[#allocation2 + $0x50] sm:$0xff] }
  0xb5   : > { %v650_v42 = vld [vmem:[#allocation2 + $0x5e8] sm:$0xff]  ;;  %2896 = vmatprep.subr.bf16.mxu1 %v2895_v35  ;;  %v2953_v54 = vpack.c.bf16 %v649_v50, %v645_v49  ;;  %v549_v56 = vld [vmem:[#allocation2 + $0x2c0] sm:$0xff]  ;;  %v484_v37 = vld [vmem:[#allocation2 + $0xb8] sm:$0xff] }
  0xb6   : > { %v2951_v48 = vpack.c.bf16 %v650_v42, %v646_v41  ;;  %v550_v51 = vld [vmem:[#allocation2 + $0x2c8] sm:$0xff]  ;;  %2950 = vmatpush1.bf16.msra.mxu0 %v2949_v45  ;;  %v553_v57 = vld [vmem:[#allocation2 + $0x2e0] sm:$0xff]  ;;  %v479_v44 = vld [vmem:[#allocation2 + $0x90] sm:$0xff]  ;;  %v2963_v47 = vpack.c.bf16 %v484_v37, %v480_v34 }
  0xb7   : > { %v554_v52 = vld [vmem:[#allocation2 + $0x2e8] sm:$0xff]  ;;  %v2905_v60 = vpack.c.bf16 %v553_v57, %v549_v56  ;;  %v557_v63 = vld [vmem:[#allocation2 + $0x300] sm:$0xff]  ;;  %v483_v45 = vld [vmem:[#allocation2 + $0xb0] sm:$0xff] }
  0xb8   : > { %2898 = vmatpush1.bf16.msra.mxu1 %v2897_v43  ;;  %v2903_v55 = vpack.c.bf16 %v554_v52, %v550_v51  ;;  %2952 = vmatprep.subr.bf16.mxu0 %v2951_v48  ;;  %v558_v58 = vld [vmem:[#allocation2 + $0x308] sm:$0xff]  ;;  %v561_v1 = vld [vmem:[#allocation2 + $0x320] sm:$0xff]  ;;  %v2961_v43 = vpack.c.bf16 %v475_v32, %v471_v31  ;;  %v488_v48 = vld [vmem:[#allocation2 + $0xd8] sm:$0xff] }
  0xb9   : > { %2900 = vmatprep.subr.bf16.mxu1 %v2899_v46  ;;  %v562_v59 = vld [vmem:[#allocation2 + $0x328] sm:$0xff]  ;;  %v2909_v4 = vpack.c.bf16 %v561_v1, %v557_v63  ;;  %v565_v6 = vld [vmem:[#allocation2 + $0x340] sm:$0xff]  ;;  %v492_v52 = vld [vmem:[#allocation2 + $0xf8] sm:$0xff] }
  0xba   : > { %2954 = vmatpush1.bf16.msra.mxu0 %v2953_v54  ;;  %v2907_v62 = vpack.c.bf16 %v562_v59, %v558_v58  ;;  %v566_v2 = vld [vmem:[#allocation2 + $0x348] sm:$0xff]  ;;  %v569_v7 = vld [vmem:[#allocation2 + $0x360] sm:$0xff]  ;;  %v2965_v58 = vpack.c.bf16 %v483_v45, %v479_v44  ;;  %v487_v59 = vld [vmem:[#allocation2 + $0xd0] sm:$0xff] }
  0xbb   : > { %v570_v3 = vld [vmem:[#allocation2 + $0x368] sm:$0xff]  ;;  %v2913_v10 = vpack.c.bf16 %v569_v7, %v565_v6  ;;  %v573_v12 = vld [vmem:[#allocation2 + $0x380] sm:$0xff]  ;;  %v503_v24 = vld [vmem:[#allocation2 + $0x150] sm:$0xff] }
  0xbc   : > { %2902 = vmatpush1.bf16.msra.mxu1 %v2901_v53  ;;  %v2911_v5 = vpack.c.bf16 %v570_v3, %v566_v2  ;;  %v574_v8 = vld [vmem:[#allocation2 + $0x388] sm:$0xff]  ;;  %v577_v13 = vld [vmem:[#allocation2 + $0x3a0] sm:$0xff]  ;;  %v496_v2 = vld [vmem:[#allocation2 + $0x118] sm:$0xff] }
  0xbd   : > { %2904 = vmatprep.subr.bf16.mxu1 %v2903_v55  ;;  %811 = vmatmul.mubr.f32.vlgmr.msra.gmra.mrb[0].mxu0 %v4279_v61  ;;  %v578_v9 = vld [vmem:[#allocation2 + $0x3a8] sm:$0xff]  ;;  %v2917_v16 = vpack.c.bf16 %v577_v13, %v573_v12  ;;  %v581_v18 = vld [vmem:[#allocation2 + $0x3c0] sm:$0xff]  ;;  %v500_v3 = vld [vmem:[#allocation2 + $0x138] sm:$0xff] }
  0xbe   : > { %v2915_v11 = vpack.c.bf16 %v578_v9, %v574_v8  ;;  %v582_v14 = vld [vmem:[#allocation2 + $0x3c8] sm:$0xff]  ;;  %v585_v19 = vld [vmem:[#allocation2 + $0x3e0] sm:$0xff]  ;;  %v495_v12 = vld [vmem:[#allocation2 + $0x110] sm:$0xff] }
  0xbf   : > { %v586_v15 = vld [vmem:[#allocation2 + $0x3e8] sm:$0xff]  ;;  %v2921_v22 = vpack.c.bf16 %v585_v19, %v581_v18  ;;  %v4283_v28 = vld [vmem:[%s4272_s23] sm:$0xff]  ;;  %v499_v13 = vld [vmem:[#allocation2 + $0x130] sm:$0xff] }
  0xc0   : > { %2906 = vmatpush1.bf16.msra.mxu1 %v2905_v60  ;;  %v2919_v17 = vpack.c.bf16 %v586_v15, %v582_v14  ;;  %v964_v35 = vld [vmem:[#allocation4 + $0x8] sm:$0xff]  ;;  %v963_v39 = vld [vmem:[#allocation4] sm:$0xff]  ;;  %v2967_v60 = vpack.c.bf16 %v492_v52, %v488_v48  ;;  %v504_v14 = vld [vmem:[#allocation2 + $0x158] sm:$0xff]  ;;  %v2973_v20 = vpack.c.bf16 %v499_v13, %v495_v12 }
  0xc1   : > { %2908 = vmatprep.subr.bf16.mxu1 %v2907_v62  ;;  %v968_v36 = vld [vmem:[#allocation4 + $0x28] sm:$0xff]  ;;  %v967_v40 = vld [vmem:[#allocation4 + $0x20] sm:$0xff]  ;;  %v491_v62 = vld [vmem:[#allocation2 + $0xf0] sm:$0xff] }
  0xc2   : > { %v3051_v38 = vpack.c.bf16 %v968_v36, %v964_v35  ;;  %v3053_v41 = vpack.c.bf16 %v967_v40, %v963_v39  ;;  %v972_v42 = vld [vmem:[#allocation4 + $0x48] sm:$0xff]  ;;  %v971_v50 = vld [vmem:[#allocation4 + $0x40] sm:$0xff]  ;;  %v2969_v8 = vpack.c.bf16 %v491_v62, %v487_v59  ;;  %v508_v15 = vld [vmem:[#allocation2 + $0x178] sm:$0xff] }
  0xc3   : > { %v976_v46 = vld [vmem:[#allocation4 + $0x68] sm:$0xff]  ;;  %v975_v51 = vld [vmem:[#allocation4 + $0x60] sm:$0xff]  ;;  %v507_v25 = vld [vmem:[#allocation2 + $0x170] sm:$0xff] }
  0xc4   : > { %2910 = vmatpush1.bf16.msra.mxu1 %v2909_v4  ;;  %3052 = vmatprep.subr.bf16.mxu0 %v3051_v38  ;;  %v3055_v49 = vpack.c.bf16 %v976_v46, %v972_v42  ;;  %v3057_v53 = vpack.c.bf16 %v975_v51, %v971_v50  ;;  %v980_v54 = vld [vmem:[#allocation4 + $0x88] sm:$0xff]  ;;  %v979_v57 = vld [vmem:[#allocation4 + $0x80] sm:$0xff]  ;;  %v512_v26 = vld [vmem:[#allocation2 + $0x198] sm:$0xff]  ;;  %v2977_v34 = vpack.c.bf16 %v507_v25, %v503_v24 }
  0xc5   : > { %2912 = vmatprep.subr.bf16.mxu1 %v2911_v5  ;;  %3054 = vmatpush1.bf16.msra.mxu0 %v3053_v41  ;;  %v984_v55 = vld [vmem:[#allocation4 + $0xa8] sm:$0xff]  ;;  %v987_v6 = vld [vmem:[#allocation4 + $0xc0] sm:$0xff]  ;;  %v516_v27 = vld [vmem:[#allocation2 + $0x1b8] sm:$0xff] }
  0xc6   : > { %3056 = vmatprep.subr.bf16.mxu0 %v3055_v49  ;;  %v3059_v56 = vpack.c.bf16 %v984_v55, %v980_v54  ;;  %v988_v63 = vld [vmem:[#allocation4 + $0xc8] sm:$0xff]  ;;  %v991_v7 = vld [vmem:[#allocation4 + $0xe0] sm:$0xff]  ;;  %v2979_v37 = vpack.c.bf16 %v516_v27, %v512_v26  ;;  %v511_v38 = vld [vmem:[#allocation2 + $0x190] sm:$0xff] }
  0xc7   : > { %v992_v1 = vld [vmem:[#allocation4 + $0xe8] sm:$0xff]  ;;  %v995_v18 = vld [vmem:[#allocation4 + $0x100] sm:$0xff]  ;;  %v515_v39 = vld [vmem:[#allocation2 + $0x1b0] sm:$0xff] }
  0xc8   : > { %2914 = vmatpush1.bf16.msra.mxu1 %v2913_v10  ;;  %v3063_v5 = vpack.c.bf16 %v992_v1, %v988_v63  ;;  %v996_v9 = vld [vmem:[#allocation4 + $0x108] sm:$0xff]  ;;  %v999_v19 = vld [vmem:[#allocation4 + $0x120] sm:$0xff]  ;;  %v520_v40 = vld [vmem:[#allocation2 + $0x1d8] sm:$0xff]  ;;  %v2981_v46 = vpack.c.bf16 %v515_v39, %v511_v38 }
  0xc9   : > { %2916 = vmatprep.subr.bf16.mxu1 %v2915_v11  ;;  %3058 = vmatpush1.bf16.msra.mxu0 %v3057_v53  ;;  %v1000_v10 = vld [vmem:[#allocation4 + $0x128] sm:$0xff]  ;;  %v2971_v11 = vpack.c.bf16 %v500_v3, %v496_v2  ;;  %v1003_v32 = vld [vmem:[#allocation4 + $0x140] sm:$0xff]  ;;  %v524_v41 = vld [vmem:[#allocation2 + $0x1f8] sm:$0xff] }
  0xca   : > { %3060 = vmatprep.subr.bf16.mxu0 %v3059_v56  ;;  %v1004_v21 = vld [vmem:[#allocation4 + $0x148] sm:$0xff]  ;;  %v1011_v44 = vld [vmem:[#allocation4 + $0x180] sm:$0xff]  ;;  %v2983_v49 = vpack.c.bf16 %v524_v41, %v520_v40  ;;  %v519_v50 = vld [vmem:[#allocation2 + $0x1d0] sm:$0xff] }
  0xcb   : > { %v1012_v35 = vld [vmem:[#allocation4 + $0x188] sm:$0xff]  ;;  %v1015_v45 = vld [vmem:[#allocation4 + $0x1a0] sm:$0xff]  ;;  %v523_v51 = vld [vmem:[#allocation2 + $0x1f0] sm:$0xff] }
  0xcc   : > { %2918 = vmatpush1.bf16.msra.mxu1 %v2917_v16  ;;  %v3065_v16 = vpack.c.bf16 %v991_v7, %v987_v6  ;;  %v1016_v36 = vld [vmem:[#allocation4 + $0x1a8] sm:$0xff]  ;;  %v528_v52 = vld [vmem:[#allocation2 + $0x218] sm:$0xff]  ;;  %v3077_v54 = vpack.c.bf16 %v1015_v45, %v1011_v44  ;;  %v1019_v56 = vld [vmem:[#allocation4 + $0x1c0] sm:$0xff] }
  0xcd   : > { %2920 = vmatprep.subr.bf16.mxu1 %v2919_v17  ;;  %v3067_v17 = vpack.c.bf16 %v1000_v10, %v996_v9  ;;  %v1024_v48 = vld [vmem:[#allocation4 + $0x1e8] sm:$0xff]  ;;  %v532_v53 = vld [vmem:[#allocation2 + $0x238] sm:$0xff]  ;;  %v527_v62 = vld [vmem:[#allocation2 + $0x210] sm:$0xff] }
  0xce   : > { %v1028_v59 = vld [vmem:[#allocation4 + $0x208] sm:$0xff]  ;;  %v531_v63 = vld [vmem:[#allocation2 + $0x230] sm:$0xff]  ;;  %v536_v1 = vld [vmem:[#allocation2 + $0x258] sm:$0xff] }
  0xcf   : > { %v540_v2 = vld [vmem:[#allocation2 + $0x278] sm:$0xff]  ;;  %v1031_v6 = vld [vmem:[#allocation4 + $0x220] sm:$0xff]  ;;  %v2989_v7 = vpack.c.bf16 %v531_v63, %v527_v62  ;;  %v1040_v9 = vld [vmem:[#allocation4 + $0x268] sm:$0xff] }
  0xd0   : > { %2922 = vmatpush1.bf16.msra.mxu1 %v2921_v22  ;;  %v1008_v22 = vld [vmem:[#allocation4 + $0x168] sm:$0xff]  ;;  %v2991_v10 = vpack.c.bf16 %v540_v2, %v536_v1  ;;  %v539_v12 = vld [vmem:[#allocation2 + $0x270] sm:$0xff]  ;;  %v544_v13 = vld [vmem:[#allocation2 + $0x298] sm:$0xff] }
  0xd1   : > { %2956 = vmatprep.subr.bf16.mxu1 %v2955_v23  ;;  %v2975_v23 = vpack.c.bf16 %v508_v15, %v504_v14  ;;  %v3071_v31 = vpack.c.bf16 %v1008_v22, %v1004_v21  ;;  %v548_v14 = vld [vmem:[#allocation2 + $0x2b8] sm:$0xff]  ;;  %v1048_v21 = vld [vmem:[#allocation4 + $0x2a8] sm:$0xff]  ;;  %v547_v24 = vld [vmem:[#allocation2 + $0x2b0] sm:$0xff] }
  0xd2   : > { %v2995_v22 = vpack.c.bf16 %v548_v14, %v544_v13  ;;  %v552_v25 = vld [vmem:[#allocation2 + $0x2d8] sm:$0xff]  ;;  %v555_v38 = vld [vmem:[#allocation2 + $0x2f0] sm:$0xff]  ;;  %v1055_v44 = vld [vmem:[#allocation4 + $0x2e0] sm:$0xff] }
  0xd3   : > { %740 = vmatmul.mubr.f32.vlgmr.msra.gmra.mrb[0].mxu1 %v4283_v28  ;;  %v556_v26 = vld [vmem:[#allocation2 + $0x2f8] sm:$0xff] }
  0xd4   : > { %2958 = vmatpush1.bf16.msra.mxu1 %v2957_v29  ;;  %881 = vmatprep.mubr.f32.mxu1 %v4275_v30  ;;  %v983_v30 = vld [vmem:[#allocation4 + $0xa0] sm:$0xff]  ;;  %v3069_v29 = vpack.c.bf16 %v999_v19, %v995_v18  ;;  %v560_v39 = vld [vmem:[#allocation2 + $0x318] sm:$0xff] }
  0xd5   : > { %2960 = vmatprep.subr.bf16.mxu1 %v2959_v33  ;;  %v3061_v4 = vpack.c.bf16 %v983_v30, %v979_v57  ;;  %v1007_v33 = vld [vmem:[#allocation4 + $0x160] sm:$0xff]  ;;  %v1032_v30 = vld [vmem:[#allocation4 + $0x228] sm:$0xff]  ;;  %v564_v40 = vld [vmem:[#allocation2 + $0x338] sm:$0xff] }
  0xd6   : > { %v3073_v42 = vpack.c.bf16 %v1007_v33, %v1003_v32  ;;  %v1023_v57 = vld [vmem:[#allocation4 + $0x1e0] sm:$0xff]  ;;  %v584_v62 = vld [vmem:[#allocation2 + $0x3d8] sm:$0xff] }
  0xd7   : > { %3062 = vmatpush1.bf16.msra.mxu0 %v3061_v4  ;;  %v3081_v3 = vpack.c.bf16 %v1023_v57, %v1019_v56  ;;  %v3083_v4 = vpack.c.bf16 %v1032_v30, %v1028_v59  ;;  %v1039_v18 = vld [vmem:[#allocation4 + $0x260] sm:$0xff]  ;;  %v576_v56 = vld [vmem:[#allocation2 + $0x398] sm:$0xff]  ;;  %v575_v30 = vld [vmem:[#allocation2 + $0x390] sm:$0xff] }
  0xd8   : > { %2962 = vmatpush1.bf16.msra.mxu1 %v2961_v43  ;;  %3064 = vmatprep.subr.bf16.mxu0 %v3063_v5  ;;  %v3075_v43 = vpack.c.bf16 %v1016_v36, %v1012_v35  ;;  %v1027_v5 = vld [vmem:[#allocation4 + $0x200] sm:$0xff]  ;;  %v1056_v35 = vld [vmem:[#allocation4 + $0x2e8] sm:$0xff]  ;;  %v2999_v36 = vpack.c.bf16 %v556_v26, %v552_v25  ;;  %v580_v57 = vld [vmem:[#allocation2 + $0x3b8] sm:$0xff] }
  0xd9   : > { %2964 = vmatprep.subr.bf16.mxu1 %v2963_v47  ;;  %v1020_v47 = vld [vmem:[#allocation4 + $0x1c8] sm:$0xff]  ;;  %v3085_v15 = vpack.c.bf16 %v1031_v6, %v1027_v5  ;;  %v1047_v32 = vld [vmem:[#allocation4 + $0x2a0] sm:$0xff]  ;;  %v3011_v59 = vpack.c.bf16 %v580_v57, %v576_v56  ;;  %v588_v63 = vld [vmem:[#allocation2 + $0x3f8] sm:$0xff] }
  0xda   : > { %v3079_v55 = vpack.c.bf16 %v1024_v48, %v1020_v47  ;;  %v559_v47 = vld [vmem:[#allocation2 + $0x310] sm:$0xff]  ;;  %v3015_v2 = vpack.c.bf16 %v588_v63, %v584_v62  ;;  %v592_v5 = vld [vmem:[#allocation2 + $0x418] sm:$0xff] }
  0xdb   : > { %3066 = vmatpush1.bf16.msra.mxu0 %v3065_v16  ;;  %v563_v48 = vld [vmem:[#allocation2 + $0x330] sm:$0xff]  ;;  %v596_v6 = vld [vmem:[#allocation2 + $0x438] sm:$0xff] }
  0xdc   : > { %2966 = vmatpush1.bf16.msra.mxu1 %v2965_v58  ;;  %3068 = vmatprep.subr.bf16.mxu0 %v3067_v17  ;;  %v2985_v58 = vpack.c.bf16 %v523_v51, %v519_v50  ;;  %v1035_v17 = vld [vmem:[#allocation4 + $0x240] sm:$0xff]  ;;  %v572_v50 = vld [vmem:[#allocation2 + $0x378] sm:$0xff]  ;;  %v647_v56 = vld [vmem:[#allocation2 + $0x5d0] sm:$0xff] }
  0xdd   : > { %2968 = vmatprep.subr.bf16.mxu1 %v2967_v60  ;;  %v2987_v60 = vpack.c.bf16 %v532_v53, %v528_v52  ;;  %v3089_v27 = vpack.c.bf16 %v1039_v18, %v1035_v17  ;;  %v3005_v52 = vpack.c.bf16 %v563_v48, %v559_v47  ;;  %v608_v17 = vld [vmem:[#allocation2 + $0x498] sm:$0xff]  ;;  %v1060_v48 = vld [vmem:[#allocation4 + $0x308] sm:$0xff]  ;;  %v651_v57 = vld [vmem:[#allocation2 + $0x5f0] sm:$0xff] }
  0xde   : > { %v612_v18 = vld [vmem:[#allocation2 + $0x4b8] sm:$0xff] }
  0xdf   : > { %3070 = vmatpush1.bf16.msra.mxu0 %v3069_v29  ;;  %v648_v47 = vld [vmem:[#allocation2 + $0x5d8] sm:$0xff] }
  0xe0   : > { %2970 = vmatpush1.bf16.msra.mxu1 %v2969_v8  ;;  %3072 = vmatprep.subr.bf16.mxu0 %v3071_v31  ;;  %v1036_v8 = vld [vmem:[#allocation4 + $0x248] sm:$0xff]  ;;  %v1043_v31 = vld [vmem:[#allocation4 + $0x280] sm:$0xff]  ;;  %v970_v62 = vld [vmem:[#allocation4 + $0x38] sm:$0xff] }
  0xe1   : > { %2972 = vmatprep.subr.bf16.mxu1 %v2971_v11  ;;  %v535_v11 = vld [vmem:[#allocation2 + $0x250] sm:$0xff]  ;;  %v3087_v16 = vpack.c.bf16 %v1040_v9, %v1036_v8  ;;  %v3093_v41 = vpack.c.bf16 %v1047_v32, %v1043_v31  ;;  %v3019_v8 = vpack.c.bf16 %v596_v6, %v592_v5  ;;  %v624_v31 = vld [vmem:[#allocation2 + $0x518] sm:$0xff]  ;;  %v1076_v6 = vld [vmem:[#allocation4 + $0x388] sm:$0xff] }
  0xe2   : > { %v2993_v19 = vpack.c.bf16 %v539_v12, %v535_v11  ;;  %v591_v9 = vld [vmem:[#allocation2 + $0x410] sm:$0xff]  ;;  %v600_v11 = vld [vmem:[#allocation2 + $0x458] sm:$0xff] }
  0xe3   : > { %3074 = vmatpush1.bf16.msra.mxu0 %v3073_v42  ;;  %v604_v12 = vld [vmem:[#allocation2 + $0x478] sm:$0xff]  ;;  %v965_v5 = vld [vmem:[#allocation4 + $0x10] sm:$0xff] }
  0xe4   : > { %2974 = vmatpush1.bf16.msra.mxu1 %v2973_v20  ;;  %3076 = vmatprep.subr.bf16.mxu0 %v3075_v43  ;;  %v1044_v20 = vld [vmem:[#allocation4 + $0x288] sm:$0xff]  ;;  %v1051_v43 = vld [vmem:[#allocation4 + $0x2c0] sm:$0xff]  ;;  %v3023_v14 = vpack.c.bf16 %v604_v12, %v600_v11  ;;  %v628_v32 = vld [vmem:[#allocation2 + $0x538] sm:$0xff] }
  0xe5   : > { %2976 = vmatprep.subr.bf16.mxu1 %v2975_v23  ;;  %v543_v23 = vld [vmem:[#allocation2 + $0x290] sm:$0xff]  ;;  %v3091_v29 = vpack.c.bf16 %v1048_v21, %v1044_v20  ;;  %v3097_v51 = vpack.c.bf16 %v1055_v44, %v1051_v43  ;;  %v3027_v20 = vpack.c.bf16 %v612_v18, %v608_v17  ;;  %v1075_v11 = vld [vmem:[#allocation4 + $0x380] sm:$0xff]  ;;  %v1088_v17 = vld [vmem:[#allocation4 + $0x3e8] sm:$0xff] }
  0xe6   : > { %v2997_v33 = vpack.c.bf16 %v547_v24, %v543_v23  ;;  %v607_v21 = vld [vmem:[#allocation2 + $0x490] sm:$0xff]  ;;  %v616_v23 = vld [vmem:[#allocation2 + $0x4d8] sm:$0xff]  ;;  %v1079_v12 = vld [vmem:[#allocation4 + $0x3a0] sm:$0xff] }
  0xe7   : > { %3078 = vmatpush1.bf16.msra.mxu0 %v3077_v54  ;;  %v567_v54 = vld [vmem:[#allocation2 + $0x350] sm:$0xff]  ;;  %v620_v24 = vld [vmem:[#allocation2 + $0x4f8] sm:$0xff] }
  0xe8   : > { %2978 = vmatpush1.bf16.msra.mxu1 %v2977_v34  ;;  %3080 = vmatprep.subr.bf16.mxu0 %v3079_v55  ;;  %v1052_v34 = vld [vmem:[#allocation4 + $0x2c8] sm:$0xff]  ;;  %v571_v55 = vld [vmem:[#allocation2 + $0x370] sm:$0xff]  ;;  %v3031_v26 = vpack.c.bf16 %v620_v24, %v616_v23 }
  0xe9   : > { %2980 = vmatprep.subr.bf16.mxu1 %v2979_v37  ;;  %v551_v37 = vld [vmem:[#allocation2 + $0x2d0] sm:$0xff]  ;;  %v3095_v42 = vpack.c.bf16 %v1056_v35, %v1052_v34  ;;  %v632_v35 = vld [vmem:[#allocation2 + $0x558] sm:$0xff] }
  0xea   : > { %v3001_v45 = vpack.c.bf16 %v555_v38, %v551_v37  ;;  %v623_v34 = vld [vmem:[#allocation2 + $0x510] sm:$0xff] }
  0xeb   : > { %3082 = vmatpush1.bf16.msra.mxu0 %v3081_v3  ;;  %v583_v3 = vld [vmem:[#allocation2 + $0x3d0] sm:$0xff] }
  0xec   : > { %2982 = vmatpush1.bf16.msra.mxu1 %v2981_v46  ;;  %3084 = vmatprep.subr.bf16.mxu0 %v3083_v4  ;;  %v3003_v46 = vpack.c.bf16 %v564_v40, %v560_v39  ;;  %v587_v4 = vld [vmem:[#allocation2 + $0x3f0] sm:$0xff] }
  0xed   : > { %2984 = vmatprep.subr.bf16.mxu1 %v2983_v49  ;;  %v568_v49 = vld [vmem:[#allocation2 + $0x358] sm:$0xff]  ;;  %v631_v39 = vld [vmem:[#allocation2 + $0x550] sm:$0xff] }
  0xee   : > { %v3007_v53 = vpack.c.bf16 %v572_v50, %v568_v49  ;;  %v635_v40 = vld [vmem:[#allocation2 + $0x570] sm:$0xff]  ;;  %v1064_v49 = vld [vmem:[#allocation4 + $0x328] sm:$0xff]  ;;  %v652_v50 = vld [vmem:[#allocation2 + $0x5f8] sm:$0xff] }
  0xef   : > { %3086 = vmatpush1.bf16.msra.mxu0 %v3085_v15  ;;  %v599_v15 = vld [vmem:[#allocation2 + $0x450] sm:$0xff]  ;;  %v3041_v43 = vpack.c.bf16 %v635_v40, %v631_v39 }
  0xf0   : > { %2986 = vmatpush1.bf16.msra.mxu1 %v2985_v58  ;;  %3088 = vmatprep.subr.bf16.mxu0 %v3087_v16  ;;  %v3009_v58 = vpack.c.bf16 %v571_v55, %v567_v54  ;;  %v603_v16 = vld [vmem:[#allocation2 + $0x470] sm:$0xff] }
  0xf1   : > { %2988 = vmatprep.subr.bf16.mxu1 %v2987_v60  ;;  %v579_v60 = vld [vmem:[#allocation2 + $0x3b0] sm:$0xff] }
  0xf2   : > { %v3013_v1 = vpack.c.bf16 %v579_v60, %v575_v30  ;;  %v639_v44 = vld [vmem:[#allocation2 + $0x590] sm:$0xff]  ;;  %v1068_v30 = vld [vmem:[#allocation4 + $0x348] sm:$0xff] }
  0xf3   : > { %3090 = vmatpush1.bf16.msra.mxu0 %v3089_v27  ;;  %v615_v27 = vld [vmem:[#allocation2 + $0x4d0] sm:$0xff]  ;;  %v1072_v60 = vld [vmem:[#allocation4 + $0x368] sm:$0xff] }
  0xf4   : > { %2990 = vmatpush1.bf16.msra.mxu1 %v2989_v7  ;;  %3092 = vmatprep.subr.bf16.mxu0 %v3091_v29  ;;  %v3017_v7 = vpack.c.bf16 %v587_v4, %v583_v3  ;;  %v619_v29 = vld [vmem:[#allocation2 + $0x4f0] sm:$0xff]  ;;  %v3103_v63 = vpack.c.bf16 %v1072_v60, %v1068_v30  ;;  %v3049_v4 = vpack.c.bf16 %v651_v57, %v647_v56 }
  0xf5   : > { %2992 = vmatprep.subr.bf16.mxu1 %v2991_v10  ;;  %v595_v10 = vld [vmem:[#allocation2 + $0x430] sm:$0xff] }
  0xf6   : > { %v3021_v13 = vpack.c.bf16 %v595_v10, %v591_v9  ;;  %v969_v9 = vld [vmem:[#allocation4 + $0x30] sm:$0xff] }
  0xf7   : > { %3094 = vmatpush1.bf16.msra.mxu0 %v3093_v41  ;;  %v640_v41 = vld [vmem:[#allocation2 + $0x598] sm:$0xff]  ;;  %v3181_v18 = vpack.c.bf16 %v969_v9, %v965_v5  ;;  %v973_v23 = vld [vmem:[#allocation4 + $0x50] sm:$0xff] }
  0xf8   : > { %2994 = vmatpush1.bf16.msra.mxu1 %v2993_v19  ;;  %3096 = vmatprep.subr.bf16.mxu0 %v3095_v42  ;;  %v3025_v19 = vpack.c.bf16 %v603_v16, %v599_v15  ;;  %v644_v42 = vld [vmem:[#allocation2 + $0x5b8] sm:$0xff]  ;;  %v3109_v15 = vpack.c.bf16 %v1079_v12, %v1075_v11  ;;  %v1084_v16 = vld [vmem:[#allocation4 + $0x3c8] sm:$0xff]  ;;  %v977_v24 = vld [vmem:[#allocation4 + $0x70] sm:$0xff] }
  0xf9   : > { %2996 = vmatprep.subr.bf16.mxu1 %v2995_v22  ;;  %v611_v22 = vld [vmem:[#allocation2 + $0x4b0] sm:$0xff] }
  0xfa   : > { %v3029_v25 = vpack.c.bf16 %v611_v22, %v607_v21  ;;  %v1087_v21 = vld [vmem:[#allocation4 + $0x3e0] sm:$0xff]  ;;  %v993_v39 = vld [vmem:[#allocation4 + $0xf0] sm:$0xff] }
  0xfb   : > { %3098 = vmatpush1.bf16.msra.mxu0 %v3097_v51  ;;  %v3099_v51 = vpack.c.bf16 %v1064_v49, %v1060_v48  ;;  %v1013_v56 = vld [vmem:[#allocation4 + $0x190] sm:$0xff] }
  0xfc   : > { %2998 = vmatpush1.bf16.msra.mxu1 %v2997_v33  ;;  %v3035_v33 = vpack.c.bf16 %v628_v32, %v624_v31  ;;  %v981_v32 = vld [vmem:[#allocation4 + $0x90] sm:$0xff] }
  0xfd   : > { %3000 = vmatprep.subr.bf16.mxu1 %v2999_v36  ;;  %v636_v36 = vld [vmem:[#allocation2 + $0x578] sm:$0xff]  ;;  %3100 = vmatprep.subr.bf16.mxu0 %v3099_v51  ;;  %v1009_v51 = vld [vmem:[#allocation4 + $0x170] sm:$0xff] }
  0xfe   : > { %v3039_v38 = vpack.c.bf16 %v636_v36, %v632_v35  ;;  %v1092_v35 = vld [vmem:[#allocation4 + $0x408] sm:$0xff]  ;;  %v1017_v57 = vld [vmem:[#allocation4 + $0x1b0] sm:$0xff] }
  0xff   : > { %v1096_v36 = vld [vmem:[#allocation4 + $0x428] sm:$0xff]  ;;  %v3205_v30 = vpack.c.bf16 %v1017_v57, %v1013_v56  ;;  %v1029_v5 = vld [vmem:[#allocation4 + $0x210] sm:$0xff]  ;;  %v4298_v57 = vld [vmem:[%s4463_s2] sm:$0xf] }
 0x100   : > { %3002 = vmatpush1.bf16.msra.mxu1 %v3001_v45  ;;  %v643_v45 = vld [vmem:[#allocation2 + $0x5b0] sm:$0xff]  ;;  %v3115_v40 = vpack.c.bf16 %v1096_v36, %v1092_v35 }
 0x101   : > { %3004 = vmatprep.subr.bf16.mxu1 %v3003_v46  ;;  %v3043_v46 = vpack.c.bf16 %v644_v42, %v640_v41  ;;  %v3045_v55 = vpack.c.bf16 %v643_v45, %v639_v44  ;;  %v998_v41 = vld [vmem:[#allocation4 + $0x118] sm:$0xff]  ;;  %v997_v44 = vld [vmem:[#allocation4 + $0x110] sm:$0xff] }
 0x102   : > { %v1001_v45 = vld [vmem:[#allocation4 + $0x130] sm:$0xff] }
 0x103   : > { %v3197_v48 = vpack.c.bf16 %v1001_v45, %v997_v44  ;;  %v1037_v11 = vld [vmem:[#allocation4 + $0x250] sm:$0xff] }
 0x104   : > { %3006 = vmatpush1.bf16.msra.mxu1 %v3005_v52  ;;  %v1059_v52 = vld [vmem:[#allocation4 + $0x300] sm:$0xff]  ;;  %v1041_v12 = vld [vmem:[#allocation4 + $0x270] sm:$0xff] }
 0x105   : > { %3008 = vmatprep.subr.bf16.mxu1 %v3007_v53  ;;  %v1063_v53 = vld [vmem:[#allocation4 + $0x320] sm:$0xff]  ;;  %v1069_v35 = vld [vmem:[#allocation4 + $0x350] sm:$0xff] }
 0x106   : > { %v3101_v54 = vpack.c.bf16 %v1063_v53, %v1059_v52  ;;  %v1014_v52 = vld [vmem:[#allocation4 + $0x198] sm:$0xff]  ;;  %v1073_v36 = vld [vmem:[#allocation4 + $0x370] sm:$0xff] }
 0x107   : > { %v1018_v53 = vld [vmem:[#allocation4 + $0x1b8] sm:$0xff] }
 0x108   : > { %3010 = vmatpush1.bf16.msra.mxu1 %v3009_v58  ;;  %v3047_v58 = vpack.c.bf16 %v652_v50, %v648_v47  ;;  %3102 = vmatpush1.bf16.msra.mxu0 %v3101_v54  ;;  %v1010_v47 = vld [vmem:[#allocation4 + $0x178] sm:$0xff]  ;;  %v1005_v50 = vld [vmem:[#allocation4 + $0x150] sm:$0xff] }
 0x109   : > { %3012 = vmatprep.subr.bf16.mxu1 %v3011_v59  ;;  %v966_v59 = vld [vmem:[#allocation4 + $0x18] sm:$0xff]  ;;  %3104 = vmatprep.subr.bf16.mxu0 %v3103_v63  ;;  %v3201_v54 = vpack.c.bf16 %v1009_v51, %v1005_v50  ;;  %v1025_v63 = vld [vmem:[#allocation4 + $0x1f0] sm:$0xff] }
 0x10c   : > { %3014 = vmatpush1.bf16.msra.mxu1 %v3013_v1  ;;  %v1067_v1 = vld [vmem:[#allocation4 + $0x340] sm:$0xff] }
 0x10d   : > { %3016 = vmatprep.subr.bf16.mxu1 %v3015_v2  ;;  %v1071_v2 = vld [vmem:[#allocation4 + $0x360] sm:$0xff] }
 0x10e   : > { %v3105_v3 = vpack.c.bf16 %v1071_v2, %v1067_v1  ;;  %v1030_v1 = vld [vmem:[#allocation4 + $0x218] sm:$0xff] }
 0x10f   : > { %v1034_v2 = vld [vmem:[#allocation4 + $0x238] sm:$0xff] }
 0x110   : > { %3018 = vmatpush1.bf16.msra.mxu1 %v3017_v7  ;;  %v1080_v7 = vld [vmem:[#allocation4 + $0x3a8] sm:$0xff]  ;;  %3106 = vmatpush1.bf16.msra.mxu0 %v3105_v3 }
 0x111   : > { %3020 = vmatprep.subr.bf16.mxu1 %v3019_v8  ;;  %v3179_v8 = vpack.c.bf16 %v970_v62, %v966_v59  ;;  %v3107_v10 = vpack.c.bf16 %v1080_v7, %v1076_v6  ;;  %v1026_v59 = vld [vmem:[#allocation4 + $0x1f8] sm:$0xff]  ;;  %v1021_v62 = vld [vmem:[#allocation4 + $0x1d0] sm:$0xff] }
 0x112   : > { %v3209_v3 = vpack.c.bf16 %v1025_v63, %v1021_v62  ;;  %v1033_v6 = vld [vmem:[#allocation4 + $0x230] sm:$0xff]  ;;  %v1038_v7 = vld [vmem:[#allocation4 + $0x258] sm:$0xff] }
 0x113   : > { %882 = vmatmul.mubr.f32.vlgmr.msra.gmra.mrb[2].mxu1 %v4283_v28  ;;  %v3033_v28 = vpack.c.bf16 %v619_v29, %v615_v27  ;;  %3108 = vmatprep.subr.bf16.mxu0 %v3107_v10  ;;  %v986_v27 = vld [vmem:[#allocation4 + $0xb8] sm:$0xff]  ;;  %v3185_v29 = vpack.c.bf16 %v977_v24, %v973_v23  ;;  %v3213_v9 = vpack.c.bf16 %v1033_v6, %v1029_v5  ;;  %v1053_v23 = vld [vmem:[#allocation4 + $0x2d0] sm:$0xff]  ;;  %v1095_v5 = vld [vmem:[#allocation4 + $0x420] sm:$0xff] }
 0x114   : > { %3022 = vmatpush1.bf16.msra.mxu1 %v3021_v13  ;;  %952 = vmatprep.mubr.f32.mxu1 %v4035_v0  ;;  %v627_v0 = vld [vmem:[#allocation2 + $0x530] sm:$0xff]  ;;  %v974_v13 = vld [vmem:[#allocation4 + $0x58] sm:$0xff] }
 0x115   : > { %3024 = vmatprep.subr.bf16.mxu1 %v3023_v14  ;;  %v3037_v37 = vpack.c.bf16 %v627_v0, %v623_v34  ;;  %v978_v14 = vld [vmem:[#allocation4 + $0x78] sm:$0xff]  ;;  %3110 = vmatpush1.bf16.msra.mxu0 %v3109_v15  ;;  %v3217_v15 = vpack.c.bf16 %v1041_v12, %v1037_v11  ;;  %v1057_v24 = vld [vmem:[#allocation4 + $0x2f0] sm:$0xff] }
 0x116   : > { %v3183_v22 = vpack.c.bf16 %v978_v14, %v974_v13  ;;  %v994_v34 = vld [vmem:[#allocation4 + $0xf8] sm:$0xff]  ;;  %v1093_v6 = vld [vmem:[#allocation4 + $0x410] sm:$0xff] }
 0x117   : > { %v1046_v13 = vld [vmem:[#allocation4 + $0x298] sm:$0xff] }
 0x118   : > { %3026 = vmatpush1.bf16.msra.mxu1 %v3025_v19  ;;  %v3111_v19 = vpack.c.bf16 %v1088_v17, %v1084_v16  ;;  %v1050_v14 = vld [vmem:[#allocation4 + $0x2b8] sm:$0xff]  ;;  %v1045_v17 = vld [vmem:[#allocation4 + $0x290] sm:$0xff] }
 0x119   : > { %3028 = vmatprep.subr.bf16.mxu1 %v3027_v20  ;;  %v1083_v20 = vld [vmem:[#allocation4 + $0x3c0] sm:$0xff]  ;;  %v3219_v16 = vpack.c.bf16 %v1050_v14, %v1046_v13  ;;  %v1106_v11 = vld [vmem:[#allocation4 + $0x478] sm:$0xff] }
 0x11a   : > { %3112 = vmatprep.subr.bf16.mxu0 %v3111_v19  ;;  %v1054_v19 = vld [vmem:[#allocation4 + $0x2d8] sm:$0xff] }
 0x11c   : > { %3030 = vmatpush1.bf16.msra.mxu1 %v3029_v25  ;;  %v3113_v25 = vpack.c.bf16 %v1087_v21, %v1083_v20  ;;  %v1058_v20 = vld [vmem:[#allocation4 + $0x2f8] sm:$0xff] }
 0x11d   : > { %3032 = vmatprep.subr.bf16.mxu1 %v3031_v26  ;;  %v982_v26 = vld [vmem:[#allocation4 + $0x98] sm:$0xff] }
 0x11e   : > { %v3187_v31 = vpack.c.bf16 %v986_v27, %v982_v26  ;;  %3114 = vmatpush1.bf16.msra.mxu0 %v3113_v25  ;;  %v1062_v25 = vld [vmem:[#allocation4 + $0x318] sm:$0xff]  ;;  %v3225_v27 = vpack.c.bf16 %v1057_v24, %v1053_v23  ;;  %v1112_v23 = vld [vmem:[#allocation4 + $0x4a8] sm:$0xff] }
 0x11f   : > { %3116 = vmatprep.subr.bf16.mxu0 %v3115_v40  ;;  %v1066_v26 = vld [vmem:[#allocation4 + $0x338] sm:$0xff] }
 0x120   : > { %3034 = vmatpush1.bf16.msra.mxu1 %v3033_v28  ;;  %v985_v28 = vld [vmem:[#allocation4 + $0xb0] sm:$0xff]  ;;  %v1110_v24 = vld [vmem:[#allocation4 + $0x498] sm:$0xff] }
 0x121   : > { %3036 = vmatprep.subr.bf16.mxu1 %v3035_v33  ;;  %v990_v33 = vld [vmem:[#allocation4 + $0xd8] sm:$0xff]  ;;  %v3189_v0 = vpack.c.bf16 %v985_v28, %v981_v32  ;;  %v1065_v32 = vld [vmem:[#allocation4 + $0x330] sm:$0xff] }
 0x122   : > { %v1070_v28 = vld [vmem:[#allocation4 + $0x358] sm:$0xff] }
 0x124   : > { %3038 = vmatpush1.bf16.msra.mxu1 %v3037_v37  ;;  %v3191_v37 = vpack.c.bf16 %v994_v34, %v990_v33  ;;  %v1074_v33 = vld [vmem:[#allocation4 + $0x378] sm:$0xff] }
 0x125   : > { %3040 = vmatprep.subr.bf16.mxu1 %v3039_v38  ;;  %v989_v38 = vld [vmem:[#allocation4 + $0xd0] sm:$0xff] }
 0x126   : > { %v3193_v42 = vpack.c.bf16 %v993_v39, %v989_v38  ;;  %v1082_v38 = vld [vmem:[#allocation4 + $0x3b8] sm:$0xff]  ;;  %v3233_v39 = vpack.c.bf16 %v1073_v36, %v1069_v35  ;;  %v1120_v35 = vld [vmem:[#allocation4 + $0x4e8] sm:$0xff] }
 0x127   : > { %v1118_v36 = vld [vmem:[#allocation4 + $0x4d8] sm:$0xff] }
 0x128   : > { %3042 = vmatpush1.bf16.msra.mxu1 %v3041_v43 }
 0x129   : > { %3044 = vmatprep.subr.bf16.mxu1 %v3043_v46  ;;  %v1006_v46 = vld [vmem:[#allocation4 + $0x158] sm:$0xff] }
 0x12a   : > { %v3199_v49 = vpack.c.bf16 %v1010_v47, %v1006_v46  ;;  %v1085_v46 = vld [vmem:[#allocation4 + $0x3d0] sm:$0xff] }
 0x12b   : > { %v1089_v47 = vld [vmem:[#allocation4 + $0x3f0] sm:$0xff] }
 0x12c   : > { %3046 = vmatpush1.bf16.msra.mxu1 %v3045_v55  ;;  %v3203_v55 = vpack.c.bf16 %v1018_v53, %v1014_v52  ;;  %v3241_v50 = vpack.c.bf16 %v1089_v47, %v1085_v46  ;;  %v1128_v46 = vld [vmem:[#allocation4 + $0x528] sm:$0xff]  ;;  %v1126_v47 = vld [vmem:[#allocation4 + $0x518] sm:$0xff] }
 0x12d   : > { %3048 = vmatprep.subr.bf16.mxu1 %v3047_v58  ;;  %v1022_v58 = vld [vmem:[#allocation4 + $0x1d8] sm:$0xff] }
 0x12e   : > { %v3207_v60 = vpack.c.bf16 %v1026_v59, %v1022_v58 }
 0x130   : > { %3050 = vmatpush1.bf16.msra.mxu1 %v3049_v4  ;;  %v3211_v4 = vpack.c.bf16 %v1034_v2, %v1030_v1 }
 0x131   : > { %3180 = vmatprep.subr.bf16.mxu1 %v3179_v8  ;;  %v1042_v8 = vld [vmem:[#allocation4 + $0x278] sm:$0xff] }
 0x132   : > { %v3215_v10 = vpack.c.bf16 %v1042_v8, %v1038_v7  ;;  %v1097_v7 = vld [vmem:[#allocation4 + $0x430] sm:$0xff]  ;;  %v1100_v8 = vld [vmem:[#allocation4 + $0x448] sm:$0xff] }
 0x133   : > { %953 = vmatmul.mubr.f32.vlgmr.msra.gmra.mrb[2].mxu1 %v4279_v61  ;;  %v1002_v61 = vld [vmem:[#allocation4 + $0x138] sm:$0xff]  ;;  %v3245_v14 = vpack.c.bf16 %v1097_v7, %v1093_v6 }
 0x134   : > { %3182 = vmatpush1.bf16.msra.mxu1 %v3181_v18  ;;  %v3195_v43 = vpack.c.bf16 %v1002_v61, %v998_v41  ;;  %v1049_v18 = vld [vmem:[#allocation4 + $0x2b0] sm:$0xff] }
 0x135   : > { %3184 = vmatprep.subr.bf16.mxu1 %v3183_v22  ;;  %v3221_v21 = vpack.c.bf16 %v1049_v18, %v1045_v17  ;;  %v3223_v22 = vpack.c.bf16 %v1058_v20, %v1054_v19  ;;  %v1077_v41 = vld [vmem:[#allocation4 + $0x390] sm:$0xff] }
 0x136   : > { %v1081_v61 = vld [vmem:[#allocation4 + $0x3b0] sm:$0xff] }
 0x137   : > { %v3237_v44 = vpack.c.bf16 %v1081_v61, %v1077_v41  ;;  %v1101_v20 = vld [vmem:[#allocation4 + $0x450] sm:$0xff]  ;;  %v1119_v41 = vld [vmem:[#allocation4 + $0x4e0] sm:$0xff] }
 0x138   : > { %3186 = vmatpush1.bf16.msra.mxu1 %v3185_v29  ;;  %v3227_v29 = vpack.c.bf16 %v1066_v26, %v1062_v25  ;;  %v1114_v25 = vld [vmem:[#allocation4 + $0x4b8] sm:$0xff] }
 0x139   : > { %3188 = vmatprep.subr.bf16.mxu1 %v3187_v31  ;;  %v1061_v31 = vld [vmem:[#allocation4 + $0x310] sm:$0xff] }
 0x13a   : > { %v3229_v34 = vpack.c.bf16 %v1065_v32, %v1061_v31  ;;  %v1111_v31 = vld [vmem:[#allocation4 + $0x4a0] sm:$0xff] }
 0x13c   : > { %3190 = vmatpush1.bf16.msra.mxu1 %v3189_v0  ;;  %v3231_v0 = vpack.c.bf16 %v1074_v33, %v1070_v28  ;;  %v3251_v28 = vpack.c.bf16 %v1114_v25, %v1110_v24  ;;  %v1109_v33 = vld [vmem:[#allocation4 + $0x490] sm:$0xff]  ;;  %v1150_v24 = vld [vmem:[#allocation4 + $0x5d8] sm:$0xff] }
 0x13d   : > { %3192 = vmatprep.subr.bf16.mxu1 %v3191_v37  ;;  %v1078_v37 = vld [vmem:[#allocation4 + $0x398] sm:$0xff] }
 0x13e   : > { %v3235_v40 = vpack.c.bf16 %v1082_v38, %v1078_v37  ;;  %v1122_v37 = vld [vmem:[#allocation4 + $0x4f8] sm:$0xff] }
 0x13f   : > { %v1154_v25 = vld [vmem:[#allocation4 + $0x5f8] sm:$0xff] }
 0x140   : > { %3194 = vmatpush1.bf16.msra.mxu1 %v3193_v42  ;;  %v1086_v42 = vld [vmem:[#allocation4 + $0x3d8] sm:$0xff] }
 0x141   : > { %3196 = vmatprep.subr.bf16.mxu1 %v3195_v43  ;;  %v1090_v43 = vld [vmem:[#allocation4 + $0x3f8] sm:$0xff] }
 0x142   : > { %v3239_v45 = vpack.c.bf16 %v1090_v43, %v1086_v42  ;;  %v3255_v42 = vpack.c.bf16 %v1122_v37, %v1118_v36  ;;  %v1117_v43 = vld [vmem:[#allocation4 + $0x4d0] sm:$0xff]  ;;  %v1158_v36 = vld [vmem:[#allocation4 + $0x618] sm:$0xff] }
 0x143   : > { %v1162_v37 = vld [vmem:[#allocation4 + $0x638] sm:$0xff] }
 0x144   : > { %3198 = vmatpush1.bf16.msra.mxu1 %v3197_v48  ;;  %v1094_v48 = vld [vmem:[#allocation4 + $0x418] sm:$0xff] }
 0x145   : > { %3200 = vmatprep.subr.bf16.mxu1 %v3199_v49  ;;  %v1098_v49 = vld [vmem:[#allocation4 + $0x438] sm:$0xff] }
 0x146   : > { %v3243_v51 = vpack.c.bf16 %v1098_v49, %v1094_v48  ;;  %v1130_v48 = vld [vmem:[#allocation4 + $0x538] sm:$0xff] }
 0x148   : > { %3202 = vmatpush1.bf16.msra.mxu1 %v3201_v54  ;;  %v655_v54 = vlaneseq }
 0x149   : > { %3204 = vmatprep.subr.bf16.mxu1 %v3203_v55 }
 0x14a   : > { %v4290_v55 = vshrl.u32 %v655_v54, 7  ;;  %v3259_v54 = vpack.c.bf16 %v1130_v48, %v1126_v47  ;;  %v1166_v47 = vld [vmem:[#allocation4 + $0x658] sm:$0xff] }
 0x14b   : > { %v1170_v48 = vld [vmem:[#allocation4 + $0x678] sm:$0xff] }
 0x14c   : > { %3206 = vmatpush1.bf16.msra.mxu1 %v3205_v30  ;;  %v4293_v56 = vsub.s32 0, %v4290_v55  ;;  %v4301_v58 = vsub.s32 1, %v4290_v55 }
 0x14d   : > { %3208 = vmatprep.subr.bf16.mxu1 %v3207_v60 }
 0x14e   : > { %v658_v59 = vrot.slane %v4298_v57, %v4293_v56  ;;  %v662_v30 = vrot.slane %v4298_v57, %v4301_v58 }
 0x150   : > { %3210 = vmatpush1.bf16.msra.mxu1 %v3209_v3 }
 0x151   : > { %3212 = vmatprep.subr.bf16.mxu1 %v3211_v4  ;;  %v1091_v4 = vld [vmem:[#allocation4 + $0x400] sm:$0xff] }
 0x152   : > { %v3117_v13 = vpack.c.bf16 %v1095_v5, %v1091_v4  ;;  %v1131_v4 = vld [vmem:[#allocation4 + $0x540] sm:$0xff] }
 0x153   : > { %v1135_v5 = vld [vmem:[#allocation4 + $0x560] sm:$0xff] }
 0x154   : > { %3214 = vmatpush1.bf16.msra.mxu1 %v3213_v9  ;;  %v1104_v9 = vld [vmem:[#allocation4 + $0x468] sm:$0xff] }
 0x155   : > { %3216 = vmatprep.subr.bf16.mxu1 %v3215_v10  ;;  %v1102_v10 = vld [vmem:[#allocation4 + $0x458] sm:$0xff]  ;;  %v3119_v18 = vpack.c.bf16 %v1104_v9, %v1100_v8  ;;  %v1133_v8 = vld [vmem:[#allocation4 + $0x550] sm:$0xff] }
 0x156   : > { %v3247_v19 = vpack.c.bf16 %v1106_v11, %v1102_v10  ;;  %v1137_v9 = vld [vmem:[#allocation4 + $0x570] sm:$0xff]  ;;  %v1140_v10 = vld [vmem:[#allocation4 + $0x588] sm:$0xff] }
 0x157   : > { %v1144_v11 = vld [vmem:[#allocation4 + $0x5a8] sm:$0xff] }
 0x158   : > { %3218 = vmatpush1.bf16.msra.mxu1 %v3217_v15  ;;  %v1099_v15 = vld [vmem:[#allocation4 + $0x440] sm:$0xff] }
 0x159   : > { %3220 = vmatprep.subr.bf16.mxu1 %v3219_v16  ;;  %v1103_v16 = vld [vmem:[#allocation4 + $0x460] sm:$0xff] }
 0x15a   : > { %v3121_v26 = vpack.c.bf16 %v1103_v16, %v1099_v15  ;;  %v3265_v15 = vpack.c.bf16 %v1137_v9, %v1133_v8  ;;  %v1139_v16 = vld [vmem:[#allocation4 + $0x580] sm:$0xff]  ;;  %v1173_v8 = vld [vmem:[#allocation4 + $0x690] sm:$0xff] }
 0x15b   : > { %v1177_v9 = vld [vmem:[#allocation4 + $0x6b0] sm:$0xff] }
 0x15c   : > { %3222 = vmatpush1.bf16.msra.mxu1 %v3221_v21  ;;  %v1105_v21 = vld [vmem:[#allocation4 + $0x470] sm:$0xff] }
 0x15d   : > { %3224 = vmatprep.subr.bf16.mxu1 %v3223_v22  ;;  %v1108_v22 = vld [vmem:[#allocation4 + $0x488] sm:$0xff] }
 0x15e   : > { %v3123_v32 = vpack.c.bf16 %v1112_v23, %v1108_v22  ;;  %v1148_v22 = vld [vmem:[#allocation4 + $0x5c8] sm:$0xff] }
 0x15f   : > { %v1152_v23 = vld [vmem:[#allocation4 + $0x5e8] sm:$0xff] }
 0x160   : > { %3226 = vmatpush1.bf16.msra.mxu1 %v3225_v27  ;;  %v3249_v27 = vpack.c.bf16 %v1105_v21, %v1101_v20  ;;  %v1141_v20 = vld [vmem:[#allocation4 + $0x590] sm:$0xff] }
 0x161   : > { %3228 = vmatprep.subr.bf16.mxu1 %v3227_v29  ;;  %v1107_v29 = vld [vmem:[#allocation4 + $0x480] sm:$0xff]  ;;  %v1145_v21 = vld [vmem:[#allocation4 + $0x5b0] sm:$0xff] }
 0x162   : > { %v3125_v38 = vpack.c.bf16 %v1111_v31, %v1107_v29  ;;  %v1147_v29 = vld [vmem:[#allocation4 + $0x5c0] sm:$0xff] }
 0x163   : > { %v1151_v31 = vld [vmem:[#allocation4 + $0x5e0] sm:$0xff] }
 0x164   : > { %3230 = vmatpush1.bf16.msra.mxu1 %v3229_v34  ;;  %v1113_v34 = vld [vmem:[#allocation4 + $0x4b0] sm:$0xff] }
 0x165   : > { %3232 = vmatprep.subr.bf16.mxu1 %v3231_v0  ;;  %v1116_v0 = vld [vmem:[#allocation4 + $0x4c8] sm:$0xff] }
 0x166   : > { %v3127_v61 = vpack.c.bf16 %v1120_v35, %v1116_v0  ;;  %v1156_v0 = vld [vmem:[#allocation4 + $0x608] sm:$0xff] }
 0x167   : > { %v1160_v35 = vld [vmem:[#allocation4 + $0x628] sm:$0xff] }
 0x168   : > { %3234 = vmatpush1.bf16.msra.mxu1 %v3233_v39  ;;  %v3253_v39 = vpack.c.bf16 %v1113_v34, %v1109_v33  ;;  %v1149_v33 = vld [vmem:[#allocation4 + $0x5d0] sm:$0xff] }
 0x169   : > { %3236 = vmatprep.subr.bf16.mxu1 %v3235_v40  ;;  %v1115_v40 = vld [vmem:[#allocation4 + $0x4c0] sm:$0xff]  ;;  %v1153_v34 = vld [vmem:[#allocation4 + $0x5f0] sm:$0xff] }
 0x16a   : > { %v3129_v49 = vpack.c.bf16 %v1119_v41, %v1115_v40  ;;  %v1155_v40 = vld [vmem:[#allocation4 + $0x600] sm:$0xff] }
 0x16b   : > { %v1159_v41 = vld [vmem:[#allocation4 + $0x620] sm:$0xff] }
 0x16c   : > { %3238 = vmatpush1.bf16.msra.mxu1 %v3237_v44  ;;  %v1121_v44 = vld [vmem:[#allocation4 + $0x4f0] sm:$0xff] }
 0x16d   : > { %3240 = vmatprep.subr.bf16.mxu1 %v3239_v45  ;;  %v1124_v45 = vld [vmem:[#allocation4 + $0x508] sm:$0xff] }
 0x170   : > { %3242 = vmatpush1.bf16.msra.mxu1 %v3241_v50  ;;  %v3257_v50 = vpack.c.bf16 %v1121_v44, %v1117_v43  ;;  %v1157_v43 = vld [vmem:[#allocation4 + $0x610] sm:$0xff] }
 0x171   : > { %3244 = vmatprep.subr.bf16.mxu1 %v3243_v51  ;;  %v1123_v51 = vld [vmem:[#allocation4 + $0x500] sm:$0xff]  ;;  %v1161_v44 = vld [vmem:[#allocation4 + $0x630] sm:$0xff] }
 0x190   : > { %v812_v52 = vpop.f32.mrb[0].mxu0 }
 0x191   : > { %v814_v53 = vpop.f32.mrb[1].mxu0 }
 0x1a6   : > { %v741_v60 = vpop.f32.mrb[0].mxu1 }
 0x1a7   : > { %v742_v62 = vadd.f32 %v741_v60, %v658_v59  ;;  %v743_v63 = vpop.f32.mrb[1].mxu1  ;;  %v1125_v59 = vld [vmem:[#allocation4 + $0x510] sm:$0xff]  ;;  %v1132_v60 = vld [vmem:[#allocation4 + $0x548] sm:$0xff] }
 0x1a8   : > { %v744_v1 = vadd.f32 %v743_v63, %v662_v30  ;;  %v1129_v30 = vld [vmem:[#allocation4 + $0x530] sm:$0xff]  ;;  %v1134_v63 = vld [vmem:[#allocation4 + $0x558] sm:$0xff] }
 0x1a9   : > { %v813_v2 = vadd.f32 %v812_v52, %v742_v62  ;;  %v1127_v52 = vld [vmem:[#allocation4 + $0x520] sm:$0xff]  ;;  %v1136_v62 = vld [vmem:[#allocation4 + $0x568] sm:$0xff] }
 0x1aa   : > { %v815_v3 = vadd.f32 %v814_v53, %v744_v1  ;;  %v3131_v53 = vpack.c.bf16 %v1128_v46, %v1124_v45  ;;  %v1138_v1 = vld [vmem:[#allocation4 + $0x578] sm:$0xff]  ;;  %v3135_v6 = vpack.c.bf16 %v1136_v62, %v1132_v60  ;;  %v1164_v45 = vld [vmem:[#allocation4 + $0x648] sm:$0xff] }
 0x1ab   : > { %3832 = vtanh.f32 %v813_v2  ;;  %v3133_v2 = vpack.c.bf16 %v1127_v52, %v1123_v51  ;;  %v3263_v7 = vpack.c.bf16 %v1138_v1, %v1134_v63  ;;  %v1168_v46 = vld [vmem:[#allocation4 + $0x668] sm:$0xff]  ;;  %v1163_v51 = vld [vmem:[#allocation4 + $0x640] sm:$0xff]  ;;  %v1174_v63 = vld [vmem:[#allocation4 + $0x698] sm:$0xff] }
 0x1ac   : > { %3834 = vtanh.f32 %v815_v3  ;;  %v3261_v3 = vpack.c.bf16 %v1129_v30, %v1125_v59  ;;  %v1167_v52 = vld [vmem:[#allocation4 + $0x660] sm:$0xff]  ;;  %v1165_v59 = vld [vmem:[#allocation4 + $0x650] sm:$0xff]  ;;  %v1172_v60 = vld [vmem:[#allocation4 + $0x688] sm:$0xff] }
 0x1ad   : > { %v1169_v30 = vld [vmem:[#allocation4 + $0x670] sm:$0xff]  ;;  %v1176_v62 = vld [vmem:[#allocation4 + $0x6a8] sm:$0xff]  ;;  %v1178_v1 = vld [vmem:[#allocation4 + $0x6b8] sm:$0xff] }
 0x1b5   : > { %v3833_v12 = vpop.eup %3832 }
 0x1b6   : > { %v3835_v17 = vpop.eup %3834 }
 0x1b7   : > { %1305 = vmatprep.mubr.f32.mxu0 %v3835_v17  ;;  %1447 = vmatprep.mubr.f32.mxu1 %v3835_v17  ;;  %v1143_v17 = vld [vmem:[#allocation4 + $0x5a0] sm:$0xff] }
 0x1b8   : > { %1306 = vmatmul.mubr.f32.vlgmr.msra.gmra.mrb[2].mxu0 %v3833_v12  ;;  %1448 = vmatmul.mubr.f32.vlgmr.msra.gmra.mrb[4].mxu1 %v3833_v12  ;;  %v1142_v12 = vld [vmem:[#allocation4 + $0x598] sm:$0xff] }
 0x1b9   : > { %3118 = vmatpush1.bf16.msra.mxu0 %v3117_v13  ;;  %3246 = vmatpush1.bf16.msra.mxu1 %v3245_v14  ;;  %v1146_v13 = vld [vmem:[#allocation4 + $0x5b8] sm:$0xff]  ;;  %v3137_v14 = vpack.c.bf16 %v1135_v5, %v1131_v4  ;;  %v1171_v4 = vld [vmem:[#allocation4 + $0x680] sm:$0xff] }
 0x1ba   : > { %3120 = vmatprep.subr.bf16.mxu0 %v3119_v18  ;;  %3248 = vmatprep.subr.bf16.mxu1 %v3247_v19  ;;  %v3139_v18 = vpack.c.bf16 %v1144_v11, %v1140_v10  ;;  %v3267_v19 = vpack.c.bf16 %v1146_v13, %v1142_v12  ;;  %v1175_v5 = vld [vmem:[#allocation4 + $0x6a0] sm:$0xff]  ;;  %v1180_v10 = vld [vmem:[#allocation4 + $0x6c8] sm:$0xff]  ;;  %v1182_v12 = vld [vmem:[#allocation4 + $0x6d8] sm:$0xff] }
 0x1bb   : > { %v1184_v11 = vld [vmem:[#allocation4 + $0x6e8] sm:$0xff]  ;;  %v1186_v13 = vld [vmem:[#allocation4 + $0x6f8] sm:$0xff] }
 0x1bd   : > { %3122 = vmatpush1.bf16.msra.mxu0 %v3121_v26  ;;  %3250 = vmatpush1.bf16.msra.mxu1 %v3249_v27  ;;  %v3141_v26 = vpack.c.bf16 %v1143_v17, %v1139_v16  ;;  %v3269_v27 = vpack.c.bf16 %v1145_v21, %v1141_v20  ;;  %v1179_v16 = vld [vmem:[#allocation4 + $0x6c0] sm:$0xff]  ;;  %v1181_v20 = vld [vmem:[#allocation4 + $0x6d0] sm:$0xff] }
 0x1be   : > { %3124 = vmatprep.subr.bf16.mxu0 %v3123_v32  ;;  %3252 = vmatprep.subr.bf16.mxu1 %v3251_v28  ;;  %v3143_v32 = vpack.c.bf16 %v1152_v23, %v1148_v22  ;;  %v3271_v28 = vpack.c.bf16 %v1154_v25, %v1150_v24  ;;  %v1183_v17 = vld [vmem:[#allocation4 + $0x6e0] sm:$0xff]  ;;  %v1185_v21 = vld [vmem:[#allocation4 + $0x6f0] sm:$0xff]  ;;  %v1188_v22 = vld [vmem:[#allocation4 + $0x708] sm:$0xff] }
 0x1bf   : > { %v1192_v23 = vld [vmem:[#allocation4 + $0x728] sm:$0xff]  ;;  %v1190_v24 = vld [vmem:[#allocation4 + $0x718] sm:$0xff] }
 0x1c0   : > { %v1194_v25 = vld [vmem:[#allocation4 + $0x738] sm:$0xff] }
 0x1c1   : > { %3126 = vmatpush1.bf16.msra.mxu0 %v3125_v38  ;;  %3254 = vmatpush1.bf16.msra.mxu1 %v3253_v39  ;;  %v3145_v38 = vpack.c.bf16 %v1151_v31, %v1147_v29  ;;  %v3273_v39 = vpack.c.bf16 %v1153_v34, %v1149_v33  ;;  %v1187_v29 = vld [vmem:[#allocation4 + $0x700] sm:$0xff]  ;;  %v1189_v33 = vld [vmem:[#allocation4 + $0x710] sm:$0xff] }
 0x1c2   : > { %3128 = vmatprep.subr.bf16.mxu0 %v3127_v61  ;;  %3256 = vmatprep.subr.bf16.mxu1 %v3255_v42  ;;  %v3147_v61 = vpack.c.bf16 %v1160_v35, %v1156_v0  ;;  %v3275_v42 = vpack.c.bf16 %v1162_v37, %v1158_v36  ;;  %v1191_v31 = vld [vmem:[#allocation4 + $0x720] sm:$0xff]  ;;  %v1193_v34 = vld [vmem:[#allocation4 + $0x730] sm:$0xff]  ;;  %v1196_v0 = vld [vmem:[#allocation4 + $0x748] sm:$0xff] }
 0x1c3   : > { %v1200_v35 = vld [vmem:[#allocation4 + $0x768] sm:$0xff]  ;;  %v1198_v36 = vld [vmem:[#allocation4 + $0x758] sm:$0xff] }
 0x1c4   : > { %v1202_v37 = vld [vmem:[#allocation4 + $0x778] sm:$0xff] }
 0x1c5   : > { %3130 = vmatpush1.bf16.msra.mxu0 %v3129_v49  ;;  %3258 = vmatpush1.bf16.msra.mxu1 %v3257_v50  ;;  %v3149_v49 = vpack.c.bf16 %v1159_v41, %v1155_v40  ;;  %v3277_v50 = vpack.c.bf16 %v1161_v44, %v1157_v43  ;;  %v1195_v40 = vld [vmem:[#allocation4 + $0x740] sm:$0xff]  ;;  %v1197_v43 = vld [vmem:[#allocation4 + $0x750] sm:$0xff] }
 0x1c6   : > { %3132 = vmatprep.subr.bf16.mxu0 %v3131_v53  ;;  %3260 = vmatprep.subr.bf16.mxu1 %v3259_v54  ;;  %v3151_v53 = vpack.c.bf16 %v1168_v46, %v1164_v45  ;;  %v3279_v54 = vpack.c.bf16 %v1170_v48, %v1166_v47  ;;  %v1199_v41 = vld [vmem:[#allocation4 + $0x760] sm:$0xff]  ;;  %v1201_v44 = vld [vmem:[#allocation4 + $0x770] sm:$0xff]  ;;  %v1204_v45 = vld [vmem:[#allocation4 + $0x788] sm:$0xff] }
 0x1c7   : > { %v1208_v46 = vld [vmem:[#allocation4 + $0x7a8] sm:$0xff]  ;;  %v1206_v47 = vld [vmem:[#allocation4 + $0x798] sm:$0xff] }
 0x1c8   : > { %v1210_v48 = vld [vmem:[#allocation4 + $0x7b8] sm:$0xff] }
 0x1c9   : > { %3134 = vmatpush1.bf16.msra.mxu0 %v3133_v2  ;;  %3262 = vmatpush1.bf16.msra.mxu1 %v3261_v3  ;;  %v3153_v2 = vpack.c.bf16 %v1167_v52, %v1163_v51  ;;  %v3281_v3 = vpack.c.bf16 %v1169_v30, %v1165_v59  ;;  %v1203_v51 = vld [vmem:[#allocation4 + $0x780] sm:$0xff]  ;;  %v1205_v59 = vld [vmem:[#allocation4 + $0x790] sm:$0xff] }
 0x1ca   : > { %3136 = vmatprep.subr.bf16.mxu0 %v3135_v6  ;;  %3264 = vmatprep.subr.bf16.mxu1 %v3263_v7  ;;  %v3155_v6 = vpack.c.bf16 %v1176_v62, %v1172_v60  ;;  %v3283_v7 = vpack.c.bf16 %v1178_v1, %v1174_v63  ;;  %v1207_v52 = vld [vmem:[#allocation4 + $0x7a0] sm:$0xff]  ;;  %v1209_v30 = vld [vmem:[#allocation4 + $0x7b0] sm:$0xff]  ;;  %v1212_v60 = vld [vmem:[#allocation4 + $0x7c8] sm:$0xff] }
 0x1cb   : > { %v1216_v62 = vld [vmem:[#allocation4 + $0x7e8] sm:$0xff]  ;;  %v1214_v63 = vld [vmem:[#allocation4 + $0x7d8] sm:$0xff] }
 0x1cc   : > { %v1218_v1 = vld [vmem:[#allocation4 + $0x7f8] sm:$0xff] }
 0x1cd   : > { %3138 = vmatpush1.bf16.msra.mxu0 %v3137_v14  ;;  %3266 = vmatpush1.bf16.msra.mxu1 %v3265_v15  ;;  %v3157_v14 = vpack.c.bf16 %v1175_v5, %v1171_v4  ;;  %v3285_v15 = vpack.c.bf16 %v1177_v9, %v1173_v8  ;;  %v1211_v4 = vld [vmem:[#allocation4 + $0x7c0] sm:$0xff]  ;;  %v1213_v8 = vld [vmem:[#allocation4 + $0x7d0] sm:$0xff] }
 0x1ce   : > { %3140 = vmatprep.subr.bf16.mxu0 %v3139_v18  ;;  %3268 = vmatprep.subr.bf16.mxu1 %v3267_v19  ;;  %v3159_v18 = vpack.c.bf16 %v1184_v11, %v1180_v10  ;;  %v3287_v19 = vpack.c.bf16 %v1186_v13, %v1182_v12  ;;  %v1215_v5 = vld [vmem:[#allocation4 + $0x7e0] sm:$0xff]  ;;  %v1217_v9 = vld [vmem:[#allocation4 + $0x7f0] sm:$0xff]  ;;  %v1530_v10 = vld [vmem:[#allocation6 + $0x8] sm:$0xff] }
 0x1cf   : > { %v1534_v11 = vld [vmem:[#allocation6 + $0x28] sm:$0xff]  ;;  %v1532_v12 = vld [vmem:[#allocation6 + $0x18] sm:$0xff] }
 0x1d0   : > { %v1536_v13 = vld [vmem:[#allocation6 + $0x38] sm:$0xff] }
 0x1d1   : > { %3142 = vmatpush1.bf16.msra.mxu0 %v3141_v26  ;;  %3270 = vmatpush1.bf16.msra.mxu1 %v3269_v27  ;;  %v3161_v26 = vpack.c.bf16 %v1183_v17, %v1179_v16  ;;  %v3289_v27 = vpack.c.bf16 %v1185_v21, %v1181_v20  ;;  %v3307_v16 = vpack.c.bf16 %v1534_v11, %v1530_v10 }
 0x1d2   : > { %3144 = vmatprep.subr.bf16.mxu0 %v3143_v32  ;;  %3272 = vmatprep.subr.bf16.mxu1 %v3271_v28  ;;  %v3163_v32 = vpack.c.bf16 %v1192_v23, %v1188_v22  ;;  %v3291_v28 = vpack.c.bf16 %v1194_v25, %v1190_v24  ;;  %v3435_v17 = vpack.c.bf16 %v1536_v13, %v1532_v12  ;;  %v1561_v12 = vld [vmem:[#allocation6 + $0x100] sm:$0xff] }
 0x1d3   : > { %v1565_v13 = vld [vmem:[#allocation6 + $0x120] sm:$0xff] }
 0x1d5   : > { %3146 = vmatpush1.bf16.msra.mxu0 %v3145_v38  ;;  %3274 = vmatpush1.bf16.msra.mxu1 %v3273_v39  ;;  %v3165_v38 = vpack.c.bf16 %v1191_v31, %v1187_v29  ;;  %v3293_v39 = vpack.c.bf16 %v1193_v34, %v1189_v33  ;;  %v1531_v29 = vld [vmem:[#allocation6 + $0x10] sm:$0xff]  ;;  %v1544_v33 = vld [vmem:[#allocation6 + $0x78] sm:$0xff] }
 0x1d6   : > { %3148 = vmatprep.subr.bf16.mxu0 %v3147_v61  ;;  %3276 = vmatprep.subr.bf16.mxu1 %v3275_v42  ;;  %v3167_v61 = vpack.c.bf16 %v1200_v35, %v1196_v0  ;;  %v3295_v42 = vpack.c.bf16 %v1202_v37, %v1198_v36  ;;  %v1535_v31 = vld [vmem:[#allocation6 + $0x30] sm:$0xff]  ;;  %v1537_v35 = vld [vmem:[#allocation6 + $0x40] sm:$0xff] }
 0x1d7   : > { %v3437_v0 = vpack.c.bf16 %v1535_v31, %v1531_v29  ;;  %v1541_v36 = vld [vmem:[#allocation6 + $0x60] sm:$0xff] }
 0x1d9   : > { %3150 = vmatpush1.bf16.msra.mxu0 %v3149_v49  ;;  %3278 = vmatpush1.bf16.msra.mxu1 %v3277_v50  ;;  %v3169_v49 = vpack.c.bf16 %v1199_v41, %v1195_v40  ;;  %v3297_v50 = vpack.c.bf16 %v1201_v44, %v1197_v43  ;;  %v1543_v40 = vld [vmem:[#allocation6 + $0x70] sm:$0xff]  ;;  %v1546_v41 = vld [vmem:[#allocation6 + $0x88] sm:$0xff]  ;;  %v1548_v43 = vld [vmem:[#allocation6 + $0x98] sm:$0xff] }
 0x1da   : > { %3152 = vmatprep.subr.bf16.mxu0 %v3151_v53  ;;  %3280 = vmatprep.subr.bf16.mxu1 %v3279_v54  ;;  %v3171_v53 = vpack.c.bf16 %v1208_v46, %v1204_v45  ;;  %v3299_v54 = vpack.c.bf16 %v1210_v48, %v1206_v47  ;;  %v1552_v44 = vld [vmem:[#allocation6 + $0xb8] sm:$0xff]  ;;  %v3313_v45 = vpack.c.bf16 %v1541_v36, %v1537_v35  ;;  %v1545_v47 = vld [vmem:[#allocation6 + $0x80] sm:$0xff] }
 0x1db   : > { %v1549_v48 = vld [vmem:[#allocation6 + $0xa0] sm:$0xff] }
 0x1dd   : > { %3154 = vmatpush1.bf16.msra.mxu0 %v3153_v2  ;;  %3282 = vmatpush1.bf16.msra.mxu1 %v3281_v3  ;;  %v3173_v2 = vpack.c.bf16 %v1207_v52, %v1203_v51  ;;  %v3301_v3 = vpack.c.bf16 %v1209_v30, %v1205_v59  ;;  %v1547_v51 = vld [vmem:[#allocation6 + $0x90] sm:$0xff]  ;;  %v1556_v59 = vld [vmem:[#allocation6 + $0xd8] sm:$0xff] }
 0x1de   : > { %3156 = vmatprep.subr.bf16.mxu0 %v3155_v6  ;;  %3284 = vmatprep.subr.bf16.mxu1 %v3283_v7  ;;  %v3175_v6 = vpack.c.bf16 %v1216_v62, %v1212_v60  ;;  %v3303_v7 = vpack.c.bf16 %v1218_v1, %v1214_v63  ;;  %v1551_v52 = vld [vmem:[#allocation6 + $0xb0] sm:$0xff]  ;;  %v1560_v30 = vld [vmem:[#allocation6 + $0xf8] sm:$0xff]  ;;  %v3317_v60 = vpack.c.bf16 %v1549_v48, %v1545_v47  ;;  %v1553_v63 = vld [vmem:[#allocation6 + $0xc0] sm:$0xff] }
 0x1df   : > { %v3445_v62 = vpack.c.bf16 %v1551_v52, %v1547_v51  ;;  %v1557_v1 = vld [vmem:[#allocation6 + $0xe0] sm:$0xff]  ;;  %v1587_v51 = vld [vmem:[#allocation6 + $0x1d0] sm:$0xff] }
 0x1e0   : > { %v3321_v10 = vpack.c.bf16 %v1557_v1, %v1553_v63  ;;  %v1585_v47 = vld [vmem:[#allocation6 + $0x1c0] sm:$0xff]  ;;  %v1591_v52 = vld [vmem:[#allocation6 + $0x1f0] sm:$0xff] }
 0x1e1   : > { %3158 = vmatpush1.bf16.msra.mxu0 %v3157_v14  ;;  %3286 = vmatpush1.bf16.msra.mxu1 %v3285_v15  ;;  %v3177_v14 = vpack.c.bf16 %v1215_v5, %v1211_v4  ;;  %v3305_v15 = vpack.c.bf16 %v1217_v9, %v1213_v8  ;;  %v1555_v4 = vld [vmem:[#allocation6 + $0xd0] sm:$0xff]  ;;  %v1564_v8 = vld [vmem:[#allocation6 + $0x118] sm:$0xff]  ;;  %v1589_v48 = vld [vmem:[#allocation6 + $0x1e0] sm:$0xff] }
 0x1e2   : > { %3160 = vmatprep.subr.bf16.mxu0 %v3159_v18  ;;  %3288 = vmatprep.subr.bf16.mxu1 %v3287_v19  ;;  %v4308_v18 = vsub.s32 2, %v4290_v55  ;;  %v4311_v19 = vsub.s32 3, %v4290_v55  ;;  %v1540_v55 = vld [vmem:[#allocation6 + $0x58] sm:$0xff]  ;;  %v1559_v5 = vld [vmem:[#allocation6 + $0xf0] sm:$0xff]  ;;  %v1593_v63 = vld [vmem:[#allocation6 + $0x200] sm:$0xff] }
 0x1e3   : > { %v1568_v9 = vld [vmem:[#allocation6 + $0x138] sm:$0xff]  ;;  %v3449_v11 = vpack.c.bf16 %v1559_v5, %v1555_v4  ;;  %v1597_v1 = vld [vmem:[#allocation6 + $0x220] sm:$0xff]  ;;  %v1595_v4 = vld [vmem:[#allocation6 + $0x210] sm:$0xff] }
 0x1e4   : > { %v666_v20 = vrot.slane %v4298_v57, %v4308_v18  ;;  %v670_v21 = vrot.slane %v4298_v57, %v4311_v19  ;;  %v1599_v5 = vld [vmem:[#allocation6 + $0x230] sm:$0xff] }
 0x1e5   : > { %3162 = vmatpush1.bf16.msra.mxu0 %v3161_v26  ;;  %3290 = vmatpush1.bf16.msra.mxu1 %v3289_v27  ;;  %v1529_v26 = vld [vmem:[#allocation6] sm:$0xff] }
 0x1e6   : > { %3164 = vmatprep.subr.bf16.mxu0 %v3163_v32  ;;  %3292 = vmatprep.subr.bf16.mxu1 %v3291_v28  ;;  %v1533_v27 = vld [vmem:[#allocation6 + $0x20] sm:$0xff]  ;;  %v1538_v32 = vld [vmem:[#allocation6 + $0x48] sm:$0xff] }
 0x1e7   : > { %v1542_v28 = vld [vmem:[#allocation6 + $0x68] sm:$0xff]  ;;  %v3309_v34 = vpack.c.bf16 %v1533_v27, %v1529_v26  ;;  %v1569_v26 = vld [vmem:[#allocation6 + $0x140] sm:$0xff] }
 0x1e8   : > { %v3311_v57 = vpack.c.bf16 %v1542_v28, %v1538_v32  ;;  %v1573_v27 = vld [vmem:[#allocation6 + $0x160] sm:$0xff]  ;;  %v1571_v32 = vld [vmem:[#allocation6 + $0x150] sm:$0xff] }
 0x1e9   : > { %3166 = vmatpush1.bf16.msra.mxu0 %v3165_v38  ;;  %3294 = vmatpush1.bf16.msra.mxu1 %v3293_v39  ;;  %v3439_v38 = vpack.c.bf16 %v1544_v33, %v1540_v55  ;;  %v1539_v39 = vld [vmem:[#allocation6 + $0x50] sm:$0xff]  ;;  %v1578_v55 = vld [vmem:[#allocation6 + $0x188] sm:$0xff]  ;;  %v3329_v35 = vpack.c.bf16 %v1573_v27, %v1569_v26  ;;  %v1609_v26 = vld [vmem:[#allocation6 + $0x280] sm:$0xff] }
 0x1ea   : > { %3168 = vmatprep.subr.bf16.mxu0 %v3167_v61  ;;  %3296 = vmatprep.subr.bf16.mxu1 %v3295_v42  ;;  %v1550_v42 = vld [vmem:[#allocation6 + $0xa8] sm:$0xff]  ;;  %v3441_v46 = vpack.c.bf16 %v1543_v40, %v1539_v39  ;;  %v1575_v28 = vld [vmem:[#allocation6 + $0x170] sm:$0xff]  ;;  %v1613_v27 = vld [vmem:[#allocation6 + $0x2a0] sm:$0xff] }
 0x1eb   : > { %v1582_v33 = vld [vmem:[#allocation6 + $0x1a8] sm:$0xff]  ;;  %v3457_v36 = vpack.c.bf16 %v1575_v28, %v1571_v32  ;;  %v1579_v40 = vld [vmem:[#allocation6 + $0x190] sm:$0xff] }
 0x1ec   : > { %v1611_v32 = vld [vmem:[#allocation6 + $0x290] sm:$0xff] }
 0x1ed   : > { %3170 = vmatpush1.bf16.msra.mxu0 %v3169_v49  ;;  %3298 = vmatpush1.bf16.msra.mxu1 %v3297_v50  ;;  %v3315_v49 = vpack.c.bf16 %v1550_v42, %v1546_v41  ;;  %v3443_v50 = vpack.c.bf16 %v1552_v44, %v1548_v43  ;;  %v1583_v41 = vld [vmem:[#allocation6 + $0x1b0] sm:$0xff]  ;;  %v1590_v42 = vld [vmem:[#allocation6 + $0x1e8] sm:$0xff]  ;;  %v1588_v43 = vld [vmem:[#allocation6 + $0x1d8] sm:$0xff] }
 0x1ee   : > { %3172 = vmatprep.subr.bf16.mxu0 %v3171_v53  ;;  %3300 = vmatprep.subr.bf16.mxu1 %v3299_v54  ;;  %v1554_v53 = vld [vmem:[#allocation6 + $0xc8] sm:$0xff]  ;;  %v1592_v44 = vld [vmem:[#allocation6 + $0x1f8] sm:$0xff]  ;;  %v1615_v28 = vld [vmem:[#allocation6 + $0x2b0] sm:$0xff] }
 0x1ef   : > { %v1558_v54 = vld [vmem:[#allocation6 + $0xe8] sm:$0xff] }
 0x1f1   : > { %3174 = vmatpush1.bf16.msra.mxu0 %v3173_v2  ;;  %3302 = vmatpush1.bf16.msra.mxu1 %v3301_v3  ;;  %v3319_v2 = vpack.c.bf16 %v1558_v54, %v1554_v53  ;;  %v3447_v3 = vpack.c.bf16 %v1560_v30, %v1556_v59  ;;  %v1594_v53 = vld [vmem:[#allocation6 + $0x208] sm:$0xff]  ;;  %v1596_v59 = vld [vmem:[#allocation6 + $0x218] sm:$0xff] }
 0x1f2   : > { %3176 = vmatprep.subr.bf16.mxu0 %v3175_v6  ;;  %3304 = vmatprep.subr.bf16.mxu1 %v3303_v7  ;;  %v1562_v6 = vld [vmem:[#allocation6 + $0x108] sm:$0xff]  ;;  %v1600_v30 = vld [vmem:[#allocation6 + $0x238] sm:$0xff] }
 0x1f3   : > { %v1566_v7 = vld [vmem:[#allocation6 + $0x128] sm:$0xff] }
 0x1f4   : > { %v1598_v54 = vld [vmem:[#allocation6 + $0x228] sm:$0xff] }
 0x1f5   : > { %3178 = vmatpush1.bf16.msra.mxu0 %v3177_v14  ;;  %3306 = vmatpush1.bf16.msra.mxu1 %v3305_v15  ;;  %v3323_v14 = vpack.c.bf16 %v1566_v7, %v1562_v6  ;;  %v3451_v15 = vpack.c.bf16 %v1568_v9, %v1564_v8  ;;  %v1602_v6 = vld [vmem:[#allocation6 + $0x248] sm:$0xff]  ;;  %v1604_v8 = vld [vmem:[#allocation6 + $0x258] sm:$0xff] }
 0x1f6   : > { %3308 = vmatprep.subr.bf16.mxu0 %v3307_v16  ;;  %3436 = vmatprep.subr.bf16.mxu1 %v3435_v17  ;;  %v1563_v16 = vld [vmem:[#allocation6 + $0x110] sm:$0xff]  ;;  %v1606_v7 = vld [vmem:[#allocation6 + $0x268] sm:$0xff]  ;;  %v1608_v9 = vld [vmem:[#allocation6 + $0x278] sm:$0xff] }
 0x1f7   : > { %v1567_v17 = vld [vmem:[#allocation6 + $0x130] sm:$0xff] }
 0x206   : > { %v954_v22 = vpop.f32.mrb[2].mxu1 }
 0x207   : > { %v3727_v23 = vadd.f32 %v954_v22, %v666_v20  ;;  %v956_v24 = vpop.f32.mrb[3].mxu1  ;;  %v1570_v20 = vld [vmem:[#allocation6 + $0x148] sm:$0xff]  ;;  %v1572_v22 = vld [vmem:[#allocation6 + $0x158] sm:$0xff] }
 0x208   : > { %v3728_v25 = vadd.f32 %v956_v24, %v670_v21  ;;  %v1574_v21 = vld [vmem:[#allocation6 + $0x168] sm:$0xff]  ;;  %v3325_v24 = vpack.c.bf16 %v1565_v13, %v1561_v12  ;;  %v1601_v12 = vld [vmem:[#allocation6 + $0x240] sm:$0xff] }
 0x209   : > { %v3327_v29 = vpack.c.bf16 %v1574_v21, %v1570_v20  ;;  %v1605_v13 = vld [vmem:[#allocation6 + $0x260] sm:$0xff]  ;;  %v1610_v20 = vld [vmem:[#allocation6 + $0x288] sm:$0xff] }
 0x20a   : > { %3836 = vtanh.f32 %v3728_v25  ;;  %v3453_v25 = vpack.c.bf16 %v1567_v17, %v1563_v16  ;;  %v1603_v16 = vld [vmem:[#allocation6 + $0x250] sm:$0xff]  ;;  %v1614_v21 = vld [vmem:[#allocation6 + $0x2a8] sm:$0xff] }
 0x20b   : > { %3838 = vtanh.f32 %v3727_v23  ;;  %v1576_v23 = vld [vmem:[#allocation6 + $0x178] sm:$0xff]  ;;  %v1607_v17 = vld [vmem:[#allocation6 + $0x270] sm:$0xff] }
 0x20c   : > { %v3455_v31 = vpack.c.bf16 %v1576_v23, %v1572_v22  ;;  %v1612_v22 = vld [vmem:[#allocation6 + $0x298] sm:$0xff] }
 0x20d   : > { %v1616_v23 = vld [vmem:[#allocation6 + $0x2b8] sm:$0xff] }
 0x214   : > { %v3837_v37 = vpop.eup %3836 }
 0x215   : > { %v3839_v61 = vpop.eup %3838  ;;  %1376 = vmatprep.mubr.f32.mxu0 %v3837_v37  ;;  %1518 = vmatprep.mubr.f32.mxu1 %v3837_v37  ;;  %v1577_v37 = vld [vmem:[#allocation6 + $0x180] sm:$0xff] }
 0x216   : > { %1377 = vmatmul.mubr.f32.vlgmr.msra.gmra.mrb[2].mxu0 %v3839_v61  ;;  %1519 = vmatmul.mubr.f32.vlgmr.msra.gmra.mrb[4].mxu1 %v3839_v61  ;;  %v1586_v61 = vld [vmem:[#allocation6 + $0x1c8] sm:$0xff] }
 0x217   : > { %3310 = vmatpush1.bf16.msra.mxu0 %v3309_v34  ;;  %3438 = vmatpush1.bf16.msra.mxu1 %v3437_v0  ;;  %v1580_v34 = vld [vmem:[#allocation6 + $0x198] sm:$0xff] }
 0x218   : > { %3312 = vmatprep.subr.bf16.mxu0 %v3311_v57  ;;  %3440 = vmatprep.subr.bf16.mxu1 %v3439_v38  ;;  %v1584_v0 = vld [vmem:[#allocation6 + $0x1b8] sm:$0xff]  ;;  %v1581_v57 = vld [vmem:[#allocation6 + $0x1a0] sm:$0xff]  ;;  %v3331_v38 = vpack.c.bf16 %v1582_v33, %v1578_v55  ;;  %v1618_v55 = vld [vmem:[#allocation6 + $0x2c8] sm:$0xff] }
 0x219   : > { %v3459_v39 = vpack.c.bf16 %v1584_v0, %v1580_v34  ;;  %v1622_v33 = vld [vmem:[#allocation6 + $0x2e8] sm:$0xff]  ;;  %v1620_v34 = vld [vmem:[#allocation6 + $0x2d8] sm:$0xff] }
 0x21a   : > { %v1624_v0 = vld [vmem:[#allocation6 + $0x2f8] sm:$0xff] }
 0x21b   : > { %3314 = vmatpush1.bf16.msra.mxu0 %v3313_v45  ;;  %3442 = vmatpush1.bf16.msra.mxu1 %v3441_v46  ;;  %v3333_v45 = vpack.c.bf16 %v1581_v57, %v1577_v37  ;;  %v3461_v46 = vpack.c.bf16 %v1583_v41, %v1579_v40  ;;  %v1617_v37 = vld [vmem:[#allocation6 + $0x2c0] sm:$0xff]  ;;  %v1619_v40 = vld [vmem:[#allocation6 + $0x2d0] sm:$0xff] }
 0x21c   : > { %3316 = vmatprep.subr.bf16.mxu0 %v3315_v49  ;;  %3444 = vmatprep.subr.bf16.mxu1 %v3443_v50  ;;  %v3335_v49 = vpack.c.bf16 %v1590_v42, %v1586_v61  ;;  %v3463_v50 = vpack.c.bf16 %v1592_v44, %v1588_v43  ;;  %v1621_v57 = vld [vmem:[#allocation6 + $0x2e0] sm:$0xff]  ;;  %v1623_v41 = vld [vmem:[#allocation6 + $0x2f0] sm:$0xff]  ;;  %v1626_v61 = vld [vmem:[#allocation6 + $0x308] sm:$0xff] }
 0x21d   : > { %v1630_v42 = vld [vmem:[#allocation6 + $0x328] sm:$0xff]  ;;  %v1628_v43 = vld [vmem:[#allocation6 + $0x318] sm:$0xff] }
 0x21e   : > { %v1632_v44 = vld [vmem:[#allocation6 + $0x338] sm:$0xff] }
 0x21f   : > { %3318 = vmatpush1.bf16.msra.mxu0 %v3317_v60  ;;  %3446 = vmatpush1.bf16.msra.mxu1 %v3445_v62  ;;  %v3337_v60 = vpack.c.bf16 %v1589_v48, %v1585_v47  ;;  %v3465_v62 = vpack.c.bf16 %v1591_v52, %v1587_v51  ;;  %v3355_v47 = vpack.c.bf16 %v1630_v42, %v1626_v61  ;;  %v1627_v51 = vld [vmem:[#allocation6 + $0x310] sm:$0xff] }
 0x220   : > { %3320 = vmatprep.subr.bf16.mxu0 %v3319_v2  ;;  %3448 = vmatprep.subr.bf16.mxu1 %v3447_v3  ;;  %v3339_v2 = vpack.c.bf16 %v1598_v54, %v1594_v53  ;;  %v3467_v3 = vpack.c.bf16 %v1600_v30, %v1596_v59  ;;  %v3483_v48 = vpack.c.bf16 %v1632_v44, %v1628_v43  ;;  %v1631_v53 = vld [vmem:[#allocation6 + $0x330] sm:$0xff]  ;;  %v1634_v59 = vld [vmem:[#allocation6 + $0x348] sm:$0xff] }
 0x221   : > { %v3485_v54 = vpack.c.bf16 %v1631_v53, %v1627_v51  ;;  %v1638_v30 = vld [vmem:[#allocation6 + $0x368] sm:$0xff]  ;;  %v1663_v51 = vld [vmem:[#allocation6 + $0x430] sm:$0xff] }
 0x222   : > { %v1670_v53 = vld [vmem:[#allocation6 + $0x468] sm:$0xff] }
 0x223   : > { %3322 = vmatpush1.bf16.msra.mxu0 %v3321_v10  ;;  %3450 = vmatpush1.bf16.msra.mxu1 %v3449_v11  ;;  %v3341_v10 = vpack.c.bf16 %v1597_v1, %v1593_v63  ;;  %v3469_v11 = vpack.c.bf16 %v1599_v5, %v1595_v4  ;;  %v1640_v63 = vld [vmem:[#allocation6 + $0x378] sm:$0xff]  ;;  %v1633_v1 = vld [vmem:[#allocation6 + $0x340] sm:$0xff]  ;;  %v1635_v5 = vld [vmem:[#allocation6 + $0x350] sm:$0xff] }
 0x224   : > { %3324 = vmatprep.subr.bf16.mxu0 %v3323_v14  ;;  %3452 = vmatprep.subr.bf16.mxu1 %v3451_v15  ;;  %v3343_v14 = vpack.c.bf16 %v1606_v7, %v1602_v6  ;;  %v3471_v15 = vpack.c.bf16 %v1608_v9, %v1604_v8  ;;  %v1639_v6 = vld [vmem:[#allocation6 + $0x370] sm:$0xff]  ;;  %v1642_v8 = vld [vmem:[#allocation6 + $0x388] sm:$0xff] }
 0x225   : > { %v3489_v7 = vpack.c.bf16 %v1639_v6, %v1635_v5  ;;  %v1646_v9 = vld [vmem:[#allocation6 + $0x3a8] sm:$0xff] }
 0x227   : > { %3326 = vmatpush1.bf16.msra.mxu0 %v3325_v24  ;;  %3454 = vmatpush1.bf16.msra.mxu1 %v3453_v25  ;;  %v3345_v24 = vpack.c.bf16 %v1605_v13, %v1601_v12  ;;  %v3473_v25 = vpack.c.bf16 %v1607_v17, %v1603_v16  ;;  %v1648_v12 = vld [vmem:[#allocation6 + $0x3b8] sm:$0xff]  ;;  %v1641_v13 = vld [vmem:[#allocation6 + $0x380] sm:$0xff]  ;;  %v1643_v17 = vld [vmem:[#allocation6 + $0x390] sm:$0xff] }
 0x228   : > { %3328 = vmatprep.subr.bf16.mxu0 %v3327_v29  ;;  %3456 = vmatprep.subr.bf16.mxu1 %v3455_v31  ;;  %v3347_v29 = vpack.c.bf16 %v1614_v21, %v1610_v20  ;;  %v3475_v31 = vpack.c.bf16 %v1616_v23, %v1612_v22  ;;  %v1647_v20 = vld [vmem:[#allocation6 + $0x3b0] sm:$0xff]  ;;  %v1650_v21 = vld [vmem:[#allocation6 + $0x3c8] sm:$0xff] }
 0x229   : > { %v3493_v22 = vpack.c.bf16 %v1647_v20, %v1643_v17  ;;  %v1654_v23 = vld [vmem:[#allocation6 + $0x3e8] sm:$0xff]  ;;  %v1675_v20 = vld [vmem:[#allocation6 + $0x490] sm:$0xff] }
 0x22b   : > { %3330 = vmatpush1.bf16.msra.mxu0 %v3329_v35  ;;  %3458 = vmatpush1.bf16.msra.mxu1 %v3457_v36  ;;  %v3349_v35 = vpack.c.bf16 %v1613_v27, %v1609_v26  ;;  %v3477_v36 = vpack.c.bf16 %v1615_v28, %v1611_v32  ;;  %v3367_v26 = vpack.c.bf16 %v1654_v23, %v1650_v21  ;;  %v1651_v32 = vld [vmem:[#allocation6 + $0x3d0] sm:$0xff]  ;;  %v1686_v23 = vld [vmem:[#allocation6 + $0x4e8] sm:$0xff] }
 0x22c   : > { %3332 = vmatprep.subr.bf16.mxu0 %v3331_v38  ;;  %3460 = vmatprep.subr.bf16.mxu1 %v3459_v39  ;;  %v3351_v38 = vpack.c.bf16 %v1622_v33, %v1618_v55  ;;  %v3479_v39 = vpack.c.bf16 %v1624_v0, %v1620_v34  ;;  %v1655_v55 = vld [vmem:[#allocation6 + $0x3f0] sm:$0xff]  ;;  %v1658_v34 = vld [vmem:[#allocation6 + $0x408] sm:$0xff] }
 0x22d   : > { %v3497_v33 = vpack.c.bf16 %v1655_v55, %v1651_v32  ;;  %v1662_v0 = vld [vmem:[#allocation6 + $0x428] sm:$0xff]  ;;  %v1679_v21 = vld [vmem:[#allocation6 + $0x4b0] sm:$0xff] }
 0x22e   : > { %v1683_v55 = vld [vmem:[#allocation6 + $0x4d0] sm:$0xff] }
 0x22f   : > { %3334 = vmatpush1.bf16.msra.mxu0 %v3333_v45  ;;  %3462 = vmatpush1.bf16.msra.mxu1 %v3461_v46  ;;  %v3353_v45 = vpack.c.bf16 %v1621_v57, %v1617_v37  ;;  %v3481_v46 = vpack.c.bf16 %v1623_v41, %v1619_v40  ;;  %v1664_v37 = vld [vmem:[#allocation6 + $0x438] sm:$0xff] }
 0x230   : > { %3336 = vmatprep.subr.bf16.mxu0 %v3335_v49  ;;  %3464 = vmatprep.subr.bf16.mxu1 %v3463_v50  ;;  %v1625_v49 = vld [vmem:[#allocation6 + $0x300] sm:$0xff] }
 0x231   : > { %v1629_v50 = vld [vmem:[#allocation6 + $0x320] sm:$0xff] }
 0x232   : > { %v3357_v52 = vpack.c.bf16 %v1629_v50, %v1625_v49  ;;  %v1661_v49 = vld [vmem:[#allocation6 + $0x420] sm:$0xff]  ;;  %v1659_v50 = vld [vmem:[#allocation6 + $0x410] sm:$0xff] }
 0x233   : > { %3338 = vmatpush1.bf16.msra.mxu0 %v3337_v60  ;;  %3466 = vmatpush1.bf16.msra.mxu1 %v3465_v62  ;;  %v1636_v60 = vld [vmem:[#allocation6 + $0x358] sm:$0xff]  ;;  %v3359_v62 = vpack.c.bf16 %v1638_v30, %v1634_v59 }
 0x234   : > { %3340 = vmatprep.subr.bf16.mxu0 %v3339_v2  ;;  %3468 = vmatprep.subr.bf16.mxu1 %v3467_v3  ;;  %v1637_v2 = vld [vmem:[#allocation6 + $0x360] sm:$0xff]  ;;  %v3487_v3 = vpack.c.bf16 %v1640_v63, %v1636_v60  ;;  %v1672_v59 = vld [vmem:[#allocation6 + $0x478] sm:$0xff]  ;;  %v3501_v60 = vpack.c.bf16 %v1663_v51, %v1659_v50 }
 0x235   : > { %v3361_v4 = vpack.c.bf16 %v1637_v2, %v1633_v1  ;;  %v1669_v63 = vld [vmem:[#allocation6 + $0x460] sm:$0xff]  ;;  %v1667_v2 = vld [vmem:[#allocation6 + $0x450] sm:$0xff] }
 0x236   : > { %v1697_v51 = vld [vmem:[#allocation6 + $0x540] sm:$0xff] }
 0x237   : > { %3342 = vmatpush1.bf16.msra.mxu0 %v3341_v10  ;;  %3470 = vmatpush1.bf16.msra.mxu1 %v3469_v11  ;;  %v1644_v10 = vld [vmem:[#allocation6 + $0x398] sm:$0xff]  ;;  %v3363_v11 = vpack.c.bf16 %v1646_v9, %v1642_v8  ;;  %v1678_v8 = vld [vmem:[#allocation6 + $0x4a8] sm:$0xff] }
 0x238   : > { %3344 = vmatprep.subr.bf16.mxu0 %v3343_v14  ;;  %3472 = vmatprep.subr.bf16.mxu1 %v3471_v15  ;;  %v1645_v14 = vld [vmem:[#allocation6 + $0x3a0] sm:$0xff]  ;;  %v3491_v15 = vpack.c.bf16 %v1648_v12, %v1644_v10  ;;  %v1676_v9 = vld [vmem:[#allocation6 + $0x498] sm:$0xff] }
 0x239   : > { %v3365_v16 = vpack.c.bf16 %v1645_v14, %v1641_v13  ;;  %v1680_v10 = vld [vmem:[#allocation6 + $0x4b8] sm:$0xff]  ;;  %v1673_v14 = vld [vmem:[#allocation6 + $0x480] sm:$0xff] }
 0x23a   : > { %v3507_v17 = vpack.c.bf16 %v1680_v10, %v1676_v9  ;;  %v1711_v9 = vld [vmem:[#allocation6 + $0x5b0] sm:$0xff]  ;;  %v1714_v10 = vld [vmem:[#allocation6 + $0x5c8] sm:$0xff] }
 0x23b   : > { %3346 = vmatpush1.bf16.msra.mxu0 %v3345_v24  ;;  %3474 = vmatpush1.bf16.msra.mxu1 %v3473_v25  ;;  %v1652_v24 = vld [vmem:[#allocation6 + $0x3d8] sm:$0xff] }
 0x23c   : > { %3348 = vmatprep.subr.bf16.mxu0 %v3347_v29  ;;  %3476 = vmatprep.subr.bf16.mxu1 %v3475_v31  ;;  %v1656_v25 = vld [vmem:[#allocation6 + $0x3f8] sm:$0xff]  ;;  %v1649_v29 = vld [vmem:[#allocation6 + $0x3c0] sm:$0xff] }
 0x23d   : > { %v3495_v27 = vpack.c.bf16 %v1656_v25, %v1652_v24  ;;  %v1653_v31 = vld [vmem:[#allocation6 + $0x3e0] sm:$0xff]  ;;  %v1684_v24 = vld [vmem:[#allocation6 + $0x4d8] sm:$0xff] }
 0x23e   : > { %v3369_v28 = vpack.c.bf16 %v1653_v31, %v1649_v29  ;;  %v1688_v25 = vld [vmem:[#allocation6 + $0x4f8] sm:$0xff]  ;;  %v1681_v29 = vld [vmem:[#allocation6 + $0x4c0] sm:$0xff] }
 0x23f   : > { %3350 = vmatpush1.bf16.msra.mxu0 %v3349_v35  ;;  %3478 = vmatpush1.bf16.msra.mxu1 %v3477_v36  ;;  %v1660_v35 = vld [vmem:[#allocation6 + $0x418] sm:$0xff]  ;;  %v3371_v36 = vpack.c.bf16 %v1662_v0, %v1658_v34  ;;  %v1685_v31 = vld [vmem:[#allocation6 + $0x4e0] sm:$0xff]  ;;  %v1690_v34 = vld [vmem:[#allocation6 + $0x508] sm:$0xff] }
 0x240   : > { %3352 = vmatprep.subr.bf16.mxu0 %v3351_v38  ;;  %3480 = vmatprep.subr.bf16.mxu1 %v3479_v39  ;;  %v3499_v57 = vpack.c.bf16 %v1664_v37, %v1660_v35  ;;  %v4320_v38 = vld [vmem:[%s4465_s4] sm:$0xf]  ;;  %v1694_v0 = vld [vmem:[#allocation6 + $0x528] sm:$0xff]  ;;  %v1692_v35 = vld [vmem:[#allocation6 + $0x518] sm:$0xff]  ;;  %v3385_v37 = vpack.c.bf16 %v1685_v31, %v1681_v29 }
 0x241   : > { %v1224_v39 = vrot.slane %v4320_v38, %v4293_v56  ;;  %v1228_v40 = vrot.slane %v4320_v38, %v4301_v58  ;;  %v1236_v42 = vrot.slane %v4320_v38, %v4311_v19 }
 0x243   : > { %3354 = vmatpush1.bf16.msra.mxu0 %v3353_v45  ;;  %3482 = vmatpush1.bf16.msra.mxu1 %v3481_v46 }
 0x244   : > { %3356 = vmatprep.subr.bf16.mxu0 %v3355_v47  ;;  %3484 = vmatprep.subr.bf16.mxu1 %v3483_v48  ;;  %v1657_v48 = vld [vmem:[#allocation6 + $0x400] sm:$0xff] }
 0x245   : > { %v3373_v30 = vpack.c.bf16 %v1661_v49, %v1657_v48  ;;  %v1704_v48 = vld [vmem:[#allocation6 + $0x578] sm:$0xff] }
 0x247   : > { %3358 = vmatpush1.bf16.msra.mxu0 %v3357_v52  ;;  %3486 = vmatpush1.bf16.msra.mxu1 %v3485_v54  ;;  %v1666_v52 = vld [vmem:[#allocation6 + $0x448] sm:$0xff]  ;;  %v1668_v54 = vld [vmem:[#allocation6 + $0x458] sm:$0xff] }
 0x248   : > { %3360 = vmatprep.subr.bf16.mxu0 %v3359_v62  ;;  %3488 = vmatprep.subr.bf16.mxu1 %v3487_v3  ;;  %v1665_v62 = vld [vmem:[#allocation6 + $0x440] sm:$0xff]  ;;  %v1671_v3 = vld [vmem:[#allocation6 + $0x470] sm:$0xff]  ;;  %v3375_v6 = vpack.c.bf16 %v1670_v53, %v1666_v52 }
 0x249   : > { %v3377_v12 = vpack.c.bf16 %v1669_v63, %v1665_v62  ;;  %v3505_v13 = vpack.c.bf16 %v1671_v3, %v1667_v2  ;;  %v1701_v52 = vld [vmem:[#allocation6 + $0x560] sm:$0xff]  ;;  %v1710_v62 = vld [vmem:[#allocation6 + $0x5a8] sm:$0xff]  ;;  %v1708_v63 = vld [vmem:[#allocation6 + $0x598] sm:$0xff] }
 0x24a   : > { %v3393_v2 = vpack.c.bf16 %v1701_v52, %v1697_v51 }
 0x24b   : > { %3362 = vmatpush1.bf16.msra.mxu0 %v3361_v4  ;;  %3490 = vmatpush1.bf16.msra.mxu1 %v3489_v7  ;;  %v1674_v4 = vld [vmem:[#allocation6 + $0x488] sm:$0xff]  ;;  %v3503_v7 = vpack.c.bf16 %v1672_v59, %v1668_v54  ;;  %v1699_v59 = vld [vmem:[#allocation6 + $0x550] sm:$0xff] }
 0x24c   : > { %3364 = vmatprep.subr.bf16.mxu0 %v3363_v11  ;;  %3492 = vmatprep.subr.bf16.mxu1 %v3491_v15  ;;  %v1677_v15 = vld [vmem:[#allocation6 + $0x4a0] sm:$0xff] }
 0x24f   : > { %3366 = vmatpush1.bf16.msra.mxu0 %v3365_v16  ;;  %3494 = vmatpush1.bf16.msra.mxu1 %v3493_v22  ;;  %v3379_v16 = vpack.c.bf16 %v1678_v8, %v1674_v4  ;;  %v1682_v22 = vld [vmem:[#allocation6 + $0x4c8] sm:$0xff]  ;;  %v1705_v4 = vld [vmem:[#allocation6 + $0x580] sm:$0xff]  ;;  %v1707_v8 = vld [vmem:[#allocation6 + $0x590] sm:$0xff] }
 0x250   : > { %3368 = vmatprep.subr.bf16.mxu0 %v3367_v26  ;;  %3496 = vmatprep.subr.bf16.mxu1 %v3495_v27  ;;  %v3381_v26 = vpack.c.bf16 %v1677_v15, %v1673_v14  ;;  %v3509_v27 = vpack.c.bf16 %v1679_v21, %v1675_v20  ;;  %v3383_v32 = vpack.c.bf16 %v1686_v23, %v1682_v22  ;;  %v1715_v22 = vld [vmem:[#allocation6 + $0x5d0] sm:$0xff] }
 0x251   : > { %v3525_v15 = vpack.c.bf16 %v1711_v9, %v1707_v8  ;;  %v1719_v23 = vld [vmem:[#allocation6 + $0x5f0] sm:$0xff] }
 0x252   : > { %v3529_v31 = vpack.c.bf16 %v1719_v23, %v1715_v22 }
 0x253   : > { %3370 = vmatpush1.bf16.msra.mxu0 %v3369_v28  ;;  %3498 = vmatpush1.bf16.msra.mxu1 %v3497_v33  ;;  %v3511_v28 = vpack.c.bf16 %v1688_v25, %v1684_v24  ;;  %v1687_v33 = vld [vmem:[#allocation6 + $0x4f0] sm:$0xff]  ;;  %v1722_v24 = vld [vmem:[#allocation6 + $0x608] sm:$0xff] }
 0x254   : > { %3372 = vmatprep.subr.bf16.mxu0 %v3371_v36  ;;  %3500 = vmatprep.subr.bf16.mxu1 %v3499_v57  ;;  %v1696_v36 = vld [vmem:[#allocation6 + $0x538] sm:$0xff]  ;;  %v3513_v57 = vpack.c.bf16 %v1687_v33, %v1683_v55  ;;  %v1726_v25 = vld [vmem:[#allocation6 + $0x628] sm:$0xff] }
 0x255   : > { %v3403_v55 = vpack.c.bf16 %v1726_v25, %v1722_v24  ;;  %v1755_v24 = vld [vmem:[#allocation6 + $0x710] sm:$0xff] }
 0x256   : > { %v1759_v25 = vld [vmem:[#allocation6 + $0x730] sm:$0xff] }
 0x2e9   : > { %v1378_v41 = vpop.f32.mrb[2].mxu0  ;;  %v4326_v61 = vpop.f32.mrb[4].mxu1 }
 0x2ea   : > { %v1380_v43 = vpop.f32.mrb[3].mxu0  ;;  %v1522_v44 = vpop.f32.mrb[5].mxu1  ;;  %v3729_v45 = vadd.f32 %v1378_v41, %v1224_v39  ;;  %v1689_v39 = vld [vmem:[#allocation6 + $0x500] sm:$0xff]  ;;  %v3387_v41 = vpack.c.bf16 %v1694_v0, %v1690_v34  ;;  %v1723_v34 = vld [vmem:[#allocation6 + $0x610] sm:$0xff] }
 0x2eb   : > { %v3730_v46 = vadd.f32 %v1380_v43, %v1228_v40  ;;  %v3732_v47 = vadd.f32 %v1522_v44, %v1236_v42  ;;  %v1693_v40 = vld [vmem:[#allocation6 + $0x520] sm:$0xff]  ;;  %v3515_v42 = vpack.c.bf16 %v1696_v36, %v1692_v35  ;;  %v1691_v43 = vld [vmem:[#allocation6 + $0x510] sm:$0xff]  ;;  %v1730_v35 = vld [vmem:[#allocation6 + $0x648] sm:$0xff] }
 0x2ec   : > { %v1695_v44 = vld [vmem:[#allocation6 + $0x530] sm:$0xff]  ;;  %v3389_v49 = vpack.c.bf16 %v1693_v40, %v1689_v39  ;;  %v1734_v36 = vld [vmem:[#allocation6 + $0x668] sm:$0xff] }
 0x2ed   : > { %3840 = vtanh.f32 %v3730_v46  ;;  %v1702_v46 = vld [vmem:[#allocation6 + $0x568] sm:$0xff]  ;;  %v3517_v50 = vpack.c.bf16 %v1695_v44, %v1691_v43  ;;  %v1727_v0 = vld [vmem:[#allocation6 + $0x630] sm:$0xff]  ;;  %v3407_v43 = vpack.c.bf16 %v1734_v36, %v1730_v35 }
 0x2ee   : > { %3842 = vtanh.f32 %v3729_v45  ;;  %v1698_v45 = vld [vmem:[#allocation6 + $0x548] sm:$0xff]  ;;  %v3533_v40 = vpack.c.bf16 %v1727_v0, %v1723_v34  ;;  %v1765_v34 = vld [vmem:[#allocation6 + $0x760] sm:$0xff]  ;;  %v1763_v36 = vld [vmem:[#allocation6 + $0x750] sm:$0xff] }
 0x2ef   : > { %3844 = vtanh.f32 %v3732_v47  ;;  %v1700_v47 = vld [vmem:[#allocation6 + $0x558] sm:$0xff]  ;;  %v3391_v53 = vpack.c.bf16 %v1702_v46, %v1698_v45  ;;  %v1731_v45 = vld [vmem:[#allocation6 + $0x650] sm:$0xff] }
 0x2f0   : > { %v3519_v54 = vpack.c.bf16 %v1704_v48, %v1700_v47  ;;  %v1735_v46 = vld [vmem:[#allocation6 + $0x670] sm:$0xff]  ;;  %v1738_v47 = vld [vmem:[#allocation6 + $0x688] sm:$0xff] }
 0x2f1   : > { %v1742_v48 = vld [vmem:[#allocation6 + $0x6a8] sm:$0xff]  ;;  %v3537_v52 = vpack.c.bf16 %v1735_v46, %v1731_v45  ;;  %v1773_v45 = vld [vmem:[#allocation6 + $0x7a0] sm:$0xff] }
 0x2f7   : > { %v3841_v1 = vpop.eup %3840 }
 0x2f8   : > { %v3843_v5 = vpop.eup %3842  ;;  %1871 = vmatprep.mubr.f32.mxu0 %v3841_v1  ;;  %2013 = vmatprep.mubr.f32.mxu1 %v3841_v1  ;;  %v1712_v1 = vld [vmem:[#allocation6 + $0x5b8] sm:$0xff] }
 0x2f9   : > { %1872 = vmatmul.mubr.f32.vlgmr.msra.gmra.mrb[4].mxu0 %v3843_v5  ;;  %2014 = vmatmul.mubr.f32.vlgmr.msra.gmra.mrb[6].mxu1 %v3843_v5  ;;  %v3845_v11 = vpop.eup %3844  ;;  %v1709_v5 = vld [vmem:[#allocation6 + $0x5a0] sm:$0xff] }
 0x2fa   : > { %3374 = vmatpush1.bf16.msra.mxu0 %v3373_v30  ;;  %3502 = vmatpush1.bf16.msra.mxu1 %v3501_v60  ;;  %v1703_v30 = vld [vmem:[#allocation6 + $0x570] sm:$0xff]  ;;  %v1706_v60 = vld [vmem:[#allocation6 + $0x588] sm:$0xff]  ;;  %v3397_v14 = vpack.c.bf16 %v1709_v5, %v1705_v4 }
 0x2fb   : > { %1942 = vmatprep.mubr.f32.mxu0 %v3845_v11  ;;  %2084 = vmatprep.mubr.f32.mxu1 %v3845_v11  ;;  %v3521_v3 = vpack.c.bf16 %v1703_v30, %v1699_v59  ;;  %v1718_v11 = vld [vmem:[#allocation6 + $0x5e8] sm:$0xff]  ;;  %v3411_v59 = vpack.c.bf16 %v1742_v48, %v1738_v47  ;;  %v1771_v48 = vld [vmem:[#allocation6 + $0x790] sm:$0xff] }
 0x2fc   : > { %3376 = vmatprep.subr.bf16.mxu0 %v3375_v6  ;;  %3504 = vmatprep.subr.bf16.mxu1 %v3503_v7  ;;  %v3395_v6 = vpack.c.bf16 %v1710_v62, %v1706_v60  ;;  %v3523_v7 = vpack.c.bf16 %v1712_v1, %v1708_v63  ;;  %v3399_v20 = vpack.c.bf16 %v1718_v11, %v1714_v10  ;;  %v1739_v60 = vld [vmem:[#allocation6 + $0x690] sm:$0xff]  ;;  %v1746_v63 = vld [vmem:[#allocation6 + $0x6c8] sm:$0xff] }
 0x2fd   : > { %v1743_v62 = vld [vmem:[#allocation6 + $0x6b0] sm:$0xff]  ;;  %v1750_v1 = vld [vmem:[#allocation6 + $0x6e8] sm:$0xff] }
 0x2fe   : > { %3378 = vmatpush1.bf16.msra.mxu0 %v3377_v12  ;;  %3506 = vmatpush1.bf16.msra.mxu1 %v3505_v13  ;;  %v1716_v12 = vld [vmem:[#allocation6 + $0x5d8] sm:$0xff]  ;;  %v3541_v5 = vpack.c.bf16 %v1743_v62, %v1739_v60  ;;  %v3415_v8 = vpack.c.bf16 %v1750_v1, %v1746_v63  ;;  %v1747_v10 = vld [vmem:[#allocation6 + $0x6d0] sm:$0xff]  ;;  %v1781_v62 = vld [vmem:[#allocation6 + $0x7e0] sm:$0xff] }
 0x2ff   : > { %3380 = vmatprep.subr.bf16.mxu0 %v3379_v16  ;;  %3508 = vmatprep.subr.bf16.mxu1 %v3507_v17  ;;  %v1720_v13 = vld [vmem:[#allocation6 + $0x5f8] sm:$0xff]  ;;  %v1713_v16 = vld [vmem:[#allocation6 + $0x5c0] sm:$0xff]  ;;  %v1751_v11 = vld [vmem:[#allocation6 + $0x6f0] sm:$0xff] }
 0x300   : > { %v1717_v17 = vld [vmem:[#allocation6 + $0x5e0] sm:$0xff]  ;;  %v3527_v21 = vpack.c.bf16 %v1720_v13, %v1716_v12  ;;  %v1754_v12 = vld [vmem:[#allocation6 + $0x708] sm:$0xff]  ;;  %v1779_v63 = vld [vmem:[#allocation6 + $0x7d0] sm:$0xff] }
 0x301   : > { %v3401_v29 = vpack.c.bf16 %v1717_v17, %v1713_v16  ;;  %v1758_v13 = vld [vmem:[#allocation6 + $0x728] sm:$0xff]  ;;  %v3545_v17 = vpack.c.bf16 %v1751_v11, %v1747_v10  ;;  %v1783_v1 = vld [vmem:[#allocation6 + $0x7f0] sm:$0xff]  ;;  %v2102_v10 = vld [vmem:[#allocation7 + $0x38] sm:$0xff] }
 0x302   : > { %3382 = vmatpush1.bf16.msra.mxu0 %v3381_v26  ;;  %3510 = vmatpush1.bf16.msra.mxu1 %v3509_v27  ;;  %v1724_v26 = vld [vmem:[#allocation6 + $0x618] sm:$0xff]  ;;  %v3419_v22 = vpack.c.bf16 %v1758_v13, %v1754_v12  ;;  %v2099_v13 = vld [vmem:[#allocation7 + $0x20] sm:$0xff] }
 0x303   : > { %3384 = vmatprep.subr.bf16.mxu0 %v3383_v32  ;;  %3512 = vmatprep.subr.bf16.mxu1 %v3511_v28  ;;  %v1728_v27 = vld [vmem:[#allocation6 + $0x638] sm:$0xff]  ;;  %v1721_v32 = vld [vmem:[#allocation6 + $0x600] sm:$0xff] }
 0x304   : > { %v1725_v28 = vld [vmem:[#allocation6 + $0x620] sm:$0xff]  ;;  %v3531_v33 = vpack.c.bf16 %v1728_v27, %v1724_v26  ;;  %v1762_v26 = vld [vmem:[#allocation6 + $0x748] sm:$0xff] }
 0x305   : > { %v3405_v39 = vpack.c.bf16 %v1725_v28, %v1721_v32  ;;  %v1766_v27 = vld [vmem:[#allocation6 + $0x768] sm:$0xff]  ;;  %v1232_v32 = vrot.slane %v4320_v38, %v4308_v18 }
 0x306   : > { %3386 = vmatpush1.bf16.msra.mxu0 %v3385_v37  ;;  %3514 = vmatpush1.bf16.msra.mxu1 %v3513_v57  ;;  %v1732_v37 = vld [vmem:[#allocation6 + $0x658] sm:$0xff]  ;;  %v3423_v0 = vpack.c.bf16 %v1766_v27, %v1762_v26 }
 0x307   : > { %3388 = vmatprep.subr.bf16.mxu0 %v3387_v41  ;;  %3516 = vmatprep.subr.bf16.mxu1 %v3515_v42  ;;  %v1736_v57 = vld [vmem:[#allocation6 + $0x678] sm:$0xff]  ;;  %v1729_v41 = vld [vmem:[#allocation6 + $0x640] sm:$0xff] }
 0x308   : > { %v1733_v42 = vld [vmem:[#allocation6 + $0x660] sm:$0xff]  ;;  %v3535_v44 = vpack.c.bf16 %v1736_v57, %v1732_v37  ;;  %v1767_v37 = vld [vmem:[#allocation6 + $0x770] sm:$0xff]  ;;  %v1770_v57 = vld [vmem:[#allocation6 + $0x788] sm:$0xff] }
 0x309   : > { %v3409_v51 = vpack.c.bf16 %v1733_v42, %v1729_v41  ;;  %v1776_v41 = vld [vmem:[#allocation6 + $0x7b8] sm:$0xff]  ;;  %v3731_v42 = vadd.f32 %v4326_v61, %v1232_v32  ;;  %v2112_v32 = vld [vmem:[#allocation7 + $0x88] sm:$0xff] }
 0x30a   : > { %3390 = vmatpush1.bf16.msra.mxu0 %v3389_v49  ;;  %3518 = vmatpush1.bf16.msra.mxu1 %v3517_v50  ;;  %v1740_v49 = vld [vmem:[#allocation6 + $0x698] sm:$0xff] }
 0x30b   : > { %3392 = vmatprep.subr.bf16.mxu0 %v3391_v53  ;;  %3520 = vmatprep.subr.bf16.mxu1 %v3519_v54  ;;  %v1744_v50 = vld [vmem:[#allocation6 + $0x6b8] sm:$0xff]  ;;  %v1737_v53 = vld [vmem:[#allocation6 + $0x680] sm:$0xff]  ;;  %3846 = vtanh.f32 %v3731_v42 }
 0x30c   : > { %v1741_v54 = vld [vmem:[#allocation6 + $0x6a0] sm:$0xff]  ;;  %v3539_v30 = vpack.c.bf16 %v1744_v50, %v1740_v49  ;;  %v1775_v49 = vld [vmem:[#allocation6 + $0x7b0] sm:$0xff]  ;;  %v1778_v50 = vld [vmem:[#allocation6 + $0x7c8] sm:$0xff] }
 0x30d   : > { %v3413_v4 = vpack.c.bf16 %v1741_v54, %v1737_v53  ;;  %v1784_v53 = vld [vmem:[#allocation6 + $0x7f8] sm:$0xff]  ;;  %v3557_v54 = vpack.c.bf16 %v1775_v49, %v1771_v48 }
 0x30e   : > { %3394 = vmatpush1.bf16.msra.mxu0 %v3393_v2  ;;  %3522 = vmatpush1.bf16.msra.mxu1 %v3521_v3  ;;  %v1748_v2 = vld [vmem:[#allocation6 + $0x6d8] sm:$0xff] }
 0x30f   : > { %3396 = vmatprep.subr.bf16.mxu0 %v3395_v6  ;;  %3524 = vmatprep.subr.bf16.mxu1 %v3523_v7  ;;  %v1752_v3 = vld [vmem:[#allocation6 + $0x6f8] sm:$0xff]  ;;  %v1745_v6 = vld [vmem:[#allocation6 + $0x6c0] sm:$0xff] }
 0x310   : > { %v1749_v7 = vld [vmem:[#allocation6 + $0x6e0] sm:$0xff]  ;;  %v3543_v9 = vpack.c.bf16 %v1752_v3, %v1748_v2  ;;  %v2096_v2 = vld [vmem:[#allocation7 + $0x8] sm:$0xff]  ;;  %v2098_v3 = vld [vmem:[#allocation7 + $0x18] sm:$0xff] }
 0x311   : > { %v3417_v16 = vpack.c.bf16 %v1749_v7, %v1745_v6  ;;  %v3563_v6 = vpack.c.bf16 %v2098_v3, %v2096_v2  ;;  %v2095_v7 = vld [vmem:[#allocation7] sm:$0xff]  ;;  %v2122_v42 = vld [vmem:[#allocation7 + $0xd8] sm:$0xff]  ;;  %v2133_v3 = vld [vmem:[#allocation7 + $0x130] sm:$0xff] }
 0x312   : > { %3398 = vmatpush1.bf16.msra.mxu0 %v3397_v14  ;;  %3526 = vmatpush1.bf16.msra.mxu1 %v3525_v15  ;;  %v1756_v14 = vld [vmem:[#allocation6 + $0x718] sm:$0xff]  ;;  %v2131_v2 = vld [vmem:[#allocation7 + $0x120] sm:$0xff] }
 0x313   : > { %3400 = vmatprep.subr.bf16.mxu0 %v3399_v20  ;;  %3528 = vmatprep.subr.bf16.mxu1 %v3527_v21  ;;  %v1760_v15 = vld [vmem:[#allocation6 + $0x738] sm:$0xff]  ;;  %v1753_v20 = vld [vmem:[#allocation6 + $0x700] sm:$0xff] }
 0x314   : > { %v1757_v21 = vld [vmem:[#allocation6 + $0x720] sm:$0xff]  ;;  %v3547_v23 = vpack.c.bf16 %v1760_v15, %v1756_v14  ;;  %v2101_v14 = vld [vmem:[#allocation7 + $0x30] sm:$0xff] }
 0x315   : > { %v3421_v28 = vpack.c.bf16 %v1757_v21, %v1753_v20  ;;  %v3847_v15 = vpop.eup %3846  ;;  %v3569_v20 = vpack.c.bf16 %v2101_v14, %v2099_v13  ;;  %v2139_v14 = vld [vmem:[#allocation7 + $0x160] sm:$0xff] }
 0x316   : > { %3402 = vmatpush1.bf16.msra.mxu0 %v3401_v29  ;;  %3530 = vmatpush1.bf16.msra.mxu1 %v3529_v31  ;;  %v1764_v29 = vld [vmem:[#allocation6 + $0x758] sm:$0xff] }
 0x317   : > { %3404 = vmatprep.subr.bf16.mxu0 %v3403_v55  ;;  %3532 = vmatprep.subr.bf16.mxu1 %v3531_v33  ;;  %v1768_v31 = vld [vmem:[#allocation6 + $0x778] sm:$0xff]  ;;  %v3549_v55 = vpack.c.bf16 %v1759_v25, %v1755_v24  ;;  %v1761_v33 = vld [vmem:[#allocation6 + $0x740] sm:$0xff]  ;;  %v2108_v24 = vld [vmem:[#allocation7 + $0x68] sm:$0xff] }
 0x318   : > { %v3551_v35 = vpack.c.bf16 %v1768_v31, %v1764_v29  ;;  %v3425_v38 = vpack.c.bf16 %v1765_v34, %v1761_v33  ;;  %v2110_v25 = vld [vmem:[#allocation7 + $0x78] sm:$0xff]  ;;  %v2107_v29 = vld [vmem:[#allocation7 + $0x60] sm:$0xff]  ;;  %v2109_v31 = vld [vmem:[#allocation7 + $0x70] sm:$0xff] }
 0x319   : > { %v3575_v27 = vpack.c.bf16 %v2110_v25, %v2108_v24  ;;  %v2111_v34 = vld [vmem:[#allocation7 + $0x80] sm:$0xff]  ;;  %v2148_v25 = vld [vmem:[#allocation7 + $0x1a8] sm:$0xff] }
 0x31a   : > { %3406 = vmatpush1.bf16.msra.mxu0 %v3405_v39  ;;  %3534 = vmatpush1.bf16.msra.mxu1 %v3533_v40  ;;  %v1774_v39 = vld [vmem:[#allocation6 + $0x7a8] sm:$0xff]  ;;  %v1772_v40 = vld [vmem:[#allocation6 + $0x798] sm:$0xff] }
 0x31b   : > { %3408 = vmatprep.subr.bf16.mxu0 %v3407_v43  ;;  %3536 = vmatprep.subr.bf16.mxu1 %v3535_v44  ;;  %v3553_v43 = vpack.c.bf16 %v1767_v37, %v1763_v36  ;;  %v1769_v44 = vld [vmem:[#allocation6 + $0x780] sm:$0xff]  ;;  %v3427_v46 = vpack.c.bf16 %v1774_v39, %v1770_v57  ;;  %v3555_v47 = vpack.c.bf16 %v1776_v41, %v1772_v40  ;;  %v2118_v36 = vld [vmem:[#allocation7 + $0xb8] sm:$0xff]  ;;  %v2117_v40 = vld [vmem:[#allocation7 + $0xb0] sm:$0xff] }
 0x31c   : > { %v3429_v61 = vpack.c.bf16 %v1773_v45, %v1769_v44  ;;  %v2115_v39 = vld [vmem:[#allocation7 + $0xa0] sm:$0xff]  ;;  %v2120_v41 = vld [vmem:[#allocation7 + $0xc8] sm:$0xff]  ;;  %v2121_v45 = vld [vmem:[#allocation7 + $0xd0] sm:$0xff] }
 0x31d   : > { %v2119_v44 = vld [vmem:[#allocation7 + $0xc0] sm:$0xff] }
 0x31e   : > { %3410 = vmatpush1.bf16.msra.mxu0 %v3409_v51  ;;  %3538 = vmatpush1.bf16.msra.mxu1 %v3537_v52  ;;  %v1782_v51 = vld [vmem:[#allocation6 + $0x7e8] sm:$0xff]  ;;  %v1780_v52 = vld [vmem:[#allocation6 + $0x7d8] sm:$0xff]  ;;  %v3589_v48 = vpack.c.bf16 %v2121_v45, %v2119_v44  ;;  %v4336_v44 = vld [vmem:[%s4467_s6] sm:$0xf] }
 0x31f   : > { %3412 = vmatprep.subr.bf16.mxu0 %v3411_v59  ;;  %3540 = vmatprep.subr.bf16.mxu1 %v3539_v30  ;;  %v1777_v59 = vld [vmem:[#allocation6 + $0x7c0] sm:$0xff]  ;;  %v3431_v30 = vpack.c.bf16 %v1782_v51, %v1778_v50  ;;  %v3559_v60 = vpack.c.bf16 %v1784_v53, %v1780_v52  ;;  %v2125_v51 = vld [vmem:[#allocation7 + $0xf0] sm:$0xff]  ;;  %v2128_v52 = vld [vmem:[#allocation7 + $0x108] sm:$0xff]  ;;  %v1790_v45 = vrot.slane %v4336_v44, %v4293_v56 }
 0x320   : > { %v2123_v50 = vld [vmem:[#allocation7 + $0xe0] sm:$0xff]  ;;  %v2130_v53 = vld [vmem:[#allocation7 + $0x118] sm:$0xff] }
 0x322   : > { %3414 = vmatpush1.bf16.msra.mxu0 %v3413_v4  ;;  %3542 = vmatpush1.bf16.msra.mxu1 %v3541_v5  ;;  %v3433_v4 = vpack.c.bf16 %v1781_v62, %v1777_v59  ;;  %v3561_v5 = vpack.c.bf16 %v1783_v1, %v1779_v63  ;;  %v2127_v59 = vld [vmem:[#allocation7 + $0x100] sm:$0xff]  ;;  %v2134_v62 = vld [vmem:[#allocation7 + $0x138] sm:$0xff] }
 0x323   : > { %3416 = vmatprep.subr.bf16.mxu0 %v3415_v8  ;;  %3544 = vmatprep.subr.bf16.mxu1 %v3543_v9  ;;  %v2097_v8 = vld [vmem:[#allocation7 + $0x10] sm:$0xff]  ;;  %v2100_v9 = vld [vmem:[#allocation7 + $0x28] sm:$0xff] }
 0x324   : > { %v3565_v11 = vpack.c.bf16 %v2097_v8, %v2095_v7  ;;  %v3567_v12 = vpack.c.bf16 %v2102_v10, %v2100_v9  ;;  %v2135_v8 = vld [vmem:[#allocation7 + $0x140] sm:$0xff]  ;;  %v2137_v9 = vld [vmem:[#allocation7 + $0x150] sm:$0xff]  ;;  %v2140_v10 = vld [vmem:[#allocation7 + $0x168] sm:$0xff] }
 0x326   : > { %3418 = vmatpush1.bf16.msra.mxu0 %v3417_v16  ;;  %3546 = vmatpush1.bf16.msra.mxu1 %v3545_v17  ;;  %v2104_v16 = vld [vmem:[#allocation7 + $0x48] sm:$0xff]  ;;  %v2106_v17 = vld [vmem:[#allocation7 + $0x58] sm:$0xff] }
 0x327   : > { %3420 = vmatprep.subr.bf16.mxu0 %v3419_v22  ;;  %3548 = vmatprep.subr.bf16.mxu1 %v3547_v23  ;;  %v3571_v21 = vpack.c.bf16 %v2106_v17, %v2104_v16  ;;  %v2103_v22 = vld [vmem:[#allocation7 + $0x40] sm:$0xff]  ;;  %v2105_v23 = vld [vmem:[#allocation7 + $0x50] sm:$0xff]  ;;  %v2144_v16 = vld [vmem:[#allocation7 + $0x188] sm:$0xff] }
 0x328   : > { %v3573_v26 = vpack.c.bf16 %v2105_v23, %v2103_v22  ;;  %v2146_v17 = vld [vmem:[#allocation7 + $0x198] sm:$0xff]  ;;  %v2143_v22 = vld [vmem:[#allocation7 + $0x180] sm:$0xff]  ;;  %v2145_v23 = vld [vmem:[#allocation7 + $0x190] sm:$0xff] }
 0x329   : > { %v3613_v24 = vpack.c.bf16 %v2145_v23, %v2143_v22  ;;  %v2175_v23 = vld [vmem:[#allocation7 + $0x280] sm:$0xff] }
 0x32a   : > { %3422 = vmatpush1.bf16.msra.mxu0 %v3421_v28  ;;  %3550 = vmatpush1.bf16.msra.mxu1 %v3549_v55  ;;  %v2114_v28 = vld [vmem:[#allocation7 + $0x98] sm:$0xff]  ;;  %v3577_v55 = vpack.c.bf16 %v2109_v31, %v2107_v29  ;;  %v2147_v29 = vld [vmem:[#allocation7 + $0x1a0] sm:$0xff]  ;;  %v2149_v31 = vld [vmem:[#allocation7 + $0x1b0] sm:$0xff] }
 0x32b   : > { %3424 = vmatprep.subr.bf16.mxu0 %v3423_v0  ;;  %3552 = vmatprep.subr.bf16.mxu1 %v3551_v35  ;;  %v3579_v33 = vpack.c.bf16 %v2114_v28, %v2112_v32  ;;  %v2113_v0 = vld [vmem:[#allocation7 + $0x90] sm:$0xff]  ;;  %v2116_v35 = vld [vmem:[#allocation7 + $0xa8] sm:$0xff]  ;;  %v3617_v32 = vpack.c.bf16 %v2149_v31, %v2147_v29  ;;  %v2179_v31 = vld [vmem:[#allocation7 + $0x2a0] sm:$0xff] }
 0x32c   : > { %v3581_v37 = vpack.c.bf16 %v2113_v0, %v2111_v34  ;;  %v3583_v57 = vpack.c.bf16 %v2118_v36, %v2116_v35  ;;  %v2152_v28 = vld [vmem:[#allocation7 + $0x1c8] sm:$0xff]  ;;  %v2153_v0 = vld [vmem:[#allocation7 + $0x1d0] sm:$0xff]  ;;  %v2158_v36 = vld [vmem:[#allocation7 + $0x1f8] sm:$0xff] }
 0x32d   : > { %v2156_v35 = vld [vmem:[#allocation7 + $0x1e8] sm:$0xff] }
 0x32e   : > { %3426 = vmatpush1.bf16.msra.mxu0 %v3425_v38  ;;  %3554 = vmatpush1.bf16.msra.mxu1 %v3553_v43  ;;  %v3585_v38 = vpack.c.bf16 %v2117_v40, %v2115_v39  ;;  %v3587_v43 = vpack.c.bf16 %v2122_v42, %v2120_v41  ;;  %v2155_v39 = vld [vmem:[#allocation7 + $0x1e0] sm:$0xff]  ;;  %v2157_v40 = vld [vmem:[#allocation7 + $0x1f0] sm:$0xff]  ;;  %v2160_v42 = vld [vmem:[#allocation7 + $0x208] sm:$0xff] }
 0x32f   : > { %3428 = vmatprep.subr.bf16.mxu0 %v3427_v46  ;;  %3556 = vmatprep.subr.bf16.mxu1 %v3555_v47  ;;  %v2124_v46 = vld [vmem:[#allocation7 + $0xe8] sm:$0xff]  ;;  %v2126_v47 = vld [vmem:[#allocation7 + $0xf8] sm:$0xff]  ;;  %v3625_v41 = vpack.c.bf16 %v2157_v40, %v2155_v39  ;;  %v2187_v40 = vld [vmem:[#allocation7 + $0x2e0] sm:$0xff] }
 0x330   : > { %v3591_v49 = vpack.c.bf16 %v2126_v47, %v2124_v46  ;;  %v1794_v46 = vrot.slane %v4336_v44, %v4301_v58  ;;  %v1802_v47 = vrot.slane %v4336_v44, %v4311_v19  ;;  %v2165_v19 = vld [vmem:[#allocation7 + $0x230] sm:$0xff] }
 0x332   : > { %3430 = vmatpush1.bf16.msra.mxu0 %v3429_v61  ;;  %3558 = vmatpush1.bf16.msra.mxu1 %v3557_v54  ;;  %v3593_v61 = vpack.c.bf16 %v2125_v51, %v2123_v50  ;;  %v3595_v54 = vpack.c.bf16 %v2130_v53, %v2128_v52 }
 0x333   : > { %3432 = vmatprep.subr.bf16.mxu0 %v3431_v30  ;;  %3560 = vmatprep.subr.bf16.mxu1 %v3559_v60  ;;  %v2129_v30 = vld [vmem:[#allocation7 + $0x110] sm:$0xff]  ;;  %v2132_v60 = vld [vmem:[#allocation7 + $0x128] sm:$0xff] }
 0x334   : > { %v3597_v63 = vpack.c.bf16 %v2129_v30, %v2127_v59  ;;  %v3599_v1 = vpack.c.bf16 %v2134_v62, %v2132_v60  ;;  %v2161_v59 = vld [vmem:[#allocation7 + $0x210] sm:$0xff]  ;;  %v2164_v30 = vld [vmem:[#allocation7 + $0x228] sm:$0xff]  ;;  %v2166_v60 = vld [vmem:[#allocation7 + $0x238] sm:$0xff] }
 0x336   : > { %3434 = vmatpush1.bf16.msra.mxu0 %v3433_v4  ;;  %3562 = vmatpush1.bf16.msra.mxu1 %v3561_v5  ;;  %v2136_v4 = vld [vmem:[#allocation7 + $0x148] sm:$0xff]  ;;  %v2138_v5 = vld [vmem:[#allocation7 + $0x158] sm:$0xff] }
 0x337   : > { %3564 = vmatprep.subr.bf16.mxu0 %v3563_v6  ;;  %v3601_v6 = vpack.c.bf16 %v2133_v3, %v2131_v2  ;;  %v3603_v7 = vpack.c.bf16 %v2138_v5, %v2136_v4  ;;  %v2163_v2 = vld [vmem:[#allocation7 + $0x220] sm:$0xff]  ;;  %v2168_v4 = vld [vmem:[#allocation7 + $0x248] sm:$0xff]  ;;  %v2170_v5 = vld [vmem:[#allocation7 + $0x258] sm:$0xff] }
 0x339   : > { %1943 = vmatmul.mubr.f32.vlgmr.msra.gmra.mrb[4].mxu0 %v3847_v15  ;;  %2085 = vmatmul.mubr.f32.vlgmr.msra.gmra.mrb[6].mxu1 %v3847_v15  ;;  %v2141_v15 = vld [vmem:[#allocation7 + $0x170] sm:$0xff] }
 0x33a   : > { %3566 = vmatpush1.bf16.msra.mxu0 %v3565_v11  ;;  %v2142_v11 = vld [vmem:[#allocation7 + $0x178] sm:$0xff] }
 0x33b   : > { %3568 = vmatprep.subr.bf16.mxu0 %v3567_v12  ;;  %v3605_v12 = vpack.c.bf16 %v2137_v9, %v2135_v8  ;;  %v3607_v13 = vpack.c.bf16 %v2142_v11, %v2140_v10  ;;  %v3635_v8 = vpack.c.bf16 %v2170_v5, %v2168_v4  ;;  %v2167_v9 = vld [vmem:[#allocation7 + $0x240] sm:$0xff]  ;;  %v2169_v10 = vld [vmem:[#allocation7 + $0x250] sm:$0xff]  ;;  %v2172_v11 = vld [vmem:[#allocation7 + $0x268] sm:$0xff] }
 0x33c   : > { %v2203_v4 = vld [vmem:[#allocation7 + $0x360] sm:$0xff]  ;;  %v2205_v5 = vld [vmem:[#allocation7 + $0x370] sm:$0xff] }
 0x33e   : > { %3570 = vmatpush1.bf16.msra.mxu0 %v3569_v20  ;;  %v3609_v20 = vpack.c.bf16 %v2141_v15, %v2139_v14  ;;  %v2171_v15 = vld [vmem:[#allocation7 + $0x260] sm:$0xff] }
 0x33f   : > { %3572 = vmatprep.subr.bf16.mxu0 %v3571_v21  ;;  %v3611_v21 = vpack.c.bf16 %v2146_v17, %v2144_v16  ;;  %v2173_v16 = vld [vmem:[#allocation7 + $0x270] sm:$0xff]  ;;  %v2176_v17 = vld [vmem:[#allocation7 + $0x288] sm:$0xff] }
 0x342   : > { %3574 = vmatpush1.bf16.msra.mxu0 %v3573_v26  ;;  %v2150_v26 = vld [vmem:[#allocation7 + $0x1b8] sm:$0xff] }
 0x343   : > { %3576 = vmatprep.subr.bf16.mxu0 %v3575_v27  ;;  %v3615_v27 = vpack.c.bf16 %v2150_v26, %v2148_v25  ;;  %v2180_v25 = vld [vmem:[#allocation7 + $0x2a8] sm:$0xff]  ;;  %v2182_v26 = vld [vmem:[#allocation7 + $0x2b8] sm:$0xff] }
 0x344   : > { %v3647_v29 = vpack.c.bf16 %v2182_v26, %v2180_v25  ;;  %v2215_v26 = vld [vmem:[#allocation7 + $0x3c0] sm:$0xff] }
 0x346   : > { %3578 = vmatpush1.bf16.msra.mxu0 %v3577_v55  ;;  %v2154_v55 = vld [vmem:[#allocation7 + $0x1d8] sm:$0xff] }
 0x347   : > { %3580 = vmatprep.subr.bf16.mxu0 %v3579_v33  ;;  %v2151_v33 = vld [vmem:[#allocation7 + $0x1c0] sm:$0xff]  ;;  %v3619_v34 = vpack.c.bf16 %v2154_v55, %v2152_v28  ;;  %v2184_v28 = vld [vmem:[#allocation7 + $0x2c8] sm:$0xff]  ;;  %v2186_v55 = vld [vmem:[#allocation7 + $0x2d8] sm:$0xff] }
 0x34a   : > { %3582 = vmatpush1.bf16.msra.mxu0 %v3581_v37  ;;  %v3621_v37 = vpack.c.bf16 %v2153_v0, %v2151_v33  ;;  %v2183_v0 = vld [vmem:[#allocation7 + $0x2c0] sm:$0xff] }
 0x34b   : > { %3584 = vmatprep.subr.bf16.mxu0 %v3583_v57  ;;  %v3623_v57 = vpack.c.bf16 %v2158_v36, %v2156_v35  ;;  %v2185_v35 = vld [vmem:[#allocation7 + $0x2d0] sm:$0xff]  ;;  %v2188_v36 = vld [vmem:[#allocation7 + $0x2e8] sm:$0xff] }
 0x34e   : > { %3586 = vmatpush1.bf16.msra.mxu0 %v3585_v38  ;;  %v2162_v38 = vld [vmem:[#allocation7 + $0x218] sm:$0xff] }
 0x34f   : > { %3588 = vmatprep.subr.bf16.mxu0 %v3587_v43  ;;  %v3627_v43 = vpack.c.bf16 %v2162_v38, %v2160_v42  ;;  %v2192_v42 = vld [vmem:[#allocation7 + $0x308] sm:$0xff]  ;;  %v2194_v38 = vld [vmem:[#allocation7 + $0x318] sm:$0xff] }
 0x352   : > { %3590 = vmatpush1.bf16.msra.mxu0 %v3589_v48 }
 0x353   : > { %3592 = vmatprep.subr.bf16.mxu0 %v3591_v49 }
 0x356   : > { %3594 = vmatpush1.bf16.msra.mxu0 %v3593_v61 }
 0x357   : > { %3596 = vmatprep.subr.bf16.mxu0 %v3595_v54  ;;  %v2159_v54 = vld [vmem:[#allocation7 + $0x200] sm:$0xff] }
 0x358   : > { %v3629_v62 = vpack.c.bf16 %v2161_v59, %v2159_v54  ;;  %v2200_v54 = vld [vmem:[#allocation7 + $0x348] sm:$0xff]  ;;  %v2202_v59 = vld [vmem:[#allocation7 + $0x358] sm:$0xff] }
 0x35a   : > { %3598 = vmatpush1.bf16.msra.mxu0 %v3597_v63 }
 0x35b   : > { %3600 = vmatprep.subr.bf16.mxu0 %v3599_v1  ;;  %v3631_v1 = vpack.c.bf16 %v2166_v60, %v2164_v30  ;;  %v3667_v60 = vpack.c.bf16 %v2202_v59, %v2200_v54  ;;  %v2590_v54 = vld [vmem:[#allocation9 + $0x38] sm:$0xff]  ;;  %v2607_v59 = vld [vmem:[#allocation9 + $0xc0] sm:$0xff] }
 0x35e   : > { %3602 = vmatpush1.bf16.msra.mxu0 %v3601_v6 }
 0x35f   : > { %3604 = vmatprep.subr.bf16.mxu0 %v3603_v7  ;;  %v3633_v7 = vpack.c.bf16 %v2165_v19, %v2163_v2  ;;  %v2206_v2 = vld [vmem:[#allocation7 + $0x378] sm:$0xff] }
 0x362   : > { %3606 = vmatpush1.bf16.msra.mxu0 %v3605_v12  ;;  %v2174_v12 = vld [vmem:[#allocation7 + $0x278] sm:$0xff] }
 0x363   : > { %3608 = vmatprep.subr.bf16.mxu0 %v3607_v13  ;;  %v3637_v13 = vpack.c.bf16 %v2169_v10, %v2167_v9  ;;  %v3639_v14 = vpack.c.bf16 %v2174_v12, %v2172_v11  ;;  %v2207_v10 = vld [vmem:[#allocation7 + $0x380] sm:$0xff]  ;;  %v2209_v11 = vld [vmem:[#allocation7 + $0x390] sm:$0xff]  ;;  %v2212_v12 = vld [vmem:[#allocation7 + $0x3a8] sm:$0xff] }
 0x366   : > { %3610 = vmatpush1.bf16.msra.mxu0 %v3609_v20  ;;  %v2178_v20 = vld [vmem:[#allocation7 + $0x298] sm:$0xff] }
 0x367   : > { %3612 = vmatprep.subr.bf16.mxu0 %v3611_v21  ;;  %v3641_v21 = vpack.c.bf16 %v2173_v16, %v2171_v15  ;;  %v3643_v22 = vpack.c.bf16 %v2178_v20, %v2176_v17  ;;  %v3677_v15 = vpack.c.bf16 %v2209_v11, %v2207_v10  ;;  %v2211_v17 = vld [vmem:[#allocation7 + $0x3a0] sm:$0xff]  ;;  %v2213_v20 = vld [vmem:[#allocation7 + $0x3b0] sm:$0xff] }
 0x368   : > { %v2595_v11 = vld [vmem:[#allocation9 + $0x60] sm:$0xff] }
 0x36a   : > { %3614 = vmatpush1.bf16.msra.mxu0 %v3613_v24  ;;  %v2177_v24 = vld [vmem:[#allocation7 + $0x290] sm:$0xff] }
 0x36b   : > { %3616 = vmatprep.subr.bf16.mxu0 %v3615_v27  ;;  %v3645_v27 = vpack.c.bf16 %v2177_v24, %v2175_v23  ;;  %v3681_v24 = vpack.c.bf16 %v2213_v20, %v2211_v17  ;;  %v2597_v17 = vld [vmem:[#allocation9 + $0x70] sm:$0xff]  ;;  %v2598_v20 = vld [vmem:[#allocation9 + $0x78] sm:$0xff] }
 0x36e   : > { %3618 = vmatpush1.bf16.msra.mxu0 %v3617_v32  ;;  %v2181_v32 = vld [vmem:[#allocation7 + $0x2b0] sm:$0xff] }
 0x36f   : > { %3620 = vmatprep.subr.bf16.mxu0 %v3619_v34  ;;  %v3649_v33 = vpack.c.bf16 %v2181_v32, %v2179_v31  ;;  %v3651_v34 = vpack.c.bf16 %v2186_v55, %v2184_v28  ;;  %v2222_v31 = vld [vmem:[#allocation7 + $0x3f8] sm:$0xff]  ;;  %v2219_v32 = vld [vmem:[#allocation7 + $0x3e0] sm:$0xff]  ;;  %v2221_v28 = vld [vmem:[#allocation7 + $0x3f0] sm:$0xff] }
 0x370   : > { %v3689_v55 = vpack.c.bf16 %v2221_v28, %v2219_v32 }
 0x372   : > { %3622 = vmatpush1.bf16.msra.mxu0 %v3621_v37  ;;  %v2190_v37 = vld [vmem:[#allocation7 + $0x2f8] sm:$0xff] }
 0x373   : > { %3624 = vmatprep.subr.bf16.mxu0 %v3623_v57  ;;  %v3653_v57 = vpack.c.bf16 %v2185_v35, %v2183_v0  ;;  %v3655_v39 = vpack.c.bf16 %v2190_v37, %v2188_v36  ;;  %v2583_v35 = vld [vmem:[#allocation9] sm:$0xff]  ;;  %v2584_v36 = vld [vmem:[#allocation9 + $0x8] sm:$0xff] }
 0x374   : > { %v3693_v37 = vpack.c.bf16 %v2584_v36, %v2583_v35 }
 0x376   : > { %3626 = vmatpush1.bf16.msra.mxu0 %v3625_v41  ;;  %v2189_v41 = vld [vmem:[#allocation7 + $0x2f0] sm:$0xff] }
 0x377   : > { %3628 = vmatprep.subr.bf16.mxu0 %v3627_v43  ;;  %v3657_v43 = vpack.c.bf16 %v2189_v41, %v2187_v40  ;;  %v2585_v41 = vld [vmem:[#allocation9 + $0x10] sm:$0xff] }
 0x40c   : > { %v1944_v48 = vpop.f32.mrb[4].mxu0  ;;  %v4344_v49 = vpop.f32.mrb[6].mxu1 }
 0x40d   : > { %v1946_v50 = vpop.f32.mrb[5].mxu0  ;;  %v2088_v51 = vpop.f32.mrb[7].mxu1  ;;  %v3733_v52 = vadd.f32 %v1944_v48, %v1790_v45  ;;  %v3659_v45 = vpack.c.bf16 %v2194_v38, %v2192_v42  ;;  %v2196_v48 = vld [vmem:[#allocation7 + $0x328] sm:$0xff]  ;;  %v2586_v42 = vld [vmem:[#allocation9 + $0x18] sm:$0xff] }
 0x40e   : > { %v3734_v53 = vadd.f32 %v1946_v50, %v1794_v46  ;;  %v3736_v61 = vadd.f32 %v2088_v51, %v1802_v47  ;;  %v2191_v46 = vld [vmem:[#allocation7 + $0x300] sm:$0xff]  ;;  %v2193_v47 = vld [vmem:[#allocation7 + $0x310] sm:$0xff]  ;;  %v2198_v50 = vld [vmem:[#allocation7 + $0x338] sm:$0xff]  ;;  %v3697_v38 = vpack.c.bf16 %v2586_v42, %v2585_v41 }
 0x40f   : > { %v3661_v51 = vpack.c.bf16 %v2193_v47, %v2191_v46  ;;  %v2587_v46 = vld [vmem:[#allocation9 + $0x20] sm:$0xff] }
 0x410   : > { %3848 = vtanh.f32 %v3734_v53  ;;  %v2195_v53 = vld [vmem:[#allocation7 + $0x320] sm:$0xff] }
 0x411   : > { %3850 = vtanh.f32 %v3733_v52  ;;  %v3663_v52 = vpack.c.bf16 %v2198_v50, %v2196_v48  ;;  %v2588_v48 = vld [vmem:[#allocation9 + $0x28] sm:$0xff]  ;;  %v2605_v50 = vld [vmem:[#allocation9 + $0xb0] sm:$0xff] }
 0x412   : > { %3852 = vtanh.f32 %v3736_v61  ;;  %v2197_v61 = vld [vmem:[#allocation7 + $0x330] sm:$0xff] }
 0x413   : > { %v3665_v30 = vpack.c.bf16 %v2197_v61, %v2195_v53  ;;  %v2589_v61 = vld [vmem:[#allocation9 + $0x30] sm:$0xff] }
 0x41a   : > { %v3849_v63 = vpop.eup %3848 }
 0x41b   : > { %v3851_v3 = vpop.eup %3850  ;;  %2299 = vmatprep.mubr.f32.mxu0 %v3849_v63  ;;  %v2201_v63 = vld [vmem:[#allocation7 + $0x350] sm:$0xff] }
 0x41c   : > { %v3853_v6 = vpop.eup %3852  ;;  %2300 = vmatmul.mubr.f32.vlgmr.msra.gmra.mrb[6].mxu0 %v3851_v3 }
 0x41d   : > { %3630 = vmatpush1.bf16.msra.mxu0 %v3629_v62  ;;  %2370 = vmatprep.mubr.f32.mxu0 %v3853_v6  ;;  %v2199_v62 = vld [vmem:[#allocation7 + $0x340] sm:$0xff]  ;;  %v2208_v6 = vld [vmem:[#allocation7 + $0x388] sm:$0xff] }
 0x41e   : > { %3632 = vmatprep.subr.bf16.mxu0 %v3631_v1  ;;  %v2204_v1 = vld [vmem:[#allocation7 + $0x368] sm:$0xff]  ;;  %v3669_v19 = vpack.c.bf16 %v2201_v63, %v2199_v62  ;;  %v2591_v63 = vld [vmem:[#allocation9 + $0x40] sm:$0xff] }
 0x41f   : > { %v3671_v3 = vpack.c.bf16 %v2206_v2, %v2204_v1  ;;  %v2592_v1 = vld [vmem:[#allocation9 + $0x48] sm:$0xff]  ;;  %v2609_v2 = vld [vmem:[#allocation9 + $0xd0] sm:$0xff] }
 0x421   : > { %3634 = vmatpush1.bf16.msra.mxu0 %v3633_v7  ;;  %v2210_v7 = vld [vmem:[#allocation7 + $0x398] sm:$0xff] }
 0x422   : > { %3636 = vmatprep.subr.bf16.mxu0 %v3635_v8  ;;  %v3673_v8 = vpack.c.bf16 %v2205_v5, %v2203_v4  ;;  %v3675_v9 = vpack.c.bf16 %v2210_v7, %v2208_v6  ;;  %v2593_v5 = vld [vmem:[#allocation9 + $0x50] sm:$0xff]  ;;  %v2594_v6 = vld [vmem:[#allocation9 + $0x58] sm:$0xff]  ;;  %v2611_v7 = vld [vmem:[#allocation9 + $0xe0] sm:$0xff] }
 0x425   : > { %3638 = vmatpush1.bf16.msra.mxu0 %v3637_v13  ;;  %v2214_v13 = vld [vmem:[#allocation7 + $0x3b8] sm:$0xff] }
 0x426   : > { %3640 = vmatprep.subr.bf16.mxu0 %v3639_v14  ;;  %v1798_v14 = vrot.slane %v4336_v44, %v4308_v18  ;;  %v3679_v16 = vpack.c.bf16 %v2214_v13, %v2212_v12  ;;  %v2596_v12 = vld [vmem:[#allocation9 + $0x68] sm:$0xff]  ;;  %v2613_v13 = vld [vmem:[#allocation9 + $0xf0] sm:$0xff] }
 0x428   : > { %v3735_v23 = vadd.f32 %v4344_v49, %v1798_v14  ;;  %v2614_v14 = vld [vmem:[#allocation9 + $0xf8] sm:$0xff] }
 0x429   : > { %3642 = vmatpush1.bf16.msra.mxu0 %v3641_v21  ;;  %v2216_v21 = vld [vmem:[#allocation7 + $0x3c8] sm:$0xff] }
 0x42a   : > { %3644 = vmatprep.subr.bf16.mxu0 %v3643_v22  ;;  %v2218_v22 = vld [vmem:[#allocation7 + $0x3d8] sm:$0xff]  ;;  %3854 = vtanh.f32 %v3735_v23 }
 0x42b   : > { %v3683_v25 = vpack.c.bf16 %v2218_v22, %v2216_v21  ;;  %v3721_v21 = vpack.c.bf16 %v2598_v20, %v2597_v17  ;;  %v2223_v22 = vld [vmem:[%s4469_s8] sm:$0x3] }
 0x42c   : > { %v2228_v23 = vrot.slane %v2223_v22, %v4293_v56 }
 0x42d   : > { %3646 = vmatpush1.bf16.msra.mxu0 %v3645_v27  ;;  %v2217_v27 = vld [vmem:[#allocation7 + $0x3d0] sm:$0xff] }
 0x42e   : > { %3648 = vmatprep.subr.bf16.mxu0 %v3647_v29  ;;  %v2220_v29 = vld [vmem:[#allocation7 + $0x3e8] sm:$0xff]  ;;  %v3685_v18 = vpack.c.bf16 %v2217_v27, %v2215_v26 }
 0x42f   : > { %v3687_v44 = vpack.c.bf16 %v2222_v31, %v2220_v29 }
 0x431   : > { %3650 = vmatpush1.bf16.msra.mxu0 %v3649_v33  ;;  %v2599_v33 = vld [vmem:[#allocation9 + $0x80] sm:$0xff] }
 0x432   : > { %3652 = vmatprep.subr.bf16.mxu0 %v3651_v34  ;;  %v2600_v34 = vld [vmem:[#allocation9 + $0x88] sm:$0xff] }
 0x433   : > { %v3691_v0 = vpack.c.bf16 %v2600_v34, %v2599_v33 }
 0x434   : > { %v3855_v49 = vpop.eup %3854 }
 0x435   : > { %3654 = vmatpush1.bf16.msra.mxu0 %v3653_v57  ;;  %3692 = vmatprep.subr.bf16.mxu1 %v3691_v0  ;;  %v2601_v57 = vld [vmem:[#allocation9 + $0x90] sm:$0xff] }
 0x436   : > { %3656 = vmatprep.subr.bf16.mxu0 %v3655_v39  ;;  %3694 = vmatpush3.bf16.msra.mxu1 %v3693_v37  ;;  %v2602_v39 = vld [vmem:[#allocation9 + $0x98] sm:$0xff] }
 0x437   : > { %v3695_v40 = vpack.c.bf16 %v2602_v39, %v2601_v57 }
 0x439   : > { %3658 = vmatpush1.bf16.msra.mxu0 %v3657_v43  ;;  %v2603_v43 = vld [vmem:[#allocation9 + $0xa0] sm:$0xff]  ;;  %3696 = vmatprep.subr.bf16.mxu1 %v3695_v40 }
 0x43a   : > { %3660 = vmatprep.subr.bf16.mxu0 %v3659_v45  ;;  %v2604_v45 = vld [vmem:[#allocation9 + $0xa8] sm:$0xff]  ;;  %3698 = vmatpush3.bf16.msra.mxu1 %v3697_v38  ;;  %v4036_v38 = vmov 683565275  }
 0x43b   : > { %v3699_v47 = vpack.c.bf16 %v2604_v45, %v2603_v43  ;;  %v4037_v45 = vmov 2475754826  }
 0x43d   : > { %3662 = vmatpush1.bf16.msra.mxu0 %v3661_v51  ;;  %v2606_v51 = vld [vmem:[#allocation9 + $0xb8] sm:$0xff]  ;;  %3700 = vmatprep.subr.bf16.mxu1 %v3699_v47 }
 0x43e   : > { %3664 = vmatprep.subr.bf16.mxu0 %v3663_v52  ;;  %v3701_v52 = vpack.c.bf16 %v2588_v48, %v2587_v46  ;;  %v3703_v53 = vpack.c.bf16 %v2606_v51, %v2605_v50  ;;  %v4038_v48 = vmov 2131351028   ;;  %v4039_v51 = vmov 2102212464  }
 0x440   : > { %3702 = vmatpush3.bf16.msra.mxu1 %v3701_v52 }
 0x441   : > { %3666 = vmatpush1.bf16.msra.mxu0 %v3665_v30  ;;  %v2608_v30 = vld [vmem:[#allocation9 + $0xc8] sm:$0xff]  ;;  %3704 = vmatprep.subr.bf16.mxu1 %v3703_v53  ;;  %v4040_v53 = vmov 920167782  }
 0x442   : > { %3668 = vmatprep.subr.bf16.mxu0 %v3667_v60  ;;  %v3705_v60 = vpack.c.bf16 %v2590_v54, %v2589_v61  ;;  %v3707_v62 = vpack.c.bf16 %v2608_v30, %v2607_v59 }
 0x444   : > { %3706 = vmatpush3.bf16.msra.mxu1 %v3705_v60 }
 0x445   : > { %3670 = vmatpush1.bf16.msra.mxu0 %v3669_v19  ;;  %v2610_v19 = vld [vmem:[#allocation9 + $0xd8] sm:$0xff]  ;;  %3708 = vmatprep.subr.bf16.mxu1 %v3707_v62 }
 0x446   : > { %3672 = vmatprep.subr.bf16.mxu0 %v3671_v3  ;;  %v3709_v3 = vpack.c.bf16 %v2592_v1, %v2591_v63  ;;  %v3711_v4 = vpack.c.bf16 %v2610_v19, %v2609_v2  ;;  %v4041_v63 = vmov 1326507024  }
 0x448   : > { %3710 = vmatpush3.bf16.msra.mxu1 %v3709_v3 }
 0x449   : > { %3674 = vmatpush1.bf16.msra.mxu0 %v3673_v8  ;;  %v2612_v8 = vld [vmem:[#allocation9 + $0xe8] sm:$0xff]  ;;  %3712 = vmatprep.subr.bf16.mxu1 %v3711_v4 }
 0x44a   : > { %3676 = vmatprep.subr.bf16.mxu0 %v3675_v9  ;;  %v3713_v9 = vpack.c.bf16 %v2594_v6, %v2593_v5  ;;  %v3715_v10 = vpack.c.bf16 %v2612_v8, %v2611_v7 }
 0x44c   : > { %3714 = vmatpush3.bf16.msra.mxu1 %v3713_v9 }
 0x44d   : > { %3678 = vmatpush1.bf16.msra.mxu0 %v3677_v15  ;;  %v3717_v15 = vpack.c.bf16 %v2596_v12, %v2595_v11  ;;  %3716 = vmatprep.subr.bf16.mxu1 %v3715_v10 }
 0x44e   : > { %3680 = vmatprep.subr.bf16.mxu0 %v3679_v16  ;;  %v3719_v16 = vpack.c.bf16 %v2614_v14, %v2613_v13 }
 0x450   : > { %3718 = vmatpush3.bf16.msra.mxu1 %v3717_v15 }
 0x451   : > { %3682 = vmatpush1.bf16.msra.mxu0 %v3681_v24  ;;  %3720 = vmatprep.subr.bf16.mxu1 %v3719_v16  ;;  %v2232_v24 = vrot.slane %v2223_v22, %v4301_v58 }
 0x452   : > { %3684 = vmatprep.subr.bf16.mxu0 %v3683_v25 }
 0x454   : > { %3722 = vmatpush3.bf16.msra.mxu1 %v3721_v21 }
 0x455   : > { %3686 = vmatpush1.bf16.msra.mxu0 %v3685_v18 }
 0x456   : > { %3688 = vmatprep.subr.bf16.mxu0 %v3687_v44 }
 0x459   : > { %3690 = vmatpush1.bf16.msra.mxu0 %v3689_v55 }
 0x45c   : > { %2371 = vmatmul.mubr.f32.vlgmr.msra.gmra.mrb[6].mxu0 %v3855_v49 }
 0x52f   : > { %v2372_v25 = vpop.f32.mrb[6].mxu0 }
 0x530   : > { %v4354_v26 = vadd.f32 %v2372_v25, %v2228_v23  ;;  %v2374_v27 = vpop.f32.mrb[7].mxu0 }
 0x531   : > { %v4356_v29 = vadd.f32 %v2374_v27, %v2232_v24 }
 0x532   : > { %v2377_v31 = vand.u32 2147483647, %v4354_v26  ;;  %v2380_v18 = vand.u32 2139095040, %v4354_v26  ;;  %vm2379_vm14 = vcmp.lt.s32.totalorder %v4354_v26, 0 }
 0x533   : > { %v2483_v44 = vand.u32 2139095040, %v4356_v29  ;;  %v2480_v0 = vand.u32 2147483647, %v4356_v29 }
 0x534   : > { %v2381_v32 = vshrl.u32 %v2380_v18, 23  ;;  %v2384_v28 = vand.u32 8388607, %v2377_v31  ;;  %vm4428_vm15 = vcmp.le.f32.partialorder %v2377_v31, 0.7853982 }
 0x535   : > { %v2484_v55 = vshrl.u32 %v2483_v44, 23  ;;  %v4370_v41 = vand.u32 8388607, %v2480_v0 }
 0x536   : > { %v2813_v56 = vadd.s32 4294967169, %v2381_v32  ;;  %v2385_v33 = vor.u32 8388608, %v2384_v28 }
 0x537   : > { %v2817_v49 = vadd.s32 4294967169, %v2484_v55 }
 0x538   : > { %v2387_v58 = vadd.s32 1, %v2813_v56  ;;  %v4364_v39 = vshll.u32 %v2385_v33, 8  ;;  %v2488_v56 = vor.u32 8388608, %v4370_v41 }
 0x539   : > { %v2490_v34 = vadd.s32 1, %v2817_v49 }
 0x53a   : > { %vm2388_vm0 = vcmp.gt.s32.totalorder %v2387_v58, 0 }
 0x53b   : > { %v2389_v35 = vsel %vm2388_vm0, %v2387_v58, 0  ;;  %vm2491_vm1 = vcmp.gt.s32.totalorder %v2490_v34, 0  ;;  %vm2482_vm0 = vcmp.lt.s32.totalorder %v4356_v29, 0 }
 0x53c   : > { %v2390_v36 = vshrl.u32 %v2389_v35, 5  ;;  %v2391_v37 = vand.u32 31, %v2389_v35  ;;  %v2492_v57 = vsel %vm2491_vm1, %v2490_v34, 0  ;;  %vm4440_vm1 = vcmp.le.f32.partialorder %v2480_v0, 0.7853982 }
 0x53d   : > { %v4366_v40 = vshrl.u32 %v2492_v57, 5  ;;  %v2494_v47 = vand.u32 31, %v2492_v57 }
 0x53e   : > { %v2392_v42 = vsub.s32 32, %v2391_v37  ;;  %v2394_v43 = vshll.u32 %v4036_v38, %v2391_v37  ;;  %v2397_v46 = vshll.u32 %v4037_v45, %v2391_v37  ;;  %v2400_v50 = vshll.u32 %v4038_v48, %v2391_v37 }
 0x53f   : > { %v2403_v52 = vshll.u32 %v4039_v51, %v2391_v37  ;;  %v2406_v61 = vshll.u32 %v4040_v53, %v2391_v37  ;;  %vm2409_vm2 = vcmp.lt.s32.totalorder %v2390_v36, 1  ;;  %vm2410_vm3 = vcmp.lt.s32.totalorder %v2390_v36, 2 }
 0x540   : > { %v2395_v54 = vshrl.u32 %v4037_v45, %v2392_v42  ;;  %v2398_v59 = vshrl.u32 %v4038_v48, %v2392_v42  ;;  %v2401_v30 = vshrl.u32 %v4039_v51, %v2392_v42  ;;  %v2393_v60 = vshrl.u32 %v4036_v38, %v2392_v42 }
 0x541   : > { %v2404_v62 = vshrl.u32 %v4040_v53, %v2392_v42  ;;  %v2407_v1 = vshrl.u32 %v4041_v63, %v2392_v42  ;;  %vm2411_vm4 = vcmp.lt.s32.totalorder %v2390_v36, 3  ;;  %v2495_v4 = vsub.s32 32, %v2494_v47 }
 0x542   : > { %v2396_v2 = vor.u32 %v2395_v54, %v2394_v43  ;;  %v2399_v19 = vor.u32 %v2398_v59, %v2397_v46  ;;  %v2402_v3 = vor.u32 %v2401_v30, %v2400_v50  ;;  %vm2412_vm5 = vcmp.lt.s32.totalorder %v2390_v36, 4 }
 0x543   : > { %v2405_v5 = vor.u32 %v2404_v62, %v2403_v52  ;;  %v2408_v6 = vor.u32 %v2407_v1, %v2406_v61  ;;  %v2506_v7 = vshll.u32 %v4039_v51, %v2494_v47  ;;  %v2507_v15 = vshrl.u32 %v4040_v53, %v2495_v4 }
 0x544   : > { %v2413_v8 = vsel %vm2409_vm2, %v2393_v60, %v2396_v2  ;;  %v2414_v9 = vsel %vm2412_vm5, %v2402_v3, 2102212464  ;;  %v2417_v10 = vsel %vm2409_vm2, %v2396_v2, %v2399_v19  ;;  %v2421_v11 = vsel %vm2409_vm2, %v2399_v19, %v2402_v3 }
 0x545   : > { %v2415_v12 = vsel %vm2411_vm4, %v2399_v19, %v2414_v9  ;;  %v2418_v13 = vsel %vm2412_vm5, %v2405_v5, 920167782  ;;  %v2422_v14 = vsel %vm2412_vm5, %v2408_v6, 1326507024  ;;  %v2510_v21 = vshrl.u32 %v4041_v63, %v2495_v4 }
 0x546   : > { %v2416_v16 = vsel %vm2410_vm3, %v2413_v8, %v2415_v12  ;;  %v2419_v17 = vsel %vm2411_vm4, %v2402_v3, %v2418_v13  ;;  %v2423_v20 = vsel %vm2411_vm4, %v2405_v5, %v2422_v14  ;;  %v2508_v24 = vor.u32 %v2507_v15, %v2506_v7 }
 0x547   : > { %v2420_v22 = vsel %vm2410_vm3, %v2417_v10, %v2419_v17  ;;  %v2424_v23 = vsel %vm2410_vm3, %v2421_v11, %v2423_v20  ;;  %v2509_v25 = vshll.u32 %v4040_v53, %v2494_v47  ;;  %v2432_v28 = vmul.u32 %v4364_v39, %v2416_v16 }
 0x548   : > { %v4384_v27 = vmul.u32.u64.low %v4364_v39, %v2424_v23  ;;  %v4385_v18 = vmul.u32.u64.high %v4364_v39, %v2424_v23, %v4384_v27  ;;  %v4388_v44 = vmul.u32.u64.low %v4364_v39, %v2420_v22  ;;  %v4389_v32 = vmul.u32.u64.high %v4364_v39, %v2420_v22, %v4388_v44 }
 0x549   : > { %v2511_v55 = vor.u32 %v2510_v21, %v2509_v25  ;;  %vm2515_vm6 = vcmp.lt.s32.totalorder %v4366_v40, 4  ;;  %v2497_v49 = vshll.u32 %v4036_v38, %v2494_v47  ;;  %v2498_v58 = vshrl.u32 %v4037_v45, %v2495_v4 }
 0x54a   : > { %v2501_v33 = vshrl.u32 %v4038_v48, %v2495_v4  ;;  %v2500_v35 = vshll.u32 %v4037_v45, %v2494_v47  ;;  %v2503_v36 = vshll.u32 %v4038_v48, %v2494_v47  ;;  %v2504_v37 = vshrl.u32 %v4039_v51, %v2495_v4 }
 0x54b   : > { %v2525_v34 = vsel %vm2515_vm6, %v2511_v55, 1326507024  ;;  %vm2434_vm7 = vc.u32 %v4385_v18, %v4388_v44  ;;  %v2435_v57 = vadd.s32 1, %v4389_v32  ;;  %v2521_v39 = vsel %vm2515_vm6, %v2508_v24, 920167782 }
 0x54c   : > { %v2499_v41 = vor.u32 %v2498_v58, %v2497_v49  ;;  %v2496_v42 = vshrl.u32 %v4036_v38, %v2495_v4  ;;  %v2502_v43 = vor.u32 %v2501_v33, %v2500_v35  ;;  %v2505_v46 = vor.u32 %v2504_v37, %v2503_v36 }
 0x54d   : > { %vm2514_vm8 = vcmp.lt.s32.totalorder %v4366_v40, 3  ;;  %v2436_v50 = vsel %vm2434_vm7, %v2435_v57, %v4389_v32  ;;  %vm2512_vm9 = vcmp.lt.s32.totalorder %v4366_v40, 1  ;;  %vm2513_vm10 = vcmp.lt.s32.totalorder %v4366_v40, 2 }
 0x54e   : > { %v2526_v45 = vsel %vm2514_vm8, %v2508_v24, %v2525_v34  ;;  %v2437_v47 = vadd.s32 %v2436_v50, %v2432_v28  ;;  %v2517_v48 = vsel %vm2515_vm6, %v2505_v46, 2102212464  ;;  %v2520_v51 = vsel %vm2512_vm9, %v2499_v41, %v2502_v43 }
 0x54f   : > { %v2522_v52 = vsel %vm2514_vm8, %v2505_v46, %v2521_v39  ;;  %v2524_v53 = vsel %vm2512_vm9, %v2502_v43, %v2505_v46  ;;  %v2528_v61 = vshll.u32 %v2488_v56, 8  ;;  %v2516_v59 = vsel %vm2512_vm9, %v2496_v42, %v2499_v41 }
 0x550   : > { %v2523_v38 = vsel %vm2513_vm10, %v2520_v51, %v2522_v52  ;;  %v2438_v54 = vadd.s32 536870912, %v2437_v47  ;;  %v2518_v30 = vsel %vm2514_vm8, %v2502_v43, %v2517_v48  ;;  %v2527_v60 = vsel %vm2513_vm10, %v2524_v53, %v2526_v45 }
 0x551   : > { %v4412_v62 = vmul.u32.u64.low %v2528_v61, %v2527_v60  ;;  %v4413_v63 = vmul.u32.u64.high %v2528_v61, %v2527_v60, %v4412_v62  ;;  %v4415_v1 = vmul.u32.u64.low %v2528_v61, %v2523_v38  ;;  %v4416_v2 = vmul.u32.u64.high %v2528_v61, %v2523_v38, %v4415_v1 }
 0x552   : > { %v2439_v19 = vshrl.u32 %v2438_v54, 30  ;;  %v2519_v3 = vsel %vm2513_vm10, %v2516_v59, %v2518_v30  ;;  %v2433_v20 = vadd.s32 %v4388_v44, %v4385_v18  ;;  %vm2469_vm5 = vweird.f32 %v4354_v26 }
 0x553   : > { %vm2537_vm11 = vc.u32 %v4413_v63, %v4415_v1  ;;  %v2538_v5 = vadd.s32 1, %v4416_v2  ;;  %v2535_v7 = vmul.u32 %v2528_v61, %v2519_v3  ;;  %v2536_v37 = vadd.s32 %v4415_v1, %v4413_v63 }
 0x554   : > { %v2440_v4 = vshll.u32 %v2439_v19, 30  ;;  %vm2572_vm9 = vweird.f32 %v4356_v29 }
 0x555   : > { %v2539_v8 = vsel %vm2537_vm11, %v2538_v5, %v4416_v2 }
 0x556   : > { %v2441_v6 = vsub.s32 %v2437_v47, %v2440_v4  ;;  %v2540_v10 = vadd.s32 %v2539_v8, %v2535_v7  ;;  %v2463_v47 = vsub.s32 4, %v2439_v19 }
 0x558   : > { %v2443_v9 = vsub.s32 0, %v2441_v6  ;;  %v2541_v12 = vadd.s32 536870912, %v2540_v10  ;;  %v2464_v53 = vsel %vm2379_vm14, %v2463_v47, %v2439_v19 }
 0x559   : > { %v2466_v31 = vsel %vm4428_vm15, 0, %v2464_v53 }
 0x55a   : > { %v2814_v11 = vmin.u32 %v2443_v9, %v2441_v6  ;;  %v2542_v14 = vshrl.u32 %v2541_v12, 30  ;;  %v2470_v62 = vand.u32 3, %v2466_v31 }
 0x55c   : > { %v2445_v13 = vclz %v2814_v11  ;;  %v2543_v16 = vshll.u32 %v2542_v14, 30  ;;  %v2566_v60 = vsub.s32 4, %v2542_v14  ;;  %vm2475_vm2 = vcmp.eq.s32.totalorder %v2470_v62, 2 }
 0x55d   : > { %vm2472_vm3 = vcmp.eq.s32.totalorder %v2470_v62, 0  ;;  %vm2471_vm4 = vcmp.lt.s32.totalorder %v2470_v62, 2 }
 0x55e   : > { %v2815_v15 = vadd.s32 4294967294, %v2445_v13  ;;  %v2544_v40 = vsub.s32 %v2540_v10, %v2543_v16  ;;  %v2567_v3 = vsel %vm2482_vm0, %v2566_v60, %v2542_v14 }
 0x560   : > { %vm2816_vm12 = vcmp.lt.s32.totalorder %v2815_v15, 0  ;;  %v2546_v23 = vsub.s32 0, %v2544_v40 }
 0x561   : > { %v2448_v17 = vsel %vm2816_vm12, 0, %v2815_v15 }
 0x562   : > { %v2449_v21 = vsub.s32 32, %v2448_v17  ;;  %v2453_v22 = vsub.s32 4294967266, %v2448_v17  ;;  %v2450_v24 = vshll.u32 %v2441_v6, %v2448_v17  ;;  %v2818_v32 = vmin.u32 %v2546_v23, %v2544_v40  ;;  %v2821_v17 = vld [vmem:[%s4471_s10] ss:$0 sm:$0xff] }
 0x563   : > { %v2569_v6 = vsel %vm4440_vm1, 0, %v2567_v3 }
 0x564   : > { %v2451_v25 = vshrl.u32 %v2433_v20, %v2449_v21  ;;  %v2454_v27 = vadd.s32 127, %v2453_v22  ;;  %v2548_v56 = vclz %v2818_v32  ;;  %v2573_v9 = vand.u32 3, %v2569_v6 }
 0x566   : > { %v2452_v28 = vor.u32 %v2451_v25, %v2450_v24  ;;  %v2455_v55 = vshll.u32 %v2454_v27, 23  ;;  %v2819_v58 = vadd.s32 4294967294, %v2548_v56  ;;  %vm2578_vm6 = vcmp.eq.s32.totalorder %v2573_v9, 2 }
 0x567   : > { %vm2575_vm7 = vcmp.eq.s32.totalorder %v2573_v9, 0  ;;  %vm2574_vm8 = vcmp.lt.s32.totalorder %v2573_v9, 2 }
 0x568   : > { %v2456_v49 = vor.u32 4788187, %v2455_v55  ;;  %v2459_v34 = vcvt.s32.f32 %v2452_v28  ;;  %vm2820_vm13 = vcmp.lt.s32.totalorder %v2819_v58, 0 }
 0x569   : > { %v2551_v35 = vsel %vm2820_vm13, 0, %v2819_v58 }
 0x56a   : > { %v2457_v33 = vand.u32 2147483647, %v2456_v49  ;;  %v2552_v18 = vsub.s32 32, %v2551_v35  ;;  %v2556_v44 = vsub.s32 4294967266, %v2551_v35  ;;  %v2553_v39 = vshll.u32 %v2544_v40, %v2551_v35 }
 0x56c   : > { %v2460_v36 = vmul.f32 %v2459_v34, %v2457_v33  ;;  %v2554_v41 = vshrl.u32 %v2536_v37, %v2552_v18  ;;  %v2557_v42 = vadd.s32 127, %v2556_v44 }
 0x56e   : > { %v2461_v57 = vxor.u32 2147483648, %v2460_v36  ;;  %v2555_v50 = vor.u32 %v2554_v41, %v2553_v39  ;;  %v2558_v45 = vshll.u32 %v2557_v42, 23 }
 0x570   : > { %v2462_v46 = vsel %vm2379_vm14, %v2461_v57, %v2460_v36  ;;  %v2559_v51 = vor.u32 4788187, %v2558_v45  ;;  %v2562_v38 = vcvt.s32.f32 %v2555_v50 }
 0x571   : > { %v2465_v48 = vsel %vm4428_vm15, %v4354_v26, %v2462_v46 }
 0x572   : > { %3856 = vcosq.f32 %v2465_v48  ;;  %v2560_v52 = vand.u32 2147483647, %v2559_v51 }
 0x573   : > { %3858 = vsinq.f32 %v2465_v48 }
 0x574   : > { %v2563_v61 = vmul.f32 %v2562_v38, %v2560_v52 }
 0x576   : > { %v2564_v54 = vxor.u32 2147483648, %v2563_v61 }
 0x578   : > { %v2565_v30 = vsel %vm2482_vm0, %v2564_v54, %v2563_v61 }
 0x579   : > { %v2568_v63 = vsel %vm4440_vm1, %v4356_v29, %v2565_v30 }
 0x57a   : > { %3860 = vcosq.f32 %v2568_v63 }
 0x57b   : > { %3862 = vsinq.f32 %v2568_v63 }
 0x57c   : > { %v3857_v1 = vpop.eup %3856 }
 0x57d   : > { %v3859_v2 = vpop.eup %3858  ;;  %v2476_v19 = vxor.u32 2147483648, %v3857_v1 }
 0x57e   : > { %v2473_v4 = vxor.u32 2147483648, %v3859_v2 }
 0x57f   : > { %v2477_v0 = vsel %vm2475_vm2, %v2476_v19, %v3859_v2 }
 0x580   : > { %v2474_v5 = vsel %vm2472_vm3, %v3857_v1, %v2473_v4 }
 0x581   : > { %v2478_v7 = vsel %vm2471_vm4, %v2474_v5, %v2477_v0 }
 0x582   : > { %v2479_v8 = vsel %vm2469_vm5, nan, %v2478_v7 }
 0x584   : > { %v3861_v10 = vpop.eup %3860 }
 0x585   : > { %v3863_v11 = vpop.eup %3862  ;;  %v2579_v12 = vxor.u32 2147483648, %v3861_v10 }
 0x586   : > { %v2576_v13 = vxor.u32 2147483648, %v3863_v11 }
 0x587   : > { %v2580_v14 = vsel %vm2578_vm6, %v2579_v12, %v3863_v11 }
 0x588   : > { %v2577_v15 = vsel %vm2575_vm7, %v3861_v10, %v2576_v13 }
 0x589   : > { %v2581_v16 = vsel %vm2574_vm8, %v2577_v15, %v2580_v14 }
 0x58a   : > { %v2582_v40 = vsel %vm2572_vm9, nan, %v2581_v16 }
 0x58b   : > { %2686 = vmatprep.mubr.f32.mxu1 %v2582_v40 }
 0x58c   : > { %2687 = vmatmul.mubr.f32.vlgmr.msra.gmra.mrb[8].mxu1 %v2479_v8 }
 0x65f   : > { %v2856_v26 = vpop.f32.mrb[8].mxu1 }
 0x660   : > { %v2857_v20 = vpop.f32.mrb[9].mxu1 }
 0x661   : > { %v2858_v21 = vadd.f32 %v2857_v20, %v2856_v26 }
 0x663   : > { %v2689_v22 = vadd.f32 %v2858_v21, %v2821_v17 }
 0x665   : > { %2692 = vst [vmem:[%s457_s26] sm:$0xff] %v2689_v22 }
 0x666 PF: > { %s24_s17 = sadd.s32 1, %s4022_s17  }
 0x667   : > { %p21_p1 = scmp.ge.s32.totalorder %s24_s17, 4  }
 0x669   :  { %23 = sbr.rel (!%p21_p1) target bundleno = 5 (0x5), region = 115 }
 0x670   :  { %2712 = vsyncpa [#allocation3], 1 }
 0x671   :  { %2714 = vsyncpa [#allocation3 + $0x1], 1 }
 0x672   :  { %2715 = vsyncpa [#allocation5], 1 }
 0x673   :  { %2716 = vsyncpa [#allocation8], 1 }

</bundles_post_ra>
